<compile_context>
chip_gen: v5e
topology: v5e:2x2
jax: 0.10.0
libtpu: 0.0.40
codegen_flags: <defaults>
</compile_context>

<pallas_src>
import numpy as np

import jax
import jax.numpy as jnp
from jax import lax
from jax.experimental import pallas as pl
from jax.experimental.pallas import tpu as pltpu

INPUT_SIZE = 63
HIDDEN_SIZE = 64            # H (per direction)
NUM_LAYERS = 2              # kernel below is specialized to the module's 2-layer bidi config
NUM_CLASSES = 4
H2 = 2 * HIDDEN_SIZE        # 128: [fwd | bwd] hidden packed along lanes
G3 = 3 * H2                 # 384: gate blocks [r | z | n], each 128-wide block = [fwd | bwd]
D0_PAD = 64                 # layer-0 input feature dim padded 63 -> 64 (lane alignment)
_UNROLL_MAX_T = 32          # fully unroll the time loop up to this length


# ----------------------------- in-kernel helpers ------------------------------


def _add_time_reversed(gi_ref, gb_ref, T):
    """gi[t] += gb[T-1-t] for all t. One shot, off the serial recurrence path."""
    if T <= _UNROLL_MAX_T:
        for t in range(T):                                  # static indices
            gi_ref[t] = gi_ref[t] + gb_ref[T - 1 - t]
    else:
        def body(t, c):
            gi_ref[t] = gi_ref[t] + gb_ref[T - 1 - t]
            return c
        lax.fori_loop(0, T, body, 0, unroll=4)


def _bigru_recurrence(gi_ref, whh, bhn, T, TB, y_ref=None, need_acc=False):
    """Fused fwd+bwd GRU recurrence on a lane-packed (TB, 128) hidden state.

    gi_ref: (T, TB, 3*H2) f32 scratch holding the hoisted input projection + b_ih (+ folded
            b_hr/b_hz). Row t packs (fwd gates of time t, bwd gates of time T-1-t).
    whh:    (H2, 3*H2) bf16 block-diagonal hidden->hidden weights.
    bhn:    (1, H2) f32 packed [b_hn_fwd | b_hn_bwd] (must stay inside r*(.)).
    y_ref:  optional (T, TB, H2) f32 output; y_ref[t] = [h_fwd(t) | h_bwd(T-1-t)].

    Returns sum_t of the packed hidden state when need_acc (order-invariant -> time-mean pool).
    """
    h0 = jnp.zeros((TB, H2), jnp.float32)
    acc0 = jnp.zeros((TB, H2), jnp.float32)
    bhn_b = jnp.broadcast_to(bhn, (TB, H2))        # hoisted: no per-step re-broadcast

    def step(t, h, acc):
        g = gi_ref[t]                                                       # (TB, 384) aligned
        gh = jnp.dot(h.astype(jnp.bfloat16), whh,
                     preferred_element_type=jnp.float32)                    # (TB, 384)
        r = jax.nn.sigmoid(g[:, 0:H2] + gh[:, 0:H2])
        z = jax.nn.sigmoid(g[:, H2:2 * H2] + gh[:, H2:2 * H2])
        n = jnp.tanh(g[:, 2 * H2:G3] + r * (gh[:, 2 * H2:G3] + bhn_b))
        h_new = (1.0 - z) * n + z * h
        if y_ref is not None:
            y_ref[t] = h_new.astype(y_ref.dtype)
        return h_new, (acc + h_new) if need_acc else acc

    if T <= _UNROLL_MAX_T:
        h, acc = h0, acc0
        for t in range(T):                                  # full unroll, static indices
            h, acc = step(t, h, acc)
    else:
        h, acc = lax.fori_loop(0, T, lambda t, c: step(t, *c), (h0, acc0), unroll=4)
    return acc


# ----------------------------- fused kernel ------------------------------------


def gru_fused_kernel(x_ref,
                     w0a_ref, w0b_ref, bi0_ref, whh0_ref, bhn0_ref,
                     w1a_ref, w1b_ref, bi1_ref, whh1_ref, bhn1_ref,
                     fcw_ref, fcb_ref,
                     o_ref,
                     gi_ref, gb_ref, y0_ref):
    """2-layer bidirectional GRU + time-mean pool + Linear, for one batch tile."""
    T, TB, D0 = x_ref.shape

    # ---- layer 0: hoisted input projection (all timesteps, both directions, one MXU pass each)
    x2 = x_ref[...].reshape(T * TB, D0).astype(jnp.bfloat16)
    gi_ref[...] = (jnp.dot(x2, w0a_ref[...], preferred_element_type=jnp.float32)
                   + bi0_ref[...]).reshape(T, TB, G3)
    gb_ref[...] = jnp.dot(x2, w0b_ref[...],
                          preferred_element_type=jnp.float32).reshape(T, TB, G3)
    _add_time_reversed(gi_ref, gb_ref, T)
    _bigru_recurrence(gi_ref, whh0_ref[...], bhn0_ref[...], T, TB, y_ref=y0_ref)

    # ---- layer 1: input = packed layer-0 hidden states, kept in VMEM (no HBM round trip) ----
    y2 = y0_ref[...].reshape(T * TB, H2).astype(jnp.bfloat16)
    gi_ref[...] = (jnp.dot(y2, w1a_ref[...], preferred_element_type=jnp.float32)
                   + bi1_ref[...]).reshape(T, TB, G3)
    gb_ref[...] = jnp.dot(y2, w1b_ref[...],
                          preferred_element_type=jnp.float32).reshape(T, TB, G3)
    _add_time_reversed(gi_ref, gb_ref, T)
    acc = _bigru_recurrence(gi_ref, whh1_ref[...], bhn1_ref[...], T, TB,
                            y_ref=None, need_acc=True)

    # ---- global time-average pool + Linear (fused; last layer output never hits HBM) ----
    pooled = acc * (1.0 / T)                                                # (TB, H2) f32
    o_ref[...] = (jnp.dot(pooled, fcw_ref[...], preferred_element_type=jnp.float32)
                  + fcb_ref[...])


# ----------------------------- wrapper ------------------------------------------


def _batch_tiling(B):
    """Pad batch to a multiple of 8; tile by <=128 rows per grid step."""
    tb_max = 128
    bp = -(-B // 8) * 8
    if bp <= tb_max:
        return bp, bp
    bp = -(-B // tb_max) * tb_max
    return bp, tb_max


def _full_spec(a):
    return pl.BlockSpec(a.shape, lambda b: (0,) * a.ndim)


def gru_fused_call(xt, p, TB):
    """xt: (T, Bp, D0_PAD) f32, Bp % TB == 0. Returns (Bp, NUM_CLASSES) f32 logits."""
    T, Bp, D0 = xt.shape
    grid = (Bp // TB,)
    return pl.pallas_call(
        gru_fused_kernel,
        out_shape=jax.ShapeDtypeStruct((Bp, NUM_CLASSES), jnp.float32),
        grid=grid,
        in_specs=[
            pl.BlockSpec((T, TB, D0), lambda b: (0, b, 0)),
            _full_spec(p["w0a"]), _full_spec(p["w0b"]), _full_spec(p["bi0"]),
            _full_spec(p["whh0"]), _full_spec(p["bhn0"]),
            _full_spec(p["w1a"]), _full_spec(p["w1b"]), _full_spec(p["bi1"]),
            _full_spec(p["whh1"]), _full_spec(p["bhn1"]),
            _full_spec(p["fc_w"]), _full_spec(p["fc_b"]),
        ],
        out_specs=pl.BlockSpec((TB, NUM_CLASSES), lambda b: (b, 0)),
        scratch_shapes=[
            pltpu.VMEM((T, TB, G3), jnp.float32),   # gi (reused by both layers)
            pltpu.VMEM((T, TB, G3), jnp.float32),   # gb (time-reversed half, both layers)
            pltpu.VMEM((T, TB, H2), jnp.float32),   # y0 (layer-0 packed hidden states)
        ],
        compiler_params=pltpu.CompilerParams(
            dimension_semantics=("parallel",),          # shard batch tiles across TCs (v7x)
            vmem_limit_bytes=32 * 1024 * 1024,          # footprint here <1 MiB; raises v5e 16MiB default
        ),
    )(xt, p["w0a"], p["w0b"], p["bi0"], p["whh0"], p["bhn0"],
      p["w1a"], p["w1b"], p["bi1"], p["whh1"], p["bhn1"],
      p["fc_w"], p["fc_b"])


@jax.jit
def gru_model_forward(x, packed):
    """x: (B, T, INPUT_SIZE) batch_first -> logits (B, NUM_CLASSES). Eval semantics."""
    B, T, _ = x.shape
    Bp, TB = _batch_tiling(B)
    xt = jnp.transpose(x, (1, 0, 2)).astype(jnp.float32)                       # (T, B, 63)
    xt = jnp.pad(xt, ((0, 0), (0, Bp - B), (0, D0_PAD - INPUT_SIZE)))          # (T, Bp, 64)
    logits = gru_fused_call(xt, packed, TB)                                    # (Bp, C)
    return logits[:B]


# ----------------------------- parameters ---------------------------------------


def init_params(key):
    """PyTorch-like uniform(-1/sqrt(H), 1/sqrt(H)) init; raw (per-direction) layout.

    Per layer & direction: W_ih (Din, 3H), W_hh (H, 3H), b_ih (3H,), b_hh (3H,),
    gate column order [r | z | n]. fc_w (2H, C), fc_b (C,).
    """
    params = {}
    bound = 1.0 / np.sqrt(HIDDEN_SIZE)
    for layer in range(NUM_LAYERS):
        d_in = INPUT_SIZE if layer == 0 else H2
        for d in range(2):
            key, k1, k2, k3, k4 = jax.random.split(key, 5)
            params[f"l{layer}_d{d}"] = (
                jax.random.uniform(k1, (d_in, 3 * HIDDEN_SIZE), jnp.float32, -bound, bound),
                jax.random.uniform(k2, (HIDDEN_SIZE, 3 * HIDDEN_SIZE), jnp.float32, -bound, bound),
                jax.random.uniform(k3, (3 * HIDDEN_SIZE,), jnp.float32, -bound, bound),
                jax.random.uniform(k4, (3 * HIDDEN_SIZE,), jnp.float32, -bound, bound),
            )
    key, k1, k2 = jax.random.split(key, 3)
    fb = 1.0 / np.sqrt(H2)
    params["fc_w"] = jax.random.uniform(k1, (H2, NUM_CLASSES), jnp.float32, -fb, fb)
    params["fc_b"] = jax.random.uniform(k2, (NUM_CLASSES,), jnp.float32, -fb, fb)
    return params


def _np(a):
    return np.asarray(jax.device_get(a), np.float32)


def _place(dst, row_sl, w, half):
    """Scatter per-direction gate weights w (rows, 3H) into dst[row_sl] at the fwd (half=0)
    or bwd (half=1) 64-wide half of each 128-wide gate column block [r|z|n]."""
    H = HIDDEN_SIZE
    for g in range(3):
        dst[row_sl, g * H2 + half * H: g * H2 + (half + 1) * H] = w[:, g * H:(g + 1) * H]


def _pack_whh(whh_f, whh_b):
    """Block-diagonal (H2, 3*H2): fwd hidden only feeds fwd gate cols, bwd only bwd cols."""
    out = np.zeros((H2, G3), np.float32)
    _place(out, slice(0, HIDDEN_SIZE), whh_f, 0)
    _place(out, slice(HIDDEN_SIZE, H2), whh_b, 1)
    return out


def _pack_bias(bih_f, bih_b, bhh_f, bhh_b):
    """Packed hoisted bias (b_ih for all gates, b_hr/b_hz folded in) and separate b_hn."""
    H = HIDDEN_SIZE
    bi = np.zeros((1, G3), np.float32)
    for g in range(3):
        bi[0, g * H2:g * H2 + H] = bih_f[g * H:(g + 1) * H]
        bi[0, g * H2 + H:(g + 1) * H2] = bih_b[g * H:(g + 1) * H]
        if g < 2:   # b_hr / b_hz are purely additive -> fold into the hoisted projection
            bi[0, g * H2:g * H2 + H] += bhh_f[g * H:(g + 1) * H]
            bi[0, g * H2 + H:(g + 1) * H2] += bhh_b[g * H:(g + 1) * H]
    bhn = np.zeros((1, H2), np.float32)
    bhn[0, 0:H] = bhh_f[2 * H:3 * H]
    bhn[0, H:H2] = bhh_b[2 * H:3 * H]
    return bi, bhn


def pack_params(raw):
    """Pre-pack raw weights into the fused, lane-aligned kernel layout (host-side, once).

    W*a is applied to the time-aligned input row, W*b to the time-reversed row, so the kernel
    never needs a concat([x, flip(x)]) input. Matmul weights are stored in bfloat16.
    """
    H = HIDDEN_SIZE
    p = {}

    # ---------- layer 0 (input = x[t] padded to 64 features) ----------
    wih_f, whh_f, bih_f, bhh_f = [_np(a) for a in raw["l0_d0"]]
    wih_b, whh_b, bih_b, bhh_b = [_np(a) for a in raw["l0_d1"]]
    w0a = np.zeros((D0_PAD, G3), np.float32)     # x[t]      -> fwd gate halves
    w0b = np.zeros((D0_PAD, G3), np.float32)     # x[T-1-t]  -> bwd gate halves
    _place(w0a, slice(0, INPUT_SIZE), wih_f, 0)
    _place(w0b, slice(0, INPUT_SIZE), wih_b, 1)
    p["w0a"] = jnp.asarray(w0a, jnp.bfloat16)
    p["w0b"] = jnp.asarray(w0b, jnp.bfloat16)
    p["whh0"] = jnp.asarray(_pack_whh(whh_f, whh_b), jnp.bfloat16)
    bi0, bhn0 = _pack_bias(bih_f, bih_b, bhh_f, bhh_b)
    p["bi0"], p["bhn0"] = jnp.asarray(bi0), jnp.asarray(bhn0)

    # ---------- layer 1 (input = y0[t] = [h_fwd(t) | h_bwd(T-1-t)]) ----------
    wih_f, whh_f, bih_f, bhh_f = [_np(a) for a in raw["l1_d0"]]
    wih_b, whh_b, bih_b, bhh_b = [_np(a) for a in raw["l1_d1"]]
    w1a = np.zeros((H2, G3), np.float32)         # applied to y0[t]
    w1b = np.zeros((H2, G3), np.float32)         # applied to y0[T-1-t]
    _place(w1a, slice(0, H), wih_f[0:H], 0)      # h_fwd(t)      -> fwd gates
    _place(w1a, slice(H, H2), wih_b[H:H2], 1)    # h_bwd(T-1-t)  -> bwd gates
    _place(w1b, slice(H, H2), wih_f[H:H2], 0)    # h_bwd(t)      -> fwd gates
    _place(w1b, slice(0, H), wih_b[0:H], 1)      # h_fwd(T-1-t)  -> bwd gates
    p["w1a"] = jnp.asarray(w1a, jnp.bfloat16)
    p["w1b"] = jnp.asarray(w1b, jnp.bfloat16)
    p["whh1"] = jnp.asarray(_pack_whh(whh_f, whh_b), jnp.bfloat16)
    bi1, bhn1 = _pack_bias(bih_f, bih_b, bhh_f, bhh_b)
    p["bi1"], p["bhn1"] = jnp.asarray(bi1), jnp.asarray(bhn1)

    p["fc_w"] = jnp.asarray(_np(raw["fc_w"]))                       # (H2, C) f32
    p["fc_b"] = jnp.asarray(_np(raw["fc_b"]).reshape(1, NUM_CLASSES))
    return p


# ----------------------------- pure-JAX reference -------------------------------


def _gru_cell_ref(x_t, h, w):
    wih, whh, bih, bhh = w
    H = HIDDEN_SIZE
    gi = x_t @ wih + bih
    gh = h @ whh + bhh
    r = jax.nn.sigmoid(gi[:, 0:H] + gh[:, 0:H])
    z = jax.nn.sigmoid(gi[:, H:2 * H] + gh[:, H:2 * H])
    n = jnp.tanh(gi[:, 2 * H:] + r * gh[:, 2 * H:])
    return (1.0 - z) * n + z * h


def gru_model_reference(x, raw):
    """Plain-JAX f32 reference with PyTorch nn.GRU (eval) semantics, for validation."""
    B, T, _ = x.shape
    feat = jnp.transpose(x, (1, 0, 2)).astype(jnp.float32)
    for layer in range(NUM_LAYERS):
        wf, wb = raw[f"l{layer}_d0"], raw[f"l{layer}_d1"]
        hf = jnp.zeros((B, HIDDEN_SIZE), jnp.float32)
        hb = jnp.zeros((B, HIDDEN_SIZE), jnp.float32)
        ys_f, ys_b = [None] * T, [None] * T
        for t in range(T):
            hf = _gru_cell_ref(feat[t], hf, wf)
            ys_f[t] = hf
        for t in range(T - 1, -1, -1):
            hb = _gru_cell_ref(feat[t], hb, wb)
            ys_b[t] = hb
        feat = jnp.stack([jnp.concatenate([ys_f[t], ys_b[t]], axis=-1) for t in range(T)], 0)
    pooled = jnp.mean(feat, axis=0)
    return pooled @ raw["fc_w"] + raw["fc_b"]


# ----------------------------- main ----------------------------------------------


if __name__ == "__main__":
    key = jax.random.PRNGKey(0)
    k_param, k_x = jax.random.split(key)
    raw = init_params(k_param)
    packed = pack_params(raw)

    B, T = 2, 8
    x = jax.random.normal(k_x, (B, T, INPUT_SIZE), jnp.float32)

    out = jax.block_until_ready(gru_model_forward(x, packed))
    assert out.shape == (B, NUM_CLASSES), out.shape

    ref = jax.block_until_ready(gru_model_reference(x, raw))
    # bf16 matmul weights vs. all-f32 reference -> loose-ish tolerance.
    np.testing.assert_allclose(np.asarray(out), np.asarray(ref), rtol=6e-2, atol=6e-2)

    print("KERNEL_OK")
</pallas_src>

<mosaic_0001>
module attributes {stable_mosaic.version = 11 : i64} {
  func.func @gru_fused_kernel(%arg0: i32, %arg1: memref<8x8x64xf32, #tpu.memory_space<vmem>>, %arg2: memref<64x384xbf16, #tpu.memory_space<vmem>>, %arg3: memref<64x384xbf16, #tpu.memory_space<vmem>>, %arg4: memref<1x384xf32, #tpu.memory_space<vmem>>, %arg5: memref<128x384xbf16, #tpu.memory_space<vmem>>, %arg6: memref<1x128xf32, #tpu.memory_space<vmem>>, %arg7: memref<128x384xbf16, #tpu.memory_space<vmem>>, %arg8: memref<128x384xbf16, #tpu.memory_space<vmem>>, %arg9: memref<1x384xf32, #tpu.memory_space<vmem>>, %arg10: memref<128x384xbf16, #tpu.memory_space<vmem>>, %arg11: memref<1x128xf32, #tpu.memory_space<vmem>>, %arg12: memref<128x4xf32, #tpu.memory_space<vmem>>, %arg13: memref<1x4xf32, #tpu.memory_space<vmem>>, %arg14: memref<8x4xf32, #tpu.memory_space<vmem>>, %arg15: memref<8x8x384xf32, #tpu.memory_space<vmem>>, %arg16: memref<8x8x384xf32, #tpu.memory_space<vmem>>, %arg17: memref<8x8x128xf32, #tpu.memory_space<vmem>>) attributes {dimension_semantics = [#tpu.dimension_semantics<parallel>], iteration_bounds = array<i64: 1>, scalar_prefetch = 0 : i64, scratch_operands = 3 : i64, tpu.core_type = #tpu.core_type<tc>, window_params = [{transform_indices = @transform_0, window_bounds = array<i64: 8, 8, 64>}, {pipeline_mode = #tpu.pipeline_mode<synchronous>, transform_indices = @transform_1, window_bounds = array<i64: 64, 384>}, {pipeline_mode = #tpu.pipeline_mode<synchronous>, transform_indices = @transform_2, window_bounds = array<i64: 64, 384>}, {pipeline_mode = #tpu.pipeline_mode<synchronous>, transform_indices = @transform_3, window_bounds = array<i64: 1, 384>}, {pipeline_mode = #tpu.pipeline_mode<synchronous>, transform_indices = @transform_4, window_bounds = array<i64: 128, 384>}, {pipeline_mode = #tpu.pipeline_mode<synchronous>, transform_indices = @transform_5, window_bounds = array<i64: 1, 128>}, {pipeline_mode = #tpu.pipeline_mode<synchronous>, transform_indices = @transform_6, window_bounds = array<i64: 128, 384>}, {pipeline_mode = #tpu.pipeline_mode<synchronous>, transform_indices = @transform_7, window_bounds = array<i64: 128, 384>}, {pipeline_mode = #tpu.pipeline_mode<synchronous>, transform_indices = @transform_8, window_bounds = array<i64: 1, 384>}, {pipeline_mode = #tpu.pipeline_mode<synchronous>, transform_indices = @transform_9, window_bounds = array<i64: 128, 384>}, {pipeline_mode = #tpu.pipeline_mode<synchronous>, transform_indices = @transform_10, window_bounds = array<i64: 1, 128>}, {pipeline_mode = #tpu.pipeline_mode<synchronous>, transform_indices = @transform_11, window_bounds = array<i64: 128, 4>}, {pipeline_mode = #tpu.pipeline_mode<synchronous>, transform_indices = @transform_12, window_bounds = array<i64: 1, 4>}, {transform_indices = @transform_13, window_bounds = array<i64: 8, 4>}]} {
    %c0 = arith.constant 0 : index
    %c0_0 = arith.constant 0 : index
    %c0_1 = arith.constant 0 : index
    %0 = vector.load %arg1[%c0, %c0_0, %c0_1] : memref<8x8x64xf32, #tpu.memory_space<vmem>>, vector<8x8x64xf32>
    %1 = vector.shape_cast %0 : vector<8x8x64xf32> to vector<64x64xf32>
    %2 = arith.truncf %1 : vector<64x64xf32> to vector<64x64xbf16>
    %c0_2 = arith.constant 0 : index
    %c0_3 = arith.constant 0 : index
    %3 = vector.load %arg2[%c0_2, %c0_3] : memref<64x384xbf16, #tpu.memory_space<vmem>>, vector<64x384xbf16>
    %cst = arith.constant dense<0.000000e+00> : vector<64x384xf32>
    %4 = tpu.matmul %2, %3, %cst {dimension_numbers = #tpu.dot_dimension_numbers<[1], [0], [0], [1], [0, 0, 1, 1], [], []>} : vector<64x64xbf16>, vector<64x384xbf16>, vector<64x384xf32> -> vector<64x384xf32>
    %c0_4 = arith.constant 0 : index
    %c0_5 = arith.constant 0 : index
    %5 = vector.load %arg4[%c0_4, %c0_5] : memref<1x384xf32, #tpu.memory_space<vmem>>, vector<1x384xf32>
    %6 = vector.broadcast %5 : vector<1x384xf32> to vector<64x384xf32>
    %7 = arith.addf %4, %6 : vector<64x384xf32>
    %8 = vector.shape_cast %7 : vector<64x384xf32> to vector<8x8x384xf32>
    %c0_6 = arith.constant 0 : index
    %c0_7 = arith.constant 0 : index
    %c0_8 = arith.constant 0 : index
    %9 = vector.load %arg15[%c0_6, %c0_7, %c0_8] : memref<8x8x384xf32, #tpu.memory_space<vmem>>, vector<8x8x384xf32>
    tpu.vector_store %arg15[%c0_6, %c0_7, %c0_8], %8 {strides = array<i32>} : memref<8x8x384xf32, #tpu.memory_space<vmem>>, vector<8x8x384xf32>,
    %c0_9 = arith.constant 0 : index
    %c0_10 = arith.constant 0 : index
    %10 = vector.load %arg3[%c0_9, %c0_10] : memref<64x384xbf16, #tpu.memory_space<vmem>>, vector<64x384xbf16>
    %cst_11 = arith.constant dense<0.000000e+00> : vector<64x384xf32>
    %11 = tpu.matmul %2, %10, %cst_11 {dimension_numbers = #tpu.dot_dimension_numbers<[1], [0], [0], [1], [0, 0, 1, 1], [], []>} : vector<64x64xbf16>, vector<64x384xbf16>, vector<64x384xf32> -> vector<64x384xf32>
    %12 = vector.shape_cast %11 : vector<64x384xf32> to vector<8x8x384xf32>
    %c0_12 = arith.constant 0 : index
    %c0_13 = arith.constant 0 : index
    %c0_14 = arith.constant 0 : index
    %13 = vector.load %arg16[%c0_12, %c0_13, %c0_14] : memref<8x8x384xf32, #tpu.memory_space<vmem>>, vector<8x8x384xf32>
    tpu.vector_store %arg16[%c0_12, %c0_13, %c0_14], %12 {strides = array<i32>} : memref<8x8x384xf32, #tpu.memory_space<vmem>>, vector<8x8x384xf32>,
    %c0_15 = arith.constant 0 : index
    %c0_16 = arith.constant 0 : index
    %c0_17 = arith.constant 0 : index
    %14 = vector.load %arg15[%c0_15, %c0_16, %c0_17] : memref<8x8x384xf32, #tpu.memory_space<vmem>>, vector<1x8x384xf32>
    %15 = vector.shape_cast %14 : vector<1x8x384xf32> to vector<8x384xf32>
    %c7 = arith.constant 7 : index
    %c0_18 = arith.constant 0 : index
    %c0_19 = arith.constant 0 : index
    %16 = vector.load %arg16[%c7, %c0_18, %c0_19] : memref<8x8x384xf32, #tpu.memory_space<vmem>>, vector<1x8x384xf32>
    %17 = vector.shape_cast %16 : vector<1x8x384xf32> to vector<8x384xf32>
    %18 = arith.addf %15, %17 : vector<8x384xf32>
    %c0_20 = arith.constant 0 : index
    %c0_21 = arith.constant 0 : index
    %c0_22 = arith.constant 0 : index
    %19 = vector.load %arg15[%c0_20, %c0_21, %c0_22] : memref<8x8x384xf32, #tpu.memory_space<vmem>>, vector<1x8x384xf32>
    %20 = vector.shape_cast %19 : vector<1x8x384xf32> to vector<8x384xf32>
    %21 = vector.shape_cast %18 : vector<8x384xf32> to vector<1x8x384xf32>
    tpu.vector_store %arg15[%c0_20, %c0_21, %c0_22], %21 {strides = array<i32>} : memref<8x8x384xf32, #tpu.memory_space<vmem>>, vector<1x8x384xf32>,
    %c1 = arith.constant 1 : index
    %c0_23 = arith.constant 0 : index
    %c0_24 = arith.constant 0 : index
    %22 = vector.load %arg15[%c1, %c0_23, %c0_24] : memref<8x8x384xf32, #tpu.memory_space<vmem>>, vector<1x8x384xf32>
    %23 = vector.shape_cast %22 : vector<1x8x384xf32> to vector<8x384xf32>
    %c6 = arith.constant 6 : index
    %c0_25 = arith.constant 0 : index
    %c0_26 = arith.constant 0 : index
    %24 = vector.load %arg16[%c6, %c0_25, %c0_26] : memref<8x8x384xf32, #tpu.memory_space<vmem>>, vector<1x8x384xf32>
    %25 = vector.shape_cast %24 : vector<1x8x384xf32> to vector<8x384xf32>
    %26 = arith.addf %23, %25 : vector<8x384xf32>
    %c1_27 = arith.constant 1 : index
    %c0_28 = arith.constant 0 : index
    %c0_29 = arith.constant 0 : index
    %27 = vector.load %arg15[%c1_27, %c0_28, %c0_29] : memref<8x8x384xf32, #tpu.memory_space<vmem>>, vector<1x8x384xf32>
    %28 = vector.shape_cast %27 : vector<1x8x384xf32> to vector<8x384xf32>
    %29 = vector.shape_cast %26 : vector<8x384xf32> to vector<1x8x384xf32>
    tpu.vector_store %arg15[%c1_27, %c0_28, %c0_29], %29 {strides = array<i32>} : memref<8x8x384xf32, #tpu.memory_space<vmem>>, vector<1x8x384xf32>,
    %c2 = arith.constant 2 : index
    %c0_30 = arith.constant 0 : index
    %c0_31 = arith.constant 0 : index
    %30 = vector.load %arg15[%c2, %c0_30, %c0_31] : memref<8x8x384xf32, #tpu.memory_space<vmem>>, vector<1x8x384xf32>
    %31 = vector.shape_cast %30 : vector<1x8x384xf32> to vector<8x384xf32>
    %c5 = arith.constant 5 : index
    %c0_32 = arith.constant 0 : index
    %c0_33 = arith.constant 0 : index
    %32 = vector.load %arg16[%c5, %c0_32, %c0_33] : memref<8x8x384xf32, #tpu.memory_space<vmem>>, vector<1x8x384xf32>
    %33 = vector.shape_cast %32 : vector<1x8x384xf32> to vector<8x384xf32>
    %34 = arith.addf %31, %33 : vector<8x384xf32>
    %c2_34 = arith.constant 2 : index
    %c0_35 = arith.constant 0 : index
    %c0_36 = arith.constant 0 : index
    %35 = vector.load %arg15[%c2_34, %c0_35, %c0_36] : memref<8x8x384xf32, #tpu.memory_space<vmem>>, vector<1x8x384xf32>
    %36 = vector.shape_cast %35 : vector<1x8x384xf32> to vector<8x384xf32>
    %37 = vector.shape_cast %34 : vector<8x384xf32> to vector<1x8x384xf32>
    tpu.vector_store %arg15[%c2_34, %c0_35, %c0_36], %37 {strides = array<i32>} : memref<8x8x384xf32, #tpu.memory_space<vmem>>, vector<1x8x384xf32>,
    %c3 = arith.constant 3 : index
    %c0_37 = arith.constant 0 : index
    %c0_38 = arith.constant 0 : index
    %38 = vector.load %arg15[%c3, %c0_37, %c0_38] : memref<8x8x384xf32, #tpu.memory_space<vmem>>, vector<1x8x384xf32>
    %39 = vector.shape_cast %38 : vector<1x8x384xf32> to vector<8x384xf32>
    %c4 = arith.constant 4 : index
    %c0_39 = arith.constant 0 : index
    %c0_40 = arith.constant 0 : index
    %40 = vector.load %arg16[%c4, %c0_39, %c0_40] : memref<8x8x384xf32, #tpu.memory_space<vmem>>, vector<1x8x384xf32>
    %41 = vector.shape_cast %40 : vector<1x8x384xf32> to vector<8x384xf32>
    %42 = arith.addf %39, %41 : vector<8x384xf32>
    %c3_41 = arith.constant 3 : index
    %c0_42 = arith.constant 0 : index
    %c0_43 = arith.constant 0 : index
    %43 = vector.load %arg15[%c3_41, %c0_42, %c0_43] : memref<8x8x384xf32, #tpu.memory_space<vmem>>, vector<1x8x384xf32>
    %44 = vector.shape_cast %43 : vector<1x8x384xf32> to vector<8x384xf32>
    %45 = vector.shape_cast %42 : vector<8x384xf32> to vector<1x8x384xf32>
    tpu.vector_store %arg15[%c3_41, %c0_42, %c0_43], %45 {strides = array<i32>} : memref<8x8x384xf32, #tpu.memory_space<vmem>>, vector<1x8x384xf32>,
    %c4_44 = arith.constant 4 : index
    %c0_45 = arith.constant 0 : index
    %c0_46 = arith.constant 0 : index
    %46 = vector.load %arg15[%c4_44, %c0_45, %c0_46] : memref<8x8x384xf32, #tpu.memory_space<vmem>>, vector<1x8x384xf32>
    %47 = vector.shape_cast %46 : vector<1x8x384xf32> to vector<8x384xf32>
    %c3_47 = arith.constant 3 : index
    %c0_48 = arith.constant 0 : index
    %c0_49 = arith.constant 0 : index
    %48 = vector.load %arg16[%c3_47, %c0_48, %c0_49] : memref<8x8x384xf32, #tpu.memory_space<vmem>>, vector<1x8x384xf32>
    %49 = vector.shape_cast %48 : vector<1x8x384xf32> to vector<8x384xf32>
    %50 = arith.addf %47, %49 : vector<8x384xf32>
    %c4_50 = arith.constant 4 : index
    %c0_51 = arith.constant 0 : index
    %c0_52 = arith.constant 0 : index
    %51 = vector.load %arg15[%c4_50, %c0_51, %c0_52] : memref<8x8x384xf32, #tpu.memory_space<vmem>>, vector<1x8x384xf32>
    %52 = vector.shape_cast %51 : vector<1x8x384xf32> to vector<8x384xf32>
    %53 = vector.shape_cast %50 : vector<8x384xf32> to vector<1x8x384xf32>
    tpu.vector_store %arg15[%c4_50, %c0_51, %c0_52], %53 {strides = array<i32>} : memref<8x8x384xf32, #tpu.memory_space<vmem>>, vector<1x8x384xf32>,
    %c5_53 = arith.constant 5 : index
    %c0_54 = arith.constant 0 : index
    %c0_55 = arith.constant 0 : index
    %54 = vector.load %arg15[%c5_53, %c0_54, %c0_55] : memref<8x8x384xf32, #tpu.memory_space<vmem>>, vector<1x8x384xf32>
    %55 = vector.shape_cast %54 : vector<1x8x384xf32> to vector<8x384xf32>
    %c2_56 = arith.constant 2 : index
    %c0_57 = arith.constant 0 : index
    %c0_58 = arith.constant 0 : index
    %56 = vector.load %arg16[%c2_56, %c0_57, %c0_58] : memref<8x8x384xf32, #tpu.memory_space<vmem>>, vector<1x8x384xf32>
    %57 = vector.shape_cast %56 : vector<1x8x384xf32> to vector<8x384xf32>
    %58 = arith.addf %55, %57 : vector<8x384xf32>
    %c5_59 = arith.constant 5 : index
    %c0_60 = arith.constant 0 : index
    %c0_61 = arith.constant 0 : index
    %59 = vector.load %arg15[%c5_59, %c0_60, %c0_61] : memref<8x8x384xf32, #tpu.memory_space<vmem>>, vector<1x8x384xf32>
    %60 = vector.shape_cast %59 : vector<1x8x384xf32> to vector<8x384xf32>
    %61 = vector.shape_cast %58 : vector<8x384xf32> to vector<1x8x384xf32>
    tpu.vector_store %arg15[%c5_59, %c0_60, %c0_61], %61 {strides = array<i32>} : memref<8x8x384xf32, #tpu.memory_space<vmem>>, vector<1x8x384xf32>,
    %c6_62 = arith.constant 6 : index
    %c0_63 = arith.constant 0 : index
    %c0_64 = arith.constant 0 : index
    %62 = vector.load %arg15[%c6_62, %c0_63, %c0_64] : memref<8x8x384xf32, #tpu.memory_space<vmem>>, vector<1x8x384xf32>
    %63 = vector.shape_cast %62 : vector<1x8x384xf32> to vector<8x384xf32>
    %c1_65 = arith.constant 1 : index
    %c0_66 = arith.constant 0 : index
    %c0_67 = arith.constant 0 : index
    %64 = vector.load %arg16[%c1_65, %c0_66, %c0_67] : memref<8x8x384xf32, #tpu.memory_space<vmem>>, vector<1x8x384xf32>
    %65 = vector.shape_cast %64 : vector<1x8x384xf32> to vector<8x384xf32>
    %66 = arith.addf %63, %65 : vector<8x384xf32>
    %c6_68 = arith.constant 6 : index
    %c0_69 = arith.constant 0 : index
    %c0_70 = arith.constant 0 : index
    %67 = vector.load %arg15[%c6_68, %c0_69, %c0_70] : memref<8x8x384xf32, #tpu.memory_space<vmem>>, vector<1x8x384xf32>
    %68 = vector.shape_cast %67 : vector<1x8x384xf32> to vector<8x384xf32>
    %69 = vector.shape_cast %66 : vector<8x384xf32> to vector<1x8x384xf32>
    tpu.vector_store %arg15[%c6_68, %c0_69, %c0_70], %69 {strides = array<i32>} : memref<8x8x384xf32, #tpu.memory_space<vmem>>, vector<1x8x384xf32>,
    %c7_71 = arith.constant 7 : index
    %c0_72 = arith.constant 0 : index
    %c0_73 = arith.constant 0 : index
    %70 = vector.load %arg15[%c7_71, %c0_72, %c0_73] : memref<8x8x384xf32, #tpu.memory_space<vmem>>, vector<1x8x384xf32>
    %71 = vector.shape_cast %70 : vector<1x8x384xf32> to vector<8x384xf32>
    %c0_74 = arith.constant 0 : index
    %c0_75 = arith.constant 0 : index
    %c0_76 = arith.constant 0 : index
    %72 = vector.load %arg16[%c0_74, %c0_75, %c0_76] : memref<8x8x384xf32, #tpu.memory_space<vmem>>, vector<1x8x384xf32>
    %73 = vector.shape_cast %72 : vector<1x8x384xf32> to vector<8x384xf32>
    %74 = arith.addf %71, %73 : vector<8x384xf32>
    %c7_77 = arith.constant 7 : index
    %c0_78 = arith.constant 0 : index
    %c0_79 = arith.constant 0 : index
    %75 = vector.load %arg15[%c7_77, %c0_78, %c0_79] : memref<8x8x384xf32, #tpu.memory_space<vmem>>, vector<1x8x384xf32>
    %76 = vector.shape_cast %75 : vector<1x8x384xf32> to vector<8x384xf32>
    %77 = vector.shape_cast %74 : vector<8x384xf32> to vector<1x8x384xf32>
    tpu.vector_store %arg15[%c7_77, %c0_78, %c0_79], %77 {strides = array<i32>} : memref<8x8x384xf32, #tpu.memory_space<vmem>>, vector<1x8x384xf32>,
    %c0_80 = arith.constant 0 : index
    %c0_81 = arith.constant 0 : index
    %78 = vector.load %arg5[%c0_80, %c0_81] : memref<128x384xbf16, #tpu.memory_space<vmem>>, vector<128x384xbf16>
    %c0_82 = arith.constant 0 : index
    %c0_83 = arith.constant 0 : index
    %79 = vector.load %arg6[%c0_82, %c0_83] : memref<1x128xf32, #tpu.memory_space<vmem>>, vector<1x128xf32>
    %cst_84 = arith.constant 0.000000e+00 : f32
    %80 = vector.broadcast %cst_84 : f32 to vector<8x128xf32>
    %81 = vector.shape_cast %79 : vector<1x128xf32> to vector<1x128xf32>
    %82 = vector.broadcast %81 : vector<1x128xf32> to vector<8x128xf32>
    %c0_85 = arith.constant 0 : index
    %c0_86 = arith.constant 0 : index
    %c0_87 = arith.constant 0 : index
    %83 = vector.load %arg15[%c0_85, %c0_86, %c0_87] : memref<8x8x384xf32, #tpu.memory_space<vmem>>, vector<1x8x384xf32>
    %84 = vector.shape_cast %83 : vector<1x8x384xf32> to vector<8x384xf32>
    %85 = arith.truncf %80 : vector<8x128xf32> to vector<8x128xbf16>
    %cst_88 = arith.constant dense<0.000000e+00> : vector<8x384xf32>
    %86 = tpu.matmul %85, %78, %cst_88 {dimension_numbers = #tpu.dot_dimension_numbers<[1], [0], [0], [1], [0, 0, 1, 1], [], []>} : vector<8x128xbf16>, vector<128x384xbf16>, vector<8x384xf32> -> vector<8x384xf32>
    %87 = vector.extract_strided_slice %84 {offsets = [0, 0], sizes = [8, 128], strides = [1, 1]} : vector<8x384xf32> to vector<8x128xf32>
    %88 = vector.extract_strided_slice %86 {offsets = [0, 0], sizes = [8, 128], strides = [1, 1]} : vector<8x384xf32> to vector<8x128xf32>
    %89 = arith.addf %87, %88 : vector<8x128xf32>
    %90 = arith.negf %89 : vector<8x128xf32>
    %91 = math.exp %90 : vector<8x128xf32>
    %cst_89 = arith.constant 1.000000e+00 : f32
    %92 = vector.broadcast %cst_89 : f32 to vector<8x128xf32>
    %93 = arith.addf %92, %91 : vector<8x128xf32>
    %94 = arith.divf %92, %93 : vector<8x128xf32>
    %95 = vector.extract_strided_slice %84 {offsets = [0, 128], sizes = [8, 128], strides = [1, 1]} : vector<8x384xf32> to vector<8x128xf32>
    %96 = vector.extract_strided_slice %86 {offsets = [0, 128], sizes = [8, 128], strides = [1, 1]} : vector<8x384xf32> to vector<8x128xf32>
    %97 = arith.addf %95, %96 : vector<8x128xf32>
    %98 = arith.negf %97 : vector<8x128xf32>
    %99 = math.exp %98 : vector<8x128xf32>
    %cst_90 = arith.constant 1.000000e+00 : f32
    %100 = vector.broadcast %cst_90 : f32 to vector<8x128xf32>
    %101 = arith.addf %100, %99 : vector<8x128xf32>
    %102 = arith.divf %100, %101 : vector<8x128xf32>
    %103 = vector.extract_strided_slice %84 {offsets = [0, 256], sizes = [8, 128], strides = [1, 1]} : vector<8x384xf32> to vector<8x128xf32>
    %104 = vector.extract_strided_slice %86 {offsets = [0, 256], sizes = [8, 128], strides = [1, 1]} : vector<8x384xf32> to vector<8x128xf32>
    %105 = arith.addf %104, %82 : vector<8x128xf32>
    %106 = arith.mulf %94, %105 : vector<8x128xf32>
    %107 = arith.addf %103, %106 : vector<8x128xf32>
    %108 = math.tanh %107 : vector<8x128xf32>
    %cst_91 = arith.constant 1.000000e+00 : f32
    %109 = vector.broadcast %cst_91 : f32 to vector<8x128xf32>
    %110 = arith.subf %109, %102 : vector<8x128xf32>
    %111 = arith.mulf %110, %108 : vector<8x128xf32>
    %112 = arith.mulf %102, %80 : vector<8x128xf32>
    %113 = arith.addf %111, %112 : vector<8x128xf32>
    %c0_92 = arith.constant 0 : index
    %c0_93 = arith.constant 0 : index
    %c0_94 = arith.constant 0 : index
    %114 = vector.load %arg17[%c0_92, %c0_93, %c0_94] : memref<8x8x128xf32, #tpu.memory_space<vmem>>, vector<1x8x128xf32>
    %115 = vector.shape_cast %114 : vector<1x8x128xf32> to vector<8x128xf32>
    %116 = vector.shape_cast %113 : vector<8x128xf32> to vector<1x8x128xf32>
    tpu.vector_store %arg17[%c0_92, %c0_93, %c0_94], %116 {strides = array<i32>} : memref<8x8x128xf32, #tpu.memory_space<vmem>>, vector<1x8x128xf32>,
    %c1_95 = arith.constant 1 : index
    %c0_96 = arith.constant 0 : index
    %c0_97 = arith.constant 0 : index
    %117 = vector.load %arg15[%c1_95, %c0_96, %c0_97] : memref<8x8x384xf32, #tpu.memory_space<vmem>>, vector<1x8x384xf32>
    %118 = vector.shape_cast %117 : vector<1x8x384xf32> to vector<8x384xf32>
    %119 = arith.truncf %113 : vector<8x128xf32> to vector<8x128xbf16>
    %cst_98 = arith.constant dense<0.000000e+00> : vector<8x384xf32>
    %120 = tpu.matmul %119, %78, %cst_98 {dimension_numbers = #tpu.dot_dimension_numbers<[1], [0], [0], [1], [0, 0, 1, 1], [], []>} : vector<8x128xbf16>, vector<128x384xbf16>, vector<8x384xf32> -> vector<8x384xf32>
    %121 = vector.extract_strided_slice %118 {offsets = [0, 0], sizes = [8, 128], strides = [1, 1]} : vector<8x384xf32> to vector<8x128xf32>
    %122 = vector.extract_strided_slice %120 {offsets = [0, 0], sizes = [8, 128], strides = [1, 1]} : vector<8x384xf32> to vector<8x128xf32>
    %123 = arith.addf %121, %122 : vector<8x128xf32>
    %124 = arith.negf %123 : vector<8x128xf32>
    %125 = math.exp %124 : vector<8x128xf32>
    %cst_99 = arith.constant 1.000000e+00 : f32
    %126 = vector.broadcast %cst_99 : f32 to vector<8x128xf32>
    %127 = arith.addf %126, %125 : vector<8x128xf32>
    %128 = arith.divf %126, %127 : vector<8x128xf32>
    %129 = vector.extract_strided_slice %118 {offsets = [0, 128], sizes = [8, 128], strides = [1, 1]} : vector<8x384xf32> to vector<8x128xf32>
    %130 = vector.extract_strided_slice %120 {offsets = [0, 128], sizes = [8, 128], strides = [1, 1]} : vector<8x384xf32> to vector<8x128xf32>
    %131 = arith.addf %129, %130 : vector<8x128xf32>
    %132 = arith.negf %131 : vector<8x128xf32>
    %133 = math.exp %132 : vector<8x128xf32>
    %cst_100 = arith.constant 1.000000e+00 : f32
    %134 = vector.broadcast %cst_100 : f32 to vector<8x128xf32>
    %135 = arith.addf %134, %133 : vector<8x128xf32>
    %136 = arith.divf %134, %135 : vector<8x128xf32>
    %137 = vector.extract_strided_slice %118 {offsets = [0, 256], sizes = [8, 128], strides = [1, 1]} : vector<8x384xf32> to vector<8x128xf32>
    %138 = vector.extract_strided_slice %120 {offsets = [0, 256], sizes = [8, 128], strides = [1, 1]} : vector<8x384xf32> to vector<8x128xf32>
    %139 = arith.addf %138, %82 : vector<8x128xf32>
    %140 = arith.mulf %128, %139 : vector<8x128xf32>
    %141 = arith.addf %137, %140 : vector<8x128xf32>
    %142 = math.tanh %141 : vector<8x128xf32>
    %cst_101 = arith.constant 1.000000e+00 : f32
    %143 = vector.broadcast %cst_101 : f32 to vector<8x128xf32>
    %144 = arith.subf %143, %136 : vector<8x128xf32>
    %145 = arith.mulf %144, %142 : vector<8x128xf32>
    %146 = arith.mulf %136, %113 : vector<8x128xf32>
    %147 = arith.addf %145, %146 : vector<8x128xf32>
    %c1_102 = arith.constant 1 : index
    %c0_103 = arith.constant 0 : index
    %c0_104 = arith.constant 0 : index
    %148 = vector.load %arg17[%c1_102, %c0_103, %c0_104] : memref<8x8x128xf32, #tpu.memory_space<vmem>>, vector<1x8x128xf32>
    %149 = vector.shape_cast %148 : vector<1x8x128xf32> to vector<8x128xf32>
    %150 = vector.shape_cast %147 : vector<8x128xf32> to vector<1x8x128xf32>
    tpu.vector_store %arg17[%c1_102, %c0_103, %c0_104], %150 {strides = array<i32>} : memref<8x8x128xf32, #tpu.memory_space<vmem>>, vector<1x8x128xf32>,
    %c2_105 = arith.constant 2 : index
    %c0_106 = arith.constant 0 : index
    %c0_107 = arith.constant 0 : index
    %151 = vector.load %arg15[%c2_105, %c0_106, %c0_107] : memref<8x8x384xf32, #tpu.memory_space<vmem>>, vector<1x8x384xf32>
    %152 = vector.shape_cast %151 : vector<1x8x384xf32> to vector<8x384xf32>
    %153 = arith.truncf %147 : vector<8x128xf32> to vector<8x128xbf16>
    %cst_108 = arith.constant dense<0.000000e+00> : vector<8x384xf32>
    %154 = tpu.matmul %153, %78, %cst_108 {dimension_numbers = #tpu.dot_dimension_numbers<[1], [0], [0], [1], [0, 0, 1, 1], [], []>} : vector<8x128xbf16>, vector<128x384xbf16>, vector<8x384xf32> -> vector<8x384xf32>
    %155 = vector.extract_strided_slice %152 {offsets = [0, 0], sizes = [8, 128], strides = [1, 1]} : vector<8x384xf32> to vector<8x128xf32>
    %156 = vector.extract_strided_slice %154 {offsets = [0, 0], sizes = [8, 128], strides = [1, 1]} : vector<8x384xf32> to vector<8x128xf32>
    %157 = arith.addf %155, %156 : vector<8x128xf32>
    %158 = arith.negf %157 : vector<8x128xf32>
    %159 = math.exp %158 : vector<8x128xf32>
    %cst_109 = arith.constant 1.000000e+00 : f32
    %160 = vector.broadcast %cst_109 : f32 to vector<8x128xf32>
    %161 = arith.addf %160, %159 : vector<8x128xf32>
    %162 = arith.divf %160, %161 : vector<8x128xf32>
    %163 = vector.extract_strided_slice %152 {offsets = [0, 128], sizes = [8, 128], strides = [1, 1]} : vector<8x384xf32> to vector<8x128xf32>
    %164 = vector.extract_strided_slice %154 {offsets = [0, 128], sizes = [8, 128], strides = [1, 1]} : vector<8x384xf32> to vector<8x128xf32>
    %165 = arith.addf %163, %164 : vector<8x128xf32>
    %166 = arith.negf %165 : vector<8x128xf32>
    %167 = math.exp %166 : vector<8x128xf32>
    %cst_110 = arith.constant 1.000000e+00 : f32
    %168 = vector.broadcast %cst_110 : f32 to vector<8x128xf32>
    %169 = arith.addf %168, %167 : vector<8x128xf32>
    %170 = arith.divf %168, %169 : vector<8x128xf32>
    %171 = vector.extract_strided_slice %152 {offsets = [0, 256], sizes = [8, 128], strides = [1, 1]} : vector<8x384xf32> to vector<8x128xf32>
    %172 = vector.extract_strided_slice %154 {offsets = [0, 256], sizes = [8, 128], strides = [1, 1]} : vector<8x384xf32> to vector<8x128xf32>
    %173 = arith.addf %172, %82 : vector<8x128xf32>
    %174 = arith.mulf %162, %173 : vector<8x128xf32>
    %175 = arith.addf %171, %174 : vector<8x128xf32>
    %176 = math.tanh %175 : vector<8x128xf32>
    %cst_111 = arith.constant 1.000000e+00 : f32
    %177 = vector.broadcast %cst_111 : f32 to vector<8x128xf32>
    %178 = arith.subf %177, %170 : vector<8x128xf32>
    %179 = arith.mulf %178, %176 : vector<8x128xf32>
    %180 = arith.mulf %170, %147 : vector<8x128xf32>
    %181 = arith.addf %179, %180 : vector<8x128xf32>
    %c2_112 = arith.constant 2 : index
    %c0_113 = arith.constant 0 : index
    %c0_114 = arith.constant 0 : index
    %182 = vector.load %arg17[%c2_112, %c0_113, %c0_114] : memref<8x8x128xf32, #tpu.memory_space<vmem>>, vector<1x8x128xf32>
    %183 = vector.shape_cast %182 : vector<1x8x128xf32> to vector<8x128xf32>
    %184 = vector.shape_cast %181 : vector<8x128xf32> to vector<1x8x128xf32>
    tpu.vector_store %arg17[%c2_112, %c0_113, %c0_114], %184 {strides = array<i32>} : memref<8x8x128xf32, #tpu.memory_space<vmem>>, vector<1x8x128xf32>,
    %c3_115 = arith.constant 3 : index
    %c0_116 = arith.constant 0 : index
    %c0_117 = arith.constant 0 : index
    %185 = vector.load %arg15[%c3_115, %c0_116, %c0_117] : memref<8x8x384xf32, #tpu.memory_space<vmem>>, vector<1x8x384xf32>
    %186 = vector.shape_cast %185 : vector<1x8x384xf32> to vector<8x384xf32>
    %187 = arith.truncf %181 : vector<8x128xf32> to vector<8x128xbf16>
    %cst_118 = arith.constant dense<0.000000e+00> : vector<8x384xf32>
    %188 = tpu.matmul %187, %78, %cst_118 {dimension_numbers = #tpu.dot_dimension_numbers<[1], [0], [0], [1], [0, 0, 1, 1], [], []>} : vector<8x128xbf16>, vector<128x384xbf16>, vector<8x384xf32> -> vector<8x384xf32>
    %189 = vector.extract_strided_slice %186 {offsets = [0, 0], sizes = [8, 128], strides = [1, 1]} : vector<8x384xf32> to vector<8x128xf32>
    %190 = vector.extract_strided_slice %188 {offsets = [0, 0], sizes = [8, 128], strides = [1, 1]} : vector<8x384xf32> to vector<8x128xf32>
    %191 = arith.addf %189, %190 : vector<8x128xf32>
    %192 = arith.negf %191 : vector<8x128xf32>
    %193 = math.exp %192 : vector<8x128xf32>
    %cst_119 = arith.constant 1.000000e+00 : f32
    %194 = vector.broadcast %cst_119 : f32 to vector<8x128xf32>
    %195 = arith.addf %194, %193 : vector<8x128xf32>
    %196 = arith.divf %194, %195 : vector<8x128xf32>
    %197 = vector.extract_strided_slice %186 {offsets = [0, 128], sizes = [8, 128], strides = [1, 1]} : vector<8x384xf32> to vector<8x128xf32>
    %198 = vector.extract_strided_slice %188 {offsets = [0, 128], sizes = [8, 128], strides = [1, 1]} : vector<8x384xf32> to vector<8x128xf32>
    %199 = arith.addf %197, %198 : vector<8x128xf32>
    %200 = arith.negf %199 : vector<8x128xf32>
    %201 = math.exp %200 : vector<8x128xf32>
    %cst_120 = arith.constant 1.000000e+00 : f32
    %202 = vector.broadcast %cst_120 : f32 to vector<8x128xf32>
    %203 = arith.addf %202, %201 : vector<8x128xf32>
    %204 = arith.divf %202, %203 : vector<8x128xf32>
    %205 = vector.extract_strided_slice %186 {offsets = [0, 256], sizes = [8, 128], strides = [1, 1]} : vector<8x384xf32> to vector<8x128xf32>
    %206 = vector.extract_strided_slice %188 {offsets = [0, 256], sizes = [8, 128], strides = [1, 1]} : vector<8x384xf32> to vector<8x128xf32>
    %207 = arith.addf %206, %82 : vector<8x128xf32>
    %208 = arith.mulf %196, %207 : vector<8x128xf32>
    %209 = arith.addf %205, %208 : vector<8x128xf32>
    %210 = math.tanh %209 : vector<8x128xf32>
    %cst_121 = arith.constant 1.000000e+00 : f32
    %211 = vector.broadcast %cst_121 : f32 to vector<8x128xf32>
    %212 = arith.subf %211, %204 : vector<8x128xf32>
    %213 = arith.mulf %212, %210 : vector<8x128xf32>
    %214 = arith.mulf %204, %181 : vector<8x128xf32>
    %215 = arith.addf %213, %214 : vector<8x128xf32>
    %c3_122 = arith.constant 3 : index
    %c0_123 = arith.constant 0 : index
    %c0_124 = arith.constant 0 : index
    %216 = vector.load %arg17[%c3_122, %c0_123, %c0_124] : memref<8x8x128xf32, #tpu.memory_space<vmem>>, vector<1x8x128xf32>
    %217 = vector.shape_cast %216 : vector<1x8x128xf32> to vector<8x128xf32>
    %218 = vector.shape_cast %215 : vector<8x128xf32> to vector<1x8x128xf32>
    tpu.vector_store %arg17[%c3_122, %c0_123, %c0_124], %218 {strides = array<i32>} : memref<8x8x128xf32, #tpu.memory_space<vmem>>, vector<1x8x128xf32>,
    %c4_125 = arith.constant 4 : index
    %c0_126 = arith.constant 0 : index
    %c0_127 = arith.constant 0 : index
    %219 = vector.load %arg15[%c4_125, %c0_126, %c0_127] : memref<8x8x384xf32, #tpu.memory_space<vmem>>, vector<1x8x384xf32>
    %220 = vector.shape_cast %219 : vector<1x8x384xf32> to vector<8x384xf32>
    %221 = arith.truncf %215 : vector<8x128xf32> to vector<8x128xbf16>
    %cst_128 = arith.constant dense<0.000000e+00> : vector<8x384xf32>
    %222 = tpu.matmul %221, %78, %cst_128 {dimension_numbers = #tpu.dot_dimension_numbers<[1], [0], [0], [1], [0, 0, 1, 1], [], []>} : vector<8x128xbf16>, vector<128x384xbf16>, vector<8x384xf32> -> vector<8x384xf32>
    %223 = vector.extract_strided_slice %220 {offsets = [0, 0], sizes = [8, 128], strides = [1, 1]} : vector<8x384xf32> to vector<8x128xf32>
    %224 = vector.extract_strided_slice %222 {offsets = [0, 0], sizes = [8, 128], strides = [1, 1]} : vector<8x384xf32> to vector<8x128xf32>
    %225 = arith.addf %223, %224 : vector<8x128xf32>
    %226 = arith.negf %225 : vector<8x128xf32>
    %227 = math.exp %226 : vector<8x128xf32>
    %cst_129 = arith.constant 1.000000e+00 : f32
    %228 = vector.broadcast %cst_129 : f32 to vector<8x128xf32>
    %229 = arith.addf %228, %227 : vector<8x128xf32>
    %230 = arith.divf %228, %229 : vector<8x128xf32>
    %231 = vector.extract_strided_slice %220 {offsets = [0, 128], sizes = [8, 128], strides = [1, 1]} : vector<8x384xf32> to vector<8x128xf32>
    %232 = vector.extract_strided_slice %222 {offsets = [0, 128], sizes = [8, 128], strides = [1, 1]} : vector<8x384xf32> to vector<8x128xf32>
    %233 = arith.addf %231, %232 : vector<8x128xf32>
    %234 = arith.negf %233 : vector<8x128xf32>
    %235 = math.exp %234 : vector<8x128xf32>
    %cst_130 = arith.constant 1.000000e+00 : f32
    %236 = vector.broadcast %cst_130 : f32 to vector<8x128xf32>
    %237 = arith.addf %236, %235 : vector<8x128xf32>
    %238 = arith.divf %236, %237 : vector<8x128xf32>
    %239 = vector.extract_strided_slice %220 {offsets = [0, 256], sizes = [8, 128], strides = [1, 1]} : vector<8x384xf32> to vector<8x128xf32>
    %240 = vector.extract_strided_slice %222 {offsets = [0, 256], sizes = [8, 128], strides = [1, 1]} : vector<8x384xf32> to vector<8x128xf32>
    %241 = arith.addf %240, %82 : vector<8x128xf32>
    %242 = arith.mulf %230, %241 : vector<8x128xf32>
    %243 = arith.addf %239, %242 : vector<8x128xf32>
    %244 = math.tanh %243 : vector<8x128xf32>
    %cst_131 = arith.constant 1.000000e+00 : f32
    %245 = vector.broadcast %cst_131 : f32 to vector<8x128xf32>
    %246 = arith.subf %245, %238 : vector<8x128xf32>
    %247 = arith.mulf %246, %244 : vector<8x128xf32>
    %248 = arith.mulf %238, %215 : vector<8x128xf32>
    %249 = arith.addf %247, %248 : vector<8x128xf32>
    %c4_132 = arith.constant 4 : index
    %c0_133 = arith.constant 0 : index
    %c0_134 = arith.constant 0 : index
    %250 = vector.load %arg17[%c4_132, %c0_133, %c0_134] : memref<8x8x128xf32, #tpu.memory_space<vmem>>, vector<1x8x128xf32>
    %251 = vector.shape_cast %250 : vector<1x8x128xf32> to vector<8x128xf32>
    %252 = vector.shape_cast %249 : vector<8x128xf32> to vector<1x8x128xf32>
    tpu.vector_store %arg17[%c4_132, %c0_133, %c0_134], %252 {strides = array<i32>} : memref<8x8x128xf32, #tpu.memory_space<vmem>>, vector<1x8x128xf32>,
    %c5_135 = arith.constant 5 : index
    %c0_136 = arith.constant 0 : index
    %c0_137 = arith.constant 0 : index
    %253 = vector.load %arg15[%c5_135, %c0_136, %c0_137] : memref<8x8x384xf32, #tpu.memory_space<vmem>>, vector<1x8x384xf32>
    %254 = vector.shape_cast %253 : vector<1x8x384xf32> to vector<8x384xf32>
    %255 = arith.truncf %249 : vector<8x128xf32> to vector<8x128xbf16>
    %cst_138 = arith.constant dense<0.000000e+00> : vector<8x384xf32>
    %256 = tpu.matmul %255, %78, %cst_138 {dimension_numbers = #tpu.dot_dimension_numbers<[1], [0], [0], [1], [0, 0, 1, 1], [], []>} : vector<8x128xbf16>, vector<128x384xbf16>, vector<8x384xf32> -> vector<8x384xf32>
    %257 = vector.extract_strided_slice %254 {offsets = [0, 0], sizes = [8, 128], strides = [1, 1]} : vector<8x384xf32> to vector<8x128xf32>
    %258 = vector.extract_strided_slice %256 {offsets = [0, 0], sizes = [8, 128], strides = [1, 1]} : vector<8x384xf32> to vector<8x128xf32>
    %259 = arith.addf %257, %258 : vector<8x128xf32>
    %260 = arith.negf %259 : vector<8x128xf32>
    %261 = math.exp %260 : vector<8x128xf32>
    %cst_139 = arith.constant 1.000000e+00 : f32
    %262 = vector.broadcast %cst_139 : f32 to vector<8x128xf32>
    %263 = arith.addf %262, %261 : vector<8x128xf32>
    %264 = arith.divf %262, %263 : vector<8x128xf32>
    %265 = vector.extract_strided_slice %254 {offsets = [0, 128], sizes = [8, 128], strides = [1, 1]} : vector<8x384xf32> to vector<8x128xf32>
    %266 = vector.extract_strided_slice %256 {offsets = [0, 128], sizes = [8, 128], strides = [1, 1]} : vector<8x384xf32> to vector<8x128xf32>
    %267 = arith.addf %265, %266 : vector<8x128xf32>
    %268 = arith.negf %267 : vector<8x128xf32>
    %269 = math.exp %268 : vector<8x128xf32>
    %cst_140 = arith.constant 1.000000e+00 : f32
    %270 = vector.broadcast %cst_140 : f32 to vector<8x128xf32>
    %271 = arith.addf %270, %269 : vector<8x128xf32>
    %272 = arith.divf %270, %271 : vector<8x128xf32>
    %273 = vector.extract_strided_slice %254 {offsets = [0, 256], sizes = [8, 128], strides = [1, 1]} : vector<8x384xf32> to vector<8x128xf32>
    %274 = vector.extract_strided_slice %256 {offsets = [0, 256], sizes = [8, 128], strides = [1, 1]} : vector<8x384xf32> to vector<8x128xf32>
    %275 = arith.addf %274, %82 : vector<8x128xf32>
    %276 = arith.mulf %264, %275 : vector<8x128xf32>
    %277 = arith.addf %273, %276 : vector<8x128xf32>
    %278 = math.tanh %277 : vector<8x128xf32>
    %cst_141 = arith.constant 1.000000e+00 : f32
    %279 = vector.broadcast %cst_141 : f32 to vector<8x128xf32>
    %280 = arith.subf %279, %272 : vector<8x128xf32>
    %281 = arith.mulf %280, %278 : vector<8x128xf32>
    %282 = arith.mulf %272, %249 : vector<8x128xf32>
    %283 = arith.addf %281, %282 : vector<8x128xf32>
    %c5_142 = arith.constant 5 : index
    %c0_143 = arith.constant 0 : index
    %c0_144 = arith.constant 0 : index
    %284 = vector.load %arg17[%c5_142, %c0_143, %c0_144] : memref<8x8x128xf32, #tpu.memory_space<vmem>>, vector<1x8x128xf32>
    %285 = vector.shape_cast %284 : vector<1x8x128xf32> to vector<8x128xf32>
    %286 = vector.shape_cast %283 : vector<8x128xf32> to vector<1x8x128xf32>
    tpu.vector_store %arg17[%c5_142, %c0_143, %c0_144], %286 {strides = array<i32>} : memref<8x8x128xf32, #tpu.memory_space<vmem>>, vector<1x8x128xf32>,
    %c6_145 = arith.constant 6 : index
    %c0_146 = arith.constant 0 : index
    %c0_147 = arith.constant 0 : index
    %287 = vector.load %arg15[%c6_145, %c0_146, %c0_147] : memref<8x8x384xf32, #tpu.memory_space<vmem>>, vector<1x8x384xf32>
    %288 = vector.shape_cast %287 : vector<1x8x384xf32> to vector<8x384xf32>
    %289 = arith.truncf %283 : vector<8x128xf32> to vector<8x128xbf16>
    %cst_148 = arith.constant dense<0.000000e+00> : vector<8x384xf32>
    %290 = tpu.matmul %289, %78, %cst_148 {dimension_numbers = #tpu.dot_dimension_numbers<[1], [0], [0], [1], [0, 0, 1, 1], [], []>} : vector<8x128xbf16>, vector<128x384xbf16>, vector<8x384xf32> -> vector<8x384xf32>
    %291 = vector.extract_strided_slice %288 {offsets = [0, 0], sizes = [8, 128], strides = [1, 1]} : vector<8x384xf32> to vector<8x128xf32>
    %292 = vector.extract_strided_slice %290 {offsets = [0, 0], sizes = [8, 128], strides = [1, 1]} : vector<8x384xf32> to vector<8x128xf32>
    %293 = arith.addf %291, %292 : vector<8x128xf32>
    %294 = arith.negf %293 : vector<8x128xf32>
    %295 = math.exp %294 : vector<8x128xf32>
    %cst_149 = arith.constant 1.000000e+00 : f32
    %296 = vector.broadcast %cst_149 : f32 to vector<8x128xf32>
    %297 = arith.addf %296, %295 : vector<8x128xf32>
    %298 = arith.divf %296, %297 : vector<8x128xf32>
    %299 = vector.extract_strided_slice %288 {offsets = [0, 128], sizes = [8, 128], strides = [1, 1]} : vector<8x384xf32> to vector<8x128xf32>
    %300 = vector.extract_strided_slice %290 {offsets = [0, 128], sizes = [8, 128], strides = [1, 1]} : vector<8x384xf32> to vector<8x128xf32>
    %301 = arith.addf %299, %300 : vector<8x128xf32>
    %302 = arith.negf %301 : vector<8x128xf32>
    %303 = math.exp %302 : vector<8x128xf32>
    %cst_150 = arith.constant 1.000000e+00 : f32
    %304 = vector.broadcast %cst_150 : f32 to vector<8x128xf32>
    %305 = arith.addf %304, %303 : vector<8x128xf32>
    %306 = arith.divf %304, %305 : vector<8x128xf32>
    %307 = vector.extract_strided_slice %288 {offsets = [0, 256], sizes = [8, 128], strides = [1, 1]} : vector<8x384xf32> to vector<8x128xf32>
    %308 = vector.extract_strided_slice %290 {offsets = [0, 256], sizes = [8, 128], strides = [1, 1]} : vector<8x384xf32> to vector<8x128xf32>
    %309 = arith.addf %308, %82 : vector<8x128xf32>
    %310 = arith.mulf %298, %309 : vector<8x128xf32>
    %311 = arith.addf %307, %310 : vector<8x128xf32>
    %312 = math.tanh %311 : vector<8x128xf32>
    %cst_151 = arith.constant 1.000000e+00 : f32
    %313 = vector.broadcast %cst_151 : f32 to vector<8x128xf32>
    %314 = arith.subf %313, %306 : vector<8x128xf32>
    %315 = arith.mulf %314, %312 : vector<8x128xf32>
    %316 = arith.mulf %306, %283 : vector<8x128xf32>
    %317 = arith.addf %315, %316 : vector<8x128xf32>
    %c6_152 = arith.constant 6 : index
    %c0_153 = arith.constant 0 : index
    %c0_154 = arith.constant 0 : index
    %318 = vector.load %arg17[%c6_152, %c0_153, %c0_154] : memref<8x8x128xf32, #tpu.memory_space<vmem>>, vector<1x8x128xf32>
    %319 = vector.shape_cast %318 : vector<1x8x128xf32> to vector<8x128xf32>
    %320 = vector.shape_cast %317 : vector<8x128xf32> to vector<1x8x128xf32>
    tpu.vector_store %arg17[%c6_152, %c0_153, %c0_154], %320 {strides = array<i32>} : memref<8x8x128xf32, #tpu.memory_space<vmem>>, vector<1x8x128xf32>,
    %c7_155 = arith.constant 7 : index
    %c0_156 = arith.constant 0 : index
    %c0_157 = arith.constant 0 : index
    %321 = vector.load %arg15[%c7_155, %c0_156, %c0_157] : memref<8x8x384xf32, #tpu.memory_space<vmem>>, vector<1x8x384xf32>
    %322 = vector.shape_cast %321 : vector<1x8x384xf32> to vector<8x384xf32>
    %323 = arith.truncf %317 : vector<8x128xf32> to vector<8x128xbf16>
    %cst_158 = arith.constant dense<0.000000e+00> : vector<8x384xf32>
    %324 = tpu.matmul %323, %78, %cst_158 {dimension_numbers = #tpu.dot_dimension_numbers<[1], [0], [0], [1], [0, 0, 1, 1], [], []>} : vector<8x128xbf16>, vector<128x384xbf16>, vector<8x384xf32> -> vector<8x384xf32>
    %325 = vector.extract_strided_slice %322 {offsets = [0, 0], sizes = [8, 128], strides = [1, 1]} : vector<8x384xf32> to vector<8x128xf32>
    %326 = vector.extract_strided_slice %324 {offsets = [0, 0], sizes = [8, 128], strides = [1, 1]} : vector<8x384xf32> to vector<8x128xf32>
    %327 = arith.addf %325, %326 : vector<8x128xf32>
    %328 = arith.negf %327 : vector<8x128xf32>
    %329 = math.exp %328 : vector<8x128xf32>
    %cst_159 = arith.constant 1.000000e+00 : f32
    %330 = vector.broadcast %cst_159 : f32 to vector<8x128xf32>
    %331 = arith.addf %330, %329 : vector<8x128xf32>
    %332 = arith.divf %330, %331 : vector<8x128xf32>
    %333 = vector.extract_strided_slice %322 {offsets = [0, 128], sizes = [8, 128], strides = [1, 1]} : vector<8x384xf32> to vector<8x128xf32>
    %334 = vector.extract_strided_slice %324 {offsets = [0, 128], sizes = [8, 128], strides = [1, 1]} : vector<8x384xf32> to vector<8x128xf32>
    %335 = arith.addf %333, %334 : vector<8x128xf32>
    %336 = arith.negf %335 : vector<8x128xf32>
    %337 = math.exp %336 : vector<8x128xf32>
    %cst_160 = arith.constant 1.000000e+00 : f32
    %338 = vector.broadcast %cst_160 : f32 to vector<8x128xf32>
    %339 = arith.addf %338, %337 : vector<8x128xf32>
    %340 = arith.divf %338, %339 : vector<8x128xf32>
    %341 = vector.extract_strided_slice %322 {offsets = [0, 256], sizes = [8, 128], strides = [1, 1]} : vector<8x384xf32> to vector<8x128xf32>
    %342 = vector.extract_strided_slice %324 {offsets = [0, 256], sizes = [8, 128], strides = [1, 1]} : vector<8x384xf32> to vector<8x128xf32>
    %343 = arith.addf %342, %82 : vector<8x128xf32>
    %344 = arith.mulf %332, %343 : vector<8x128xf32>
    %345 = arith.addf %341, %344 : vector<8x128xf32>
    %346 = math.tanh %345 : vector<8x128xf32>
    %cst_161 = arith.constant 1.000000e+00 : f32
    %347 = vector.broadcast %cst_161 : f32 to vector<8x128xf32>
    %348 = arith.subf %347, %340 : vector<8x128xf32>
    %349 = arith.mulf %348, %346 : vector<8x128xf32>
    %350 = arith.mulf %340, %317 : vector<8x128xf32>
    %351 = arith.addf %349, %350 : vector<8x128xf32>
    %c7_162 = arith.constant 7 : index
    %c0_163 = arith.constant 0 : index
    %c0_164 = arith.constant 0 : index
    %352 = vector.load %arg17[%c7_162, %c0_163, %c0_164] : memref<8x8x128xf32, #tpu.memory_space<vmem>>, vector<1x8x128xf32>
    %353 = vector.shape_cast %352 : vector<1x8x128xf32> to vector<8x128xf32>
    %354 = vector.shape_cast %351 : vector<8x128xf32> to vector<1x8x128xf32>
    tpu.vector_store %arg17[%c7_162, %c0_163, %c0_164], %354 {strides = array<i32>} : memref<8x8x128xf32, #tpu.memory_space<vmem>>, vector<1x8x128xf32>,
    %c0_165 = arith.constant 0 : index
    %c0_166 = arith.constant 0 : index
    %c0_167 = arith.constant 0 : index
    %355 = vector.load %arg17[%c0_165, %c0_166, %c0_167] : memref<8x8x128xf32, #tpu.memory_space<vmem>>, vector<8x8x128xf32>
    %356 = vector.shape_cast %355 : vector<8x8x128xf32> to vector<64x128xf32>
    %357 = arith.truncf %356 : vector<64x128xf32> to vector<64x128xbf16>
    %c0_168 = arith.constant 0 : index
    %c0_169 = arith.constant 0 : index
    %358 = vector.load %arg7[%c0_168, %c0_169] : memref<128x384xbf16, #tpu.memory_space<vmem>>, vector<128x384xbf16>
    %cst_170 = arith.constant dense<0.000000e+00> : vector<64x384xf32>
    %359 = tpu.matmul %357, %358, %cst_170 {dimension_numbers = #tpu.dot_dimension_numbers<[1], [0], [0], [1], [0, 0, 1, 1], [], []>} : vector<64x128xbf16>, vector<128x384xbf16>, vector<64x384xf32> -> vector<64x384xf32>
    %c0_171 = arith.constant 0 : index
    %c0_172 = arith.constant 0 : index
    %360 = vector.load %arg9[%c0_171, %c0_172] : memref<1x384xf32, #tpu.memory_space<vmem>>, vector<1x384xf32>
    %361 = vector.broadcast %360 : vector<1x384xf32> to vector<64x384xf32>
    %362 = arith.addf %359, %361 : vector<64x384xf32>
    %363 = vector.shape_cast %362 : vector<64x384xf32> to vector<8x8x384xf32>
    %c0_173 = arith.constant 0 : index
    %c0_174 = arith.constant 0 : index
    %c0_175 = arith.constant 0 : index
    %364 = vector.load %arg15[%c0_173, %c0_174, %c0_175] : memref<8x8x384xf32, #tpu.memory_space<vmem>>, vector<8x8x384xf32>
    tpu.vector_store %arg15[%c0_173, %c0_174, %c0_175], %363 {strides = array<i32>} : memref<8x8x384xf32, #tpu.memory_space<vmem>>, vector<8x8x384xf32>,
    %c0_176 = arith.constant 0 : index
    %c0_177 = arith.constant 0 : index
    %365 = vector.load %arg8[%c0_176, %c0_177] : memref<128x384xbf16, #tpu.memory_space<vmem>>, vector<128x384xbf16>
    %cst_178 = arith.constant dense<0.000000e+00> : vector<64x384xf32>
    %366 = tpu.matmul %357, %365, %cst_178 {dimension_numbers = #tpu.dot_dimension_numbers<[1], [0], [0], [1], [0, 0, 1, 1], [], []>} : vector<64x128xbf16>, vector<128x384xbf16>, vector<64x384xf32> -> vector<64x384xf32>
    %367 = vector.shape_cast %366 : vector<64x384xf32> to vector<8x8x384xf32>
    %c0_179 = arith.constant 0 : index
    %c0_180 = arith.constant 0 : index
    %c0_181 = arith.constant 0 : index
    %368 = vector.load %arg16[%c0_179, %c0_180, %c0_181] : memref<8x8x384xf32, #tpu.memory_space<vmem>>, vector<8x8x384xf32>
    tpu.vector_store %arg16[%c0_179, %c0_180, %c0_181], %367 {strides = array<i32>} : memref<8x8x384xf32, #tpu.memory_space<vmem>>, vector<8x8x384xf32>,
    %c0_182 = arith.constant 0 : index
    %c0_183 = arith.constant 0 : index
    %c0_184 = arith.constant 0 : index
    %369 = vector.load %arg15[%c0_182, %c0_183, %c0_184] : memref<8x8x384xf32, #tpu.memory_space<vmem>>, vector<1x8x384xf32>
    %370 = vector.shape_cast %369 : vector<1x8x384xf32> to vector<8x384xf32>
    %c7_185 = arith.constant 7 : index
    %c0_186 = arith.constant 0 : index
    %c0_187 = arith.constant 0 : index
    %371 = vector.load %arg16[%c7_185, %c0_186, %c0_187] : memref<8x8x384xf32, #tpu.memory_space<vmem>>, vector<1x8x384xf32>
    %372 = vector.shape_cast %371 : vector<1x8x384xf32> to vector<8x384xf32>
    %373 = arith.addf %370, %372 : vector<8x384xf32>
    %c0_188 = arith.constant 0 : index
    %c0_189 = arith.constant 0 : index
    %c0_190 = arith.constant 0 : index
    %374 = vector.load %arg15[%c0_188, %c0_189, %c0_190] : memref<8x8x384xf32, #tpu.memory_space<vmem>>, vector<1x8x384xf32>
    %375 = vector.shape_cast %374 : vector<1x8x384xf32> to vector<8x384xf32>
    %376 = vector.shape_cast %373 : vector<8x384xf32> to vector<1x8x384xf32>
    tpu.vector_store %arg15[%c0_188, %c0_189, %c0_190], %376 {strides = array<i32>} : memref<8x8x384xf32, #tpu.memory_space<vmem>>, vector<1x8x384xf32>,
    %c1_191 = arith.constant 1 : index
    %c0_192 = arith.constant 0 : index
    %c0_193 = arith.constant 0 : index
    %377 = vector.load %arg15[%c1_191, %c0_192, %c0_193] : memref<8x8x384xf32, #tpu.memory_space<vmem>>, vector<1x8x384xf32>
    %378 = vector.shape_cast %377 : vector<1x8x384xf32> to vector<8x384xf32>
    %c6_194 = arith.constant 6 : index
    %c0_195 = arith.constant 0 : index
    %c0_196 = arith.constant 0 : index
    %379 = vector.load %arg16[%c6_194, %c0_195, %c0_196] : memref<8x8x384xf32, #tpu.memory_space<vmem>>, vector<1x8x384xf32>
    %380 = vector.shape_cast %379 : vector<1x8x384xf32> to vector<8x384xf32>
    %381 = arith.addf %378, %380 : vector<8x384xf32>
    %c1_197 = arith.constant 1 : index
    %c0_198 = arith.constant 0 : index
    %c0_199 = arith.constant 0 : index
    %382 = vector.load %arg15[%c1_197, %c0_198, %c0_199] : memref<8x8x384xf32, #tpu.memory_space<vmem>>, vector<1x8x384xf32>
    %383 = vector.shape_cast %382 : vector<1x8x384xf32> to vector<8x384xf32>
    %384 = vector.shape_cast %381 : vector<8x384xf32> to vector<1x8x384xf32>
    tpu.vector_store %arg15[%c1_197, %c0_198, %c0_199], %384 {strides = array<i32>} : memref<8x8x384xf32, #tpu.memory_space<vmem>>, vector<1x8x384xf32>,
    %c2_200 = arith.constant 2 : index
    %c0_201 = arith.constant 0 : index
    %c0_202 = arith.constant 0 : index
    %385 = vector.load %arg15[%c2_200, %c0_201, %c0_202] : memref<8x8x384xf32, #tpu.memory_space<vmem>>, vector<1x8x384xf32>
    %386 = vector.shape_cast %385 : vector<1x8x384xf32> to vector<8x384xf32>
    %c5_203 = arith.constant 5 : index
    %c0_204 = arith.constant 0 : index
    %c0_205 = arith.constant 0 : index
    %387 = vector.load %arg16[%c5_203, %c0_204, %c0_205] : memref<8x8x384xf32, #tpu.memory_space<vmem>>, vector<1x8x384xf32>
    %388 = vector.shape_cast %387 : vector<1x8x384xf32> to vector<8x384xf32>
    %389 = arith.addf %386, %388 : vector<8x384xf32>
    %c2_206 = arith.constant 2 : index
    %c0_207 = arith.constant 0 : index
    %c0_208 = arith.constant 0 : index
    %390 = vector.load %arg15[%c2_206, %c0_207, %c0_208] : memref<8x8x384xf32, #tpu.memory_space<vmem>>, vector<1x8x384xf32>
    %391 = vector.shape_cast %390 : vector<1x8x384xf32> to vector<8x384xf32>
    %392 = vector.shape_cast %389 : vector<8x384xf32> to vector<1x8x384xf32>
    tpu.vector_store %arg15[%c2_206, %c0_207, %c0_208], %392 {strides = array<i32>} : memref<8x8x384xf32, #tpu.memory_space<vmem>>, vector<1x8x384xf32>,
    %c3_209 = arith.constant 3 : index
    %c0_210 = arith.constant 0 : index
    %c0_211 = arith.constant 0 : index
    %393 = vector.load %arg15[%c3_209, %c0_210, %c0_211] : memref<8x8x384xf32, #tpu.memory_space<vmem>>, vector<1x8x384xf32>
    %394 = vector.shape_cast %393 : vector<1x8x384xf32> to vector<8x384xf32>
    %c4_212 = arith.constant 4 : index
    %c0_213 = arith.constant 0 : index
    %c0_214 = arith.constant 0 : index
    %395 = vector.load %arg16[%c4_212, %c0_213, %c0_214] : memref<8x8x384xf32, #tpu.memory_space<vmem>>, vector<1x8x384xf32>
    %396 = vector.shape_cast %395 : vector<1x8x384xf32> to vector<8x384xf32>
    %397 = arith.addf %394, %396 : vector<8x384xf32>
    %c3_215 = arith.constant 3 : index
    %c0_216 = arith.constant 0 : index
    %c0_217 = arith.constant 0 : index
    %398 = vector.load %arg15[%c3_215, %c0_216, %c0_217] : memref<8x8x384xf32, #tpu.memory_space<vmem>>, vector<1x8x384xf32>
    %399 = vector.shape_cast %398 : vector<1x8x384xf32> to vector<8x384xf32>
    %400 = vector.shape_cast %397 : vector<8x384xf32> to vector<1x8x384xf32>
    tpu.vector_store %arg15[%c3_215, %c0_216, %c0_217], %400 {strides = array<i32>} : memref<8x8x384xf32, #tpu.memory_space<vmem>>, vector<1x8x384xf32>,
    %c4_218 = arith.constant 4 : index
    %c0_219 = arith.constant 0 : index
    %c0_220 = arith.constant 0 : index
    %401 = vector.load %arg15[%c4_218, %c0_219, %c0_220] : memref<8x8x384xf32, #tpu.memory_space<vmem>>, vector<1x8x384xf32>
    %402 = vector.shape_cast %401 : vector<1x8x384xf32> to vector<8x384xf32>
    %c3_221 = arith.constant 3 : index
    %c0_222 = arith.constant 0 : index
    %c0_223 = arith.constant 0 : index
    %403 = vector.load %arg16[%c3_221, %c0_222, %c0_223] : memref<8x8x384xf32, #tpu.memory_space<vmem>>, vector<1x8x384xf32>
    %404 = vector.shape_cast %403 : vector<1x8x384xf32> to vector<8x384xf32>
    %405 = arith.addf %402, %404 : vector<8x384xf32>
    %c4_224 = arith.constant 4 : index
    %c0_225 = arith.constant 0 : index
    %c0_226 = arith.constant 0 : index
    %406 = vector.load %arg15[%c4_224, %c0_225, %c0_226] : memref<8x8x384xf32, #tpu.memory_space<vmem>>, vector<1x8x384xf32>
    %407 = vector.shape_cast %406 : vector<1x8x384xf32> to vector<8x384xf32>
    %408 = vector.shape_cast %405 : vector<8x384xf32> to vector<1x8x384xf32>
    tpu.vector_store %arg15[%c4_224, %c0_225, %c0_226], %408 {strides = array<i32>} : memref<8x8x384xf32, #tpu.memory_space<vmem>>, vector<1x8x384xf32>,
    %c5_227 = arith.constant 5 : index
    %c0_228 = arith.constant 0 : index
    %c0_229 = arith.constant 0 : index
    %409 = vector.load %arg15[%c5_227, %c0_228, %c0_229] : memref<8x8x384xf32, #tpu.memory_space<vmem>>, vector<1x8x384xf32>
    %410 = vector.shape_cast %409 : vector<1x8x384xf32> to vector<8x384xf32>
    %c2_230 = arith.constant 2 : index
    %c0_231 = arith.constant 0 : index
    %c0_232 = arith.constant 0 : index
    %411 = vector.load %arg16[%c2_230, %c0_231, %c0_232] : memref<8x8x384xf32, #tpu.memory_space<vmem>>, vector<1x8x384xf32>
    %412 = vector.shape_cast %411 : vector<1x8x384xf32> to vector<8x384xf32>
    %413 = arith.addf %410, %412 : vector<8x384xf32>
    %c5_233 = arith.constant 5 : index
    %c0_234 = arith.constant 0 : index
    %c0_235 = arith.constant 0 : index
    %414 = vector.load %arg15[%c5_233, %c0_234, %c0_235] : memref<8x8x384xf32, #tpu.memory_space<vmem>>, vector<1x8x384xf32>
    %415 = vector.shape_cast %414 : vector<1x8x384xf32> to vector<8x384xf32>
    %416 = vector.shape_cast %413 : vector<8x384xf32> to vector<1x8x384xf32>
    tpu.vector_store %arg15[%c5_233, %c0_234, %c0_235], %416 {strides = array<i32>} : memref<8x8x384xf32, #tpu.memory_space<vmem>>, vector<1x8x384xf32>,
    %c6_236 = arith.constant 6 : index
    %c0_237 = arith.constant 0 : index
    %c0_238 = arith.constant 0 : index
    %417 = vector.load %arg15[%c6_236, %c0_237, %c0_238] : memref<8x8x384xf32, #tpu.memory_space<vmem>>, vector<1x8x384xf32>
    %418 = vector.shape_cast %417 : vector<1x8x384xf32> to vector<8x384xf32>
    %c1_239 = arith.constant 1 : index
    %c0_240 = arith.constant 0 : index
    %c0_241 = arith.constant 0 : index
    %419 = vector.load %arg16[%c1_239, %c0_240, %c0_241] : memref<8x8x384xf32, #tpu.memory_space<vmem>>, vector<1x8x384xf32>
    %420 = vector.shape_cast %419 : vector<1x8x384xf32> to vector<8x384xf32>
    %421 = arith.addf %418, %420 : vector<8x384xf32>
    %c6_242 = arith.constant 6 : index
    %c0_243 = arith.constant 0 : index
    %c0_244 = arith.constant 0 : index
    %422 = vector.load %arg15[%c6_242, %c0_243, %c0_244] : memref<8x8x384xf32, #tpu.memory_space<vmem>>, vector<1x8x384xf32>
    %423 = vector.shape_cast %422 : vector<1x8x384xf32> to vector<8x384xf32>
    %424 = vector.shape_cast %421 : vector<8x384xf32> to vector<1x8x384xf32>
    tpu.vector_store %arg15[%c6_242, %c0_243, %c0_244], %424 {strides = array<i32>} : memref<8x8x384xf32, #tpu.memory_space<vmem>>, vector<1x8x384xf32>,
    %c7_245 = arith.constant 7 : index
    %c0_246 = arith.constant 0 : index
    %c0_247 = arith.constant 0 : index
    %425 = vector.load %arg15[%c7_245, %c0_246, %c0_247] : memref<8x8x384xf32, #tpu.memory_space<vmem>>, vector<1x8x384xf32>
    %426 = vector.shape_cast %425 : vector<1x8x384xf32> to vector<8x384xf32>
    %c0_248 = arith.constant 0 : index
    %c0_249 = arith.constant 0 : index
    %c0_250 = arith.constant 0 : index
    %427 = vector.load %arg16[%c0_248, %c0_249, %c0_250] : memref<8x8x384xf32, #tpu.memory_space<vmem>>, vector<1x8x384xf32>
    %428 = vector.shape_cast %427 : vector<1x8x384xf32> to vector<8x384xf32>
    %429 = arith.addf %426, %428 : vector<8x384xf32>
    %c7_251 = arith.constant 7 : index
    %c0_252 = arith.constant 0 : index
    %c0_253 = arith.constant 0 : index
    %430 = vector.load %arg15[%c7_251, %c0_252, %c0_253] : memref<8x8x384xf32, #tpu.memory_space<vmem>>, vector<1x8x384xf32>
    %431 = vector.shape_cast %430 : vector<1x8x384xf32> to vector<8x384xf32>
    %432 = vector.shape_cast %429 : vector<8x384xf32> to vector<1x8x384xf32>
    tpu.vector_store %arg15[%c7_251, %c0_252, %c0_253], %432 {strides = array<i32>} : memref<8x8x384xf32, #tpu.memory_space<vmem>>, vector<1x8x384xf32>,
    %c0_254 = arith.constant 0 : index
    %c0_255 = arith.constant 0 : index
    %433 = vector.load %arg10[%c0_254, %c0_255] : memref<128x384xbf16, #tpu.memory_space<vmem>>, vector<128x384xbf16>
    %c0_256 = arith.constant 0 : index
    %c0_257 = arith.constant 0 : index
    %434 = vector.load %arg11[%c0_256, %c0_257] : memref<1x128xf32, #tpu.memory_space<vmem>>, vector<1x128xf32>
    %cst_258 = arith.constant 0.000000e+00 : f32
    %435 = vector.broadcast %cst_258 : f32 to vector<8x128xf32>
    %cst_259 = arith.constant 0.000000e+00 : f32
    %436 = vector.broadcast %cst_259 : f32 to vector<8x128xf32>
    %437 = vector.shape_cast %434 : vector<1x128xf32> to vector<1x128xf32>
    %438 = vector.broadcast %437 : vector<1x128xf32> to vector<8x128xf32>
    %c0_260 = arith.constant 0 : index
    %c0_261 = arith.constant 0 : index
    %c0_262 = arith.constant 0 : index
    %439 = vector.load %arg15[%c0_260, %c0_261, %c0_262] : memref<8x8x384xf32, #tpu.memory_space<vmem>>, vector<1x8x384xf32>
    %440 = vector.shape_cast %439 : vector<1x8x384xf32> to vector<8x384xf32>
    %441 = arith.truncf %435 : vector<8x128xf32> to vector<8x128xbf16>
    %cst_263 = arith.constant dense<0.000000e+00> : vector<8x384xf32>
    %442 = tpu.matmul %441, %433, %cst_263 {dimension_numbers = #tpu.dot_dimension_numbers<[1], [0], [0], [1], [0, 0, 1, 1], [], []>} : vector<8x128xbf16>, vector<128x384xbf16>, vector<8x384xf32> -> vector<8x384xf32>
    %443 = vector.extract_strided_slice %440 {offsets = [0, 0], sizes = [8, 128], strides = [1, 1]} : vector<8x384xf32> to vector<8x128xf32>
    %444 = vector.extract_strided_slice %442 {offsets = [0, 0], sizes = [8, 128], strides = [1, 1]} : vector<8x384xf32> to vector<8x128xf32>
    %445 = arith.addf %443, %444 : vector<8x128xf32>
    %446 = arith.negf %445 : vector<8x128xf32>
    %447 = math.exp %446 : vector<8x128xf32>
    %cst_264 = arith.constant 1.000000e+00 : f32
    %448 = vector.broadcast %cst_264 : f32 to vector<8x128xf32>
    %449 = arith.addf %448, %447 : vector<8x128xf32>
    %450 = arith.divf %448, %449 : vector<8x128xf32>
    %451 = vector.extract_strided_slice %440 {offsets = [0, 128], sizes = [8, 128], strides = [1, 1]} : vector<8x384xf32> to vector<8x128xf32>
    %452 = vector.extract_strided_slice %442 {offsets = [0, 128], sizes = [8, 128], strides = [1, 1]} : vector<8x384xf32> to vector<8x128xf32>
    %453 = arith.addf %451, %452 : vector<8x128xf32>
    %454 = arith.negf %453 : vector<8x128xf32>
    %455 = math.exp %454 : vector<8x128xf32>
    %cst_265 = arith.constant 1.000000e+00 : f32
    %456 = vector.broadcast %cst_265 : f32 to vector<8x128xf32>
    %457 = arith.addf %456, %455 : vector<8x128xf32>
    %458 = arith.divf %456, %457 : vector<8x128xf32>
    %459 = vector.extract_strided_slice %440 {offsets = [0, 256], sizes = [8, 128], strides = [1, 1]} : vector<8x384xf32> to vector<8x128xf32>
    %460 = vector.extract_strided_slice %442 {offsets = [0, 256], sizes = [8, 128], strides = [1, 1]} : vector<8x384xf32> to vector<8x128xf32>
    %461 = arith.addf %460, %438 : vector<8x128xf32>
    %462 = arith.mulf %450, %461 : vector<8x128xf32>
    %463 = arith.addf %459, %462 : vector<8x128xf32>
    %464 = math.tanh %463 : vector<8x128xf32>
    %cst_266 = arith.constant 1.000000e+00 : f32
    %465 = vector.broadcast %cst_266 : f32 to vector<8x128xf32>
    %466 = arith.subf %465, %458 : vector<8x128xf32>
    %467 = arith.mulf %466, %464 : vector<8x128xf32>
    %468 = arith.mulf %458, %435 : vector<8x128xf32>
    %469 = arith.addf %467, %468 : vector<8x128xf32>
    %470 = arith.addf %436, %469 : vector<8x128xf32>
    %c1_267 = arith.constant 1 : index
    %c0_268 = arith.constant 0 : index
    %c0_269 = arith.constant 0 : index
    %471 = vector.load %arg15[%c1_267, %c0_268, %c0_269] : memref<8x8x384xf32, #tpu.memory_space<vmem>>, vector<1x8x384xf32>
    %472 = vector.shape_cast %471 : vector<1x8x384xf32> to vector<8x384xf32>
    %473 = arith.truncf %469 : vector<8x128xf32> to vector<8x128xbf16>
    %cst_270 = arith.constant dense<0.000000e+00> : vector<8x384xf32>
    %474 = tpu.matmul %473, %433, %cst_270 {dimension_numbers = #tpu.dot_dimension_numbers<[1], [0], [0], [1], [0, 0, 1, 1], [], []>} : vector<8x128xbf16>, vector<128x384xbf16>, vector<8x384xf32> -> vector<8x384xf32>
    %475 = vector.extract_strided_slice %472 {offsets = [0, 0], sizes = [8, 128], strides = [1, 1]} : vector<8x384xf32> to vector<8x128xf32>
    %476 = vector.extract_strided_slice %474 {offsets = [0, 0], sizes = [8, 128], strides = [1, 1]} : vector<8x384xf32> to vector<8x128xf32>
    %477 = arith.addf %475, %476 : vector<8x128xf32>
    %478 = arith.negf %477 : vector<8x128xf32>
    %479 = math.exp %478 : vector<8x128xf32>
    %cst_271 = arith.constant 1.000000e+00 : f32
    %480 = vector.broadcast %cst_271 : f32 to vector<8x128xf32>
    %481 = arith.addf %480, %479 : vector<8x128xf32>
    %482 = arith.divf %480, %481 : vector<8x128xf32>
    %483 = vector.extract_strided_slice %472 {offsets = [0, 128], sizes = [8, 128], strides = [1, 1]} : vector<8x384xf32> to vector<8x128xf32>
    %484 = vector.extract_strided_slice %474 {offsets = [0, 128], sizes = [8, 128], strides = [1, 1]} : vector<8x384xf32> to vector<8x128xf32>
    %485 = arith.addf %483, %484 : vector<8x128xf32>
    %486 = arith.negf %485 : vector<8x128xf32>
    %487 = math.exp %486 : vector<8x128xf32>
    %cst_272 = arith.constant 1.000000e+00 : f32
    %488 = vector.broadcast %cst_272 : f32 to vector<8x128xf32>
    %489 = arith.addf %488, %487 : vector<8x128xf32>
    %490 = arith.divf %488, %489 : vector<8x128xf32>
    %491 = vector.extract_strided_slice %472 {offsets = [0, 256], sizes = [8, 128], strides = [1, 1]} : vector<8x384xf32> to vector<8x128xf32>
    %492 = vector.extract_strided_slice %474 {offsets = [0, 256], sizes = [8, 128], strides = [1, 1]} : vector<8x384xf32> to vector<8x128xf32>
    %493 = arith.addf %492, %438 : vector<8x128xf32>
    %494 = arith.mulf %482, %493 : vector<8x128xf32>
    %495 = arith.addf %491, %494 : vector<8x128xf32>
    %496 = math.tanh %495 : vector<8x128xf32>
    %cst_273 = arith.constant 1.000000e+00 : f32
    %497 = vector.broadcast %cst_273 : f32 to vector<8x128xf32>
    %498 = arith.subf %497, %490 : vector<8x128xf32>
    %499 = arith.mulf %498, %496 : vector<8x128xf32>
    %500 = arith.mulf %490, %469 : vector<8x128xf32>
    %501 = arith.addf %499, %500 : vector<8x128xf32>
    %502 = arith.addf %470, %501 : vector<8x128xf32>
    %c2_274 = arith.constant 2 : index
    %c0_275 = arith.constant 0 : index
    %c0_276 = arith.constant 0 : index
    %503 = vector.load %arg15[%c2_274, %c0_275, %c0_276] : memref<8x8x384xf32, #tpu.memory_space<vmem>>, vector<1x8x384xf32>
    %504 = vector.shape_cast %503 : vector<1x8x384xf32> to vector<8x384xf32>
    %505 = arith.truncf %501 : vector<8x128xf32> to vector<8x128xbf16>
    %cst_277 = arith.constant dense<0.000000e+00> : vector<8x384xf32>
    %506 = tpu.matmul %505, %433, %cst_277 {dimension_numbers = #tpu.dot_dimension_numbers<[1], [0], [0], [1], [0, 0, 1, 1], [], []>} : vector<8x128xbf16>, vector<128x384xbf16>, vector<8x384xf32> -> vector<8x384xf32>
    %507 = vector.extract_strided_slice %504 {offsets = [0, 0], sizes = [8, 128], strides = [1, 1]} : vector<8x384xf32> to vector<8x128xf32>
    %508 = vector.extract_strided_slice %506 {offsets = [0, 0], sizes = [8, 128], strides = [1, 1]} : vector<8x384xf32> to vector<8x128xf32>
    %509 = arith.addf %507, %508 : vector<8x128xf32>
    %510 = arith.negf %509 : vector<8x128xf32>
    %511 = math.exp %510 : vector<8x128xf32>
    %cst_278 = arith.constant 1.000000e+00 : f32
    %512 = vector.broadcast %cst_278 : f32 to vector<8x128xf32>
    %513 = arith.addf %512, %511 : vector<8x128xf32>
    %514 = arith.divf %512, %513 : vector<8x128xf32>
    %515 = vector.extract_strided_slice %504 {offsets = [0, 128], sizes = [8, 128], strides = [1, 1]} : vector<8x384xf32> to vector<8x128xf32>
    %516 = vector.extract_strided_slice %506 {offsets = [0, 128], sizes = [8, 128], strides = [1, 1]} : vector<8x384xf32> to vector<8x128xf32>
    %517 = arith.addf %515, %516 : vector<8x128xf32>
    %518 = arith.negf %517 : vector<8x128xf32>
    %519 = math.exp %518 : vector<8x128xf32>
    %cst_279 = arith.constant 1.000000e+00 : f32
    %520 = vector.broadcast %cst_279 : f32 to vector<8x128xf32>
    %521 = arith.addf %520, %519 : vector<8x128xf32>
    %522 = arith.divf %520, %521 : vector<8x128xf32>
    %523 = vector.extract_strided_slice %504 {offsets = [0, 256], sizes = [8, 128], strides = [1, 1]} : vector<8x384xf32> to vector<8x128xf32>
    %524 = vector.extract_strided_slice %506 {offsets = [0, 256], sizes = [8, 128], strides = [1, 1]} : vector<8x384xf32> to vector<8x128xf32>
    %525 = arith.addf %524, %438 : vector<8x128xf32>
    %526 = arith.mulf %514, %525 : vector<8x128xf32>
    %527 = arith.addf %523, %526 : vector<8x128xf32>
    %528 = math.tanh %527 : vector<8x128xf32>
    %cst_280 = arith.constant 1.000000e+00 : f32
    %529 = vector.broadcast %cst_280 : f32 to vector<8x128xf32>
    %530 = arith.subf %529, %522 : vector<8x128xf32>
    %531 = arith.mulf %530, %528 : vector<8x128xf32>
    %532 = arith.mulf %522, %501 : vector<8x128xf32>
    %533 = arith.addf %531, %532 : vector<8x128xf32>
    %534 = arith.addf %502, %533 : vector<8x128xf32>
    %c3_281 = arith.constant 3 : index
    %c0_282 = arith.constant 0 : index
    %c0_283 = arith.constant 0 : index
    %535 = vector.load %arg15[%c3_281, %c0_282, %c0_283] : memref<8x8x384xf32, #tpu.memory_space<vmem>>, vector<1x8x384xf32>
    %536 = vector.shape_cast %535 : vector<1x8x384xf32> to vector<8x384xf32>
    %537 = arith.truncf %533 : vector<8x128xf32> to vector<8x128xbf16>
    %cst_284 = arith.constant dense<0.000000e+00> : vector<8x384xf32>
    %538 = tpu.matmul %537, %433, %cst_284 {dimension_numbers = #tpu.dot_dimension_numbers<[1], [0], [0], [1], [0, 0, 1, 1], [], []>} : vector<8x128xbf16>, vector<128x384xbf16>, vector<8x384xf32> -> vector<8x384xf32>
    %539 = vector.extract_strided_slice %536 {offsets = [0, 0], sizes = [8, 128], strides = [1, 1]} : vector<8x384xf32> to vector<8x128xf32>
    %540 = vector.extract_strided_slice %538 {offsets = [0, 0], sizes = [8, 128], strides = [1, 1]} : vector<8x384xf32> to vector<8x128xf32>
    %541 = arith.addf %539, %540 : vector<8x128xf32>
    %542 = arith.negf %541 : vector<8x128xf32>
    %543 = math.exp %542 : vector<8x128xf32>
    %cst_285 = arith.constant 1.000000e+00 : f32
    %544 = vector.broadcast %cst_285 : f32 to vector<8x128xf32>
    %545 = arith.addf %544, %543 : vector<8x128xf32>
    %546 = arith.divf %544, %545 : vector<8x128xf32>
    %547 = vector.extract_strided_slice %536 {offsets = [0, 128], sizes = [8, 128], strides = [1, 1]} : vector<8x384xf32> to vector<8x128xf32>
    %548 = vector.extract_strided_slice %538 {offsets = [0, 128], sizes = [8, 128], strides = [1, 1]} : vector<8x384xf32> to vector<8x128xf32>
    %549 = arith.addf %547, %548 : vector<8x128xf32>
    %550 = arith.negf %549 : vector<8x128xf32>
    %551 = math.exp %550 : vector<8x128xf32>
    %cst_286 = arith.constant 1.000000e+00 : f32
    %552 = vector.broadcast %cst_286 : f32 to vector<8x128xf32>
    %553 = arith.addf %552, %551 : vector<8x128xf32>
    %554 = arith.divf %552, %553 : vector<8x128xf32>
    %555 = vector.extract_strided_slice %536 {offsets = [0, 256], sizes = [8, 128], strides = [1, 1]} : vector<8x384xf32> to vector<8x128xf32>
    %556 = vector.extract_strided_slice %538 {offsets = [0, 256], sizes = [8, 128], strides = [1, 1]} : vector<8x384xf32> to vector<8x128xf32>
    %557 = arith.addf %556, %438 : vector<8x128xf32>
    %558 = arith.mulf %546, %557 : vector<8x128xf32>
    %559 = arith.addf %555, %558 : vector<8x128xf32>
    %560 = math.tanh %559 : vector<8x128xf32>
    %cst_287 = arith.constant 1.000000e+00 : f32
    %561 = vector.broadcast %cst_287 : f32 to vector<8x128xf32>
    %562 = arith.subf %561, %554 : vector<8x128xf32>
    %563 = arith.mulf %562, %560 : vector<8x128xf32>
    %564 = arith.mulf %554, %533 : vector<8x128xf32>
    %565 = arith.addf %563, %564 : vector<8x128xf32>
    %566 = arith.addf %534, %565 : vector<8x128xf32>
    %c4_288 = arith.constant 4 : index
    %c0_289 = arith.constant 0 : index
    %c0_290 = arith.constant 0 : index
    %567 = vector.load %arg15[%c4_288, %c0_289, %c0_290] : memref<8x8x384xf32, #tpu.memory_space<vmem>>, vector<1x8x384xf32>
    %568 = vector.shape_cast %567 : vector<1x8x384xf32> to vector<8x384xf32>
    %569 = arith.truncf %565 : vector<8x128xf32> to vector<8x128xbf16>
    %cst_291 = arith.constant dense<0.000000e+00> : vector<8x384xf32>
    %570 = tpu.matmul %569, %433, %cst_291 {dimension_numbers = #tpu.dot_dimension_numbers<[1], [0], [0], [1], [0, 0, 1, 1], [], []>} : vector<8x128xbf16>, vector<128x384xbf16>, vector<8x384xf32> -> vector<8x384xf32>
    %571 = vector.extract_strided_slice %568 {offsets = [0, 0], sizes = [8, 128], strides = [1, 1]} : vector<8x384xf32> to vector<8x128xf32>
    %572 = vector.extract_strided_slice %570 {offsets = [0, 0], sizes = [8, 128], strides = [1, 1]} : vector<8x384xf32> to vector<8x128xf32>
    %573 = arith.addf %571, %572 : vector<8x128xf32>
    %574 = arith.negf %573 : vector<8x128xf32>
    %575 = math.exp %574 : vector<8x128xf32>
    %cst_292 = arith.constant 1.000000e+00 : f32
    %576 = vector.broadcast %cst_292 : f32 to vector<8x128xf32>
    %577 = arith.addf %576, %575 : vector<8x128xf32>
    %578 = arith.divf %576, %577 : vector<8x128xf32>
    %579 = vector.extract_strided_slice %568 {offsets = [0, 128], sizes = [8, 128], strides = [1, 1]} : vector<8x384xf32> to vector<8x128xf32>
    %580 = vector.extract_strided_slice %570 {offsets = [0, 128], sizes = [8, 128], strides = [1, 1]} : vector<8x384xf32> to vector<8x128xf32>
    %581 = arith.addf %579, %580 : vector<8x128xf32>
    %582 = arith.negf %581 : vector<8x128xf32>
    %583 = math.exp %582 : vector<8x128xf32>
    %cst_293 = arith.constant 1.000000e+00 : f32
    %584 = vector.broadcast %cst_293 : f32 to vector<8x128xf32>
    %585 = arith.addf %584, %583 : vector<8x128xf32>
    %586 = arith.divf %584, %585 : vector<8x128xf32>
    %587 = vector.extract_strided_slice %568 {offsets = [0, 256], sizes = [8, 128], strides = [1, 1]} : vector<8x384xf32> to vector<8x128xf32>
    %588 = vector.extract_strided_slice %570 {offsets = [0, 256], sizes = [8, 128], strides = [1, 1]} : vector<8x384xf32> to vector<8x128xf32>
    %589 = arith.addf %588, %438 : vector<8x128xf32>
    %590 = arith.mulf %578, %589 : vector<8x128xf32>
    %591 = arith.addf %587, %590 : vector<8x128xf32>
    %592 = math.tanh %591 : vector<8x128xf32>
    %cst_294 = arith.constant 1.000000e+00 : f32
    %593 = vector.broadcast %cst_294 : f32 to vector<8x128xf32>
    %594 = arith.subf %593, %586 : vector<8x128xf32>
    %595 = arith.mulf %594, %592 : vector<8x128xf32>
    %596 = arith.mulf %586, %565 : vector<8x128xf32>
    %597 = arith.addf %595, %596 : vector<8x128xf32>
    %598 = arith.addf %566, %597 : vector<8x128xf32>
    %c5_295 = arith.constant 5 : index
    %c0_296 = arith.constant 0 : index
    %c0_297 = arith.constant 0 : index
    %599 = vector.load %arg15[%c5_295, %c0_296, %c0_297] : memref<8x8x384xf32, #tpu.memory_space<vmem>>, vector<1x8x384xf32>
    %600 = vector.shape_cast %599 : vector<1x8x384xf32> to vector<8x384xf32>
    %601 = arith.truncf %597 : vector<8x128xf32> to vector<8x128xbf16>
    %cst_298 = arith.constant dense<0.000000e+00> : vector<8x384xf32>
    %602 = tpu.matmul %601, %433, %cst_298 {dimension_numbers = #tpu.dot_dimension_numbers<[1], [0], [0], [1], [0, 0, 1, 1], [], []>} : vector<8x128xbf16>, vector<128x384xbf16>, vector<8x384xf32> -> vector<8x384xf32>
    %603 = vector.extract_strided_slice %600 {offsets = [0, 0], sizes = [8, 128], strides = [1, 1]} : vector<8x384xf32> to vector<8x128xf32>
    %604 = vector.extract_strided_slice %602 {offsets = [0, 0], sizes = [8, 128], strides = [1, 1]} : vector<8x384xf32> to vector<8x128xf32>
    %605 = arith.addf %603, %604 : vector<8x128xf32>
    %606 = arith.negf %605 : vector<8x128xf32>
    %607 = math.exp %606 : vector<8x128xf32>
    %cst_299 = arith.constant 1.000000e+00 : f32
    %608 = vector.broadcast %cst_299 : f32 to vector<8x128xf32>
    %609 = arith.addf %608, %607 : vector<8x128xf32>
    %610 = arith.divf %608, %609 : vector<8x128xf32>
    %611 = vector.extract_strided_slice %600 {offsets = [0, 128], sizes = [8, 128], strides = [1, 1]} : vector<8x384xf32> to vector<8x128xf32>
    %612 = vector.extract_strided_slice %602 {offsets = [0, 128], sizes = [8, 128], strides = [1, 1]} : vector<8x384xf32> to vector<8x128xf32>
    %613 = arith.addf %611, %612 : vector<8x128xf32>
    %614 = arith.negf %613 : vector<8x128xf32>
    %615 = math.exp %614 : vector<8x128xf32>
    %cst_300 = arith.constant 1.000000e+00 : f32
    %616 = vector.broadcast %cst_300 : f32 to vector<8x128xf32>
    %617 = arith.addf %616, %615 : vector<8x128xf32>
    %618 = arith.divf %616, %617 : vector<8x128xf32>
    %619 = vector.extract_strided_slice %600 {offsets = [0, 256], sizes = [8, 128], strides = [1, 1]} : vector<8x384xf32> to vector<8x128xf32>
    %620 = vector.extract_strided_slice %602 {offsets = [0, 256], sizes = [8, 128], strides = [1, 1]} : vector<8x384xf32> to vector<8x128xf32>
    %621 = arith.addf %620, %438 : vector<8x128xf32>
    %622 = arith.mulf %610, %621 : vector<8x128xf32>
    %623 = arith.addf %619, %622 : vector<8x128xf32>
    %624 = math.tanh %623 : vector<8x128xf32>
    %cst_301 = arith.constant 1.000000e+00 : f32
    %625 = vector.broadcast %cst_301 : f32 to vector<8x128xf32>
    %626 = arith.subf %625, %618 : vector<8x128xf32>
    %627 = arith.mulf %626, %624 : vector<8x128xf32>
    %628 = arith.mulf %618, %597 : vector<8x128xf32>
    %629 = arith.addf %627, %628 : vector<8x128xf32>
    %630 = arith.addf %598, %629 : vector<8x128xf32>
    %c6_302 = arith.constant 6 : index
    %c0_303 = arith.constant 0 : index
    %c0_304 = arith.constant 0 : index
    %631 = vector.load %arg15[%c6_302, %c0_303, %c0_304] : memref<8x8x384xf32, #tpu.memory_space<vmem>>, vector<1x8x384xf32>
    %632 = vector.shape_cast %631 : vector<1x8x384xf32> to vector<8x384xf32>
    %633 = arith.truncf %629 : vector<8x128xf32> to vector<8x128xbf16>
    %cst_305 = arith.constant dense<0.000000e+00> : vector<8x384xf32>
    %634 = tpu.matmul %633, %433, %cst_305 {dimension_numbers = #tpu.dot_dimension_numbers<[1], [0], [0], [1], [0, 0, 1, 1], [], []>} : vector<8x128xbf16>, vector<128x384xbf16>, vector<8x384xf32> -> vector<8x384xf32>
    %635 = vector.extract_strided_slice %632 {offsets = [0, 0], sizes = [8, 128], strides = [1, 1]} : vector<8x384xf32> to vector<8x128xf32>
    %636 = vector.extract_strided_slice %634 {offsets = [0, 0], sizes = [8, 128], strides = [1, 1]} : vector<8x384xf32> to vector<8x128xf32>
    %637 = arith.addf %635, %636 : vector<8x128xf32>
    %638 = arith.negf %637 : vector<8x128xf32>
    %639 = math.exp %638 : vector<8x128xf32>
    %cst_306 = arith.constant 1.000000e+00 : f32
    %640 = vector.broadcast %cst_306 : f32 to vector<8x128xf32>
    %641 = arith.addf %640, %639 : vector<8x128xf32>
    %642 = arith.divf %640, %641 : vector<8x128xf32>
    %643 = vector.extract_strided_slice %632 {offsets = [0, 128], sizes = [8, 128], strides = [1, 1]} : vector<8x384xf32> to vector<8x128xf32>
    %644 = vector.extract_strided_slice %634 {offsets = [0, 128], sizes = [8, 128], strides = [1, 1]} : vector<8x384xf32> to vector<8x128xf32>
    %645 = arith.addf %643, %644 : vector<8x128xf32>
    %646 = arith.negf %645 : vector<8x128xf32>
    %647 = math.exp %646 : vector<8x128xf32>
    %cst_307 = arith.constant 1.000000e+00 : f32
    %648 = vector.broadcast %cst_307 : f32 to vector<8x128xf32>
    %649 = arith.addf %648, %647 : vector<8x128xf32>
    %650 = arith.divf %648, %649 : vector<8x128xf32>
    %651 = vector.extract_strided_slice %632 {offsets = [0, 256], sizes = [8, 128], strides = [1, 1]} : vector<8x384xf32> to vector<8x128xf32>
    %652 = vector.extract_strided_slice %634 {offsets = [0, 256], sizes = [8, 128], strides = [1, 1]} : vector<8x384xf32> to vector<8x128xf32>
    %653 = arith.addf %652, %438 : vector<8x128xf32>
    %654 = arith.mulf %642, %653 : vector<8x128xf32>
    %655 = arith.addf %651, %654 : vector<8x128xf32>
    %656 = math.tanh %655 : vector<8x128xf32>
    %cst_308 = arith.constant 1.000000e+00 : f32
    %657 = vector.broadcast %cst_308 : f32 to vector<8x128xf32>
    %658 = arith.subf %657, %650 : vector<8x128xf32>
    %659 = arith.mulf %658, %656 : vector<8x128xf32>
    %660 = arith.mulf %650, %629 : vector<8x128xf32>
    %661 = arith.addf %659, %660 : vector<8x128xf32>
    %662 = arith.addf %630, %661 : vector<8x128xf32>
    %c7_309 = arith.constant 7 : index
    %c0_310 = arith.constant 0 : index
    %c0_311 = arith.constant 0 : index
    %663 = vector.load %arg15[%c7_309, %c0_310, %c0_311] : memref<8x8x384xf32, #tpu.memory_space<vmem>>, vector<1x8x384xf32>
    %664 = vector.shape_cast %663 : vector<1x8x384xf32> to vector<8x384xf32>
    %665 = arith.truncf %661 : vector<8x128xf32> to vector<8x128xbf16>
    %cst_312 = arith.constant dense<0.000000e+00> : vector<8x384xf32>
    %666 = tpu.matmul %665, %433, %cst_312 {dimension_numbers = #tpu.dot_dimension_numbers<[1], [0], [0], [1], [0, 0, 1, 1], [], []>} : vector<8x128xbf16>, vector<128x384xbf16>, vector<8x384xf32> -> vector<8x384xf32>
    %667 = vector.extract_strided_slice %664 {offsets = [0, 0], sizes = [8, 128], strides = [1, 1]} : vector<8x384xf32> to vector<8x128xf32>
    %668 = vector.extract_strided_slice %666 {offsets = [0, 0], sizes = [8, 128], strides = [1, 1]} : vector<8x384xf32> to vector<8x128xf32>
    %669 = arith.addf %667, %668 : vector<8x128xf32>
    %670 = arith.negf %669 : vector<8x128xf32>
    %671 = math.exp %670 : vector<8x128xf32>
    %cst_313 = arith.constant 1.000000e+00 : f32
    %672 = vector.broadcast %cst_313 : f32 to vector<8x128xf32>
    %673 = arith.addf %672, %671 : vector<8x128xf32>
    %674 = arith.divf %672, %673 : vector<8x128xf32>
    %675 = vector.extract_strided_slice %664 {offsets = [0, 128], sizes = [8, 128], strides = [1, 1]} : vector<8x384xf32> to vector<8x128xf32>
    %676 = vector.extract_strided_slice %666 {offsets = [0, 128], sizes = [8, 128], strides = [1, 1]} : vector<8x384xf32> to vector<8x128xf32>
    %677 = arith.addf %675, %676 : vector<8x128xf32>
    %678 = arith.negf %677 : vector<8x128xf32>
    %679 = math.exp %678 : vector<8x128xf32>
    %cst_314 = arith.constant 1.000000e+00 : f32
    %680 = vector.broadcast %cst_314 : f32 to vector<8x128xf32>
    %681 = arith.addf %680, %679 : vector<8x128xf32>
    %682 = arith.divf %680, %681 : vector<8x128xf32>
    %683 = vector.extract_strided_slice %664 {offsets = [0, 256], sizes = [8, 128], strides = [1, 1]} : vector<8x384xf32> to vector<8x128xf32>
    %684 = vector.extract_strided_slice %666 {offsets = [0, 256], sizes = [8, 128], strides = [1, 1]} : vector<8x384xf32> to vector<8x128xf32>
    %685 = arith.addf %684, %438 : vector<8x128xf32>
    %686 = arith.mulf %674, %685 : vector<8x128xf32>
    %687 = arith.addf %683, %686 : vector<8x128xf32>
    %688 = math.tanh %687 : vector<8x128xf32>
    %cst_315 = arith.constant 1.000000e+00 : f32
    %689 = vector.broadcast %cst_315 : f32 to vector<8x128xf32>
    %690 = arith.subf %689, %682 : vector<8x128xf32>
    %691 = arith.mulf %690, %688 : vector<8x128xf32>
    %692 = arith.mulf %682, %661 : vector<8x128xf32>
    %693 = arith.addf %691, %692 : vector<8x128xf32>
    %694 = arith.addf %662, %693 : vector<8x128xf32>
    %cst_316 = arith.constant 1.250000e-01 : f32
    %695 = vector.broadcast %cst_316 : f32 to vector<8x128xf32>
    %696 = arith.mulf %694, %695 : vector<8x128xf32>
    %c0_317 = arith.constant 0 : index
    %c0_318 = arith.constant 0 : index
    %697 = vector.load %arg12[%c0_317, %c0_318] : memref<128x4xf32, #tpu.memory_space<vmem>>, vector<128x4xf32>
    %cst_319 = arith.constant dense<0.000000e+00> : vector<8x4xf32>
    %698 = tpu.matmul %696, %697, %cst_319 {dimension_numbers = #tpu.dot_dimension_numbers<[1], [0], [0], [1], [0, 0, 1, 1], [], []>} : vector<8x128xf32>, vector<128x4xf32>, vector<8x4xf32> -> vector<8x4xf32>
    %c0_320 = arith.constant 0 : index
    %c0_321 = arith.constant 0 : index
    %699 = vector.load %arg13[%c0_320, %c0_321] : memref<1x4xf32, #tpu.memory_space<vmem>>, vector<1x4xf32>
    %700 = vector.broadcast %699 : vector<1x4xf32> to vector<8x4xf32>
    %701 = arith.addf %698, %700 : vector<8x4xf32>
    %c0_322 = arith.constant 0 : index
    %c0_323 = arith.constant 0 : index
    %702 = vector.load %arg14[%c0_322, %c0_323] : memref<8x4xf32, #tpu.memory_space<vmem>>, vector<8x4xf32>
    tpu.vector_store %arg14[%c0_322, %c0_323], %701 {strides = array<i32>} : memref<8x4xf32, #tpu.memory_space<vmem>>, vector<8x4xf32>,
    return
  }
  func.func @transform_0(%arg0: i32) -> (i32, i32, i32) {
    %c0_i32 = arith.constant 0 : i32
    %c0_i32_0 = arith.constant 0 : i32
    %c0_i32_1 = arith.constant 0 : i32
    return %c0_i32, %arg0, %c0_i32_0 : i32, i32, i32
  }
  func.func @transform_1(%arg0: i32) -> (i32, i32) {
    %c0_i32 = arith.constant 0 : i32
    %c0_i32_0 = arith.constant 0 : i32
    %c0_i32_1 = arith.constant 0 : i32
    return %c0_i32, %c0_i32_0 : i32, i32
  }
  func.func @transform_2(%arg0: i32) -> (i32, i32) {
    %c0_i32 = arith.constant 0 : i32
    %c0_i32_0 = arith.constant 0 : i32
    %c0_i32_1 = arith.constant 0 : i32
    return %c0_i32, %c0_i32_0 : i32, i32
  }
  func.func @transform_3(%arg0: i32) -> (i32, i32) {
    %c0_i32 = arith.constant 0 : i32
    %c0_i32_0 = arith.constant 0 : i32
    %c0_i32_1 = arith.constant 0 : i32
    return %c0_i32, %c0_i32_0 : i32, i32
  }
  func.func @transform_4(%arg0: i32) -> (i32, i32) {
    %c0_i32 = arith.constant 0 : i32
    %c0_i32_0 = arith.constant 0 : i32
    %c0_i32_1 = arith.constant 0 : i32
    return %c0_i32, %c0_i32_0 : i32, i32
  }
  func.func @transform_5(%arg0: i32) -> (i32, i32) {
    %c0_i32 = arith.constant 0 : i32
    %c0_i32_0 = arith.constant 0 : i32
    %c0_i32_1 = arith.constant 0 : i32
    return %c0_i32, %c0_i32_0 : i32, i32
  }
  func.func @transform_6(%arg0: i32) -> (i32, i32) {
    %c0_i32 = arith.constant 0 : i32
    %c0_i32_0 = arith.constant 0 : i32
    %c0_i32_1 = arith.constant 0 : i32
    return %c0_i32, %c0_i32_0 : i32, i32
  }
  func.func @transform_7(%arg0: i32) -> (i32, i32) {
    %c0_i32 = arith.constant 0 : i32
    %c0_i32_0 = arith.constant 0 : i32
    %c0_i32_1 = arith.constant 0 : i32
    return %c0_i32, %c0_i32_0 : i32, i32
  }
  func.func @transform_8(%arg0: i32) -> (i32, i32) {
    %c0_i32 = arith.constant 0 : i32
    %c0_i32_0 = arith.constant 0 : i32
    %c0_i32_1 = arith.constant 0 : i32
    return %c0_i32, %c0_i32_0 : i32, i32
  }
  func.func @transform_9(%arg0: i32) -> (i32, i32) {
    %c0_i32 = arith.constant 0 : i32
    %c0_i32_0 = arith.constant 0 : i32
    %c0_i32_1 = arith.constant 0 : i32
    return %c0_i32, %c0_i32_0 : i32, i32
  }
  func.func @transform_10(%arg0: i32) -> (i32, i32) {
    %c0_i32 = arith.constant 0 : i32
    %c0_i32_0 = arith.constant 0 : i32
    %c0_i32_1 = arith.constant 0 : i32
    return %c0_i32, %c0_i32_0 : i32, i32
  }
  func.func @transform_11(%arg0: i32) -> (i32, i32) {
    %c0_i32 = arith.constant 0 : i32
    %c0_i32_0 = arith.constant 0 : i32
    %c0_i32_1 = arith.constant 0 : i32
    return %c0_i32, %c0_i32_0 : i32, i32
  }
  func.func @transform_12(%arg0: i32) -> (i32, i32) {
    %c0_i32 = arith.constant 0 : i32
    %c0_i32_0 = arith.constant 0 : i32
    %c0_i32_1 = arith.constant 0 : i32
    return %c0_i32, %c0_i32_0 : i32, i32
  }
  func.func @transform_13(%arg0: i32) -> (i32, i32) {
    %c0_i32 = arith.constant 0 : i32
    %c0_i32_0 = arith.constant 0 : i32
    return %arg0, %c0_i32 : i32, i32
  }
}

</mosaic_0001>

<bundles_post_ra>
// kernel: gru_model_forward.1
= control target key start
LH: loop header
LB: loop body
LE: loop exit
PB: predicated region body
PF: predicated region fallthrough
CT: control target
= control target key end

     0   :  { %18 = vsyncpa [#allocation6], 0  ;;  %s5461_s0 = inlined_call_operand.vmem [shape: f32[8,8,64], index: 0, kind: input, shape index: {}]   ;;  %s5462_s1 = inlined_call_operand.hbm [shape: bf16[64,384], index: 1, kind: input, shape index: {}]   ;;  %s5463_s2 = inlined_call_operand.hbm [shape: bf16[64,384], index: 2, kind: input, shape index: {}]   ;;  %s5464_s3 = inlined_call_operand.vmem [shape: f32[1,384], index: 3, kind: input, shape index: {}]   ;;  %s5465_s4 = inlined_call_operand.vmem [shape: bf16[128,384], index: 4, kind: input, shape index: {}]   ;;  %s5466_s5 = inlined_call_operand.vmem [shape: f32[1,128], index: 5, kind: input, shape index: {}]   ;;  %s5467_s6 = inlined_call_operand.hbm [shape: bf16[128,384], index: 6, kind: input, shape index: {}]   ;;  %s5468_s7 = inlined_call_operand.hbm [shape: bf16[128,384], index: 7, kind: input, shape index: {}]   ;;  %s5469_s8 = inlined_call_operand.vmem [shape: f32[1,384], index: 8, kind: input, shape index: {}]   ;;  %s5470_s9 = inlined_call_operand.hbm [shape: bf16[128,384], index: 9, kind: input, shape index: {}]   ;;  %s5471_s10 = inlined_call_operand.vmem [shape: f32[1,128], index: 10, kind: input, shape index: {}]   ;;  %s5472_s11 = inlined_call_operand.vmem [shape: f32[128,4], index: 11, kind: input, shape index: {}]   ;;  %s5473_s12 = inlined_call_operand.vmem [shape: f32[1,4], index: 12, kind: input, shape index: {}]   ;;  %s5474_s13 = inlined_call_operand.vmem [shape: f32[8,4], index: 13, kind: output, shape index: {}]  }
   0x1   :  { %19 = vsyncpa [#allocation8], 0 }
   0x2   :  { %20 = vsyncpa [#allocation11], 0  ;;  %s40_s27 = sshll.u32 %s5463_s2, 4  ;;  %s4120_s28 = smov [#allocation7]   ;;  %s41_s27 = int_to_ptr.hbm [resolvable:$true] %s40_s27 }
   0x3   :  { %s42_s29 = sshll.u32 %s4120_s28, 4  ;;  %s72_s15 = sshll.u32 %s5468_s7, 4  ;;  %s43_s29 = int_to_ptr.vmem [resolvable:$true] %s42_s29  ;;  %s73_s15 = int_to_ptr.hbm [resolvable:$true] %s72_s15 }
   0x4   :  { %s4121_s16 = smov 192   ;;  %s4122_s17 = smov 12  }
   0x5   :  { %48 = dma.hbm_to_vmem [thread:$0]  %s41_s27, 1536, %s43_s29, [#allocation8], %s4121_s16, %s4121_s16, %s4122_s17  }
   0x6   :  { %s4123_s18 = smov [#allocation10]   ;;  %s27_s22 = sshll.u32 %s5462_s1, 4  ;;  %s28_s22 = int_to_ptr.hbm [resolvable:$true] %s27_s22 }
   0x7   :  { %s74_s19 = sshll.u32 %s4123_s18, 4  ;;  %s59_s24 = sshll.u32 %s5467_s6, 4  ;;  %s75_s19 = int_to_ptr.vmem [resolvable:$true] %s74_s19  ;;  %s60_s24 = int_to_ptr.hbm [resolvable:$true] %s59_s24 }
   0x8   :  { %80 = dma.hbm_to_vmem [thread:$0]  %s73_s15, 3072, %s75_s19, [#allocation11], %s4121_s16, %s4121_s16, %s4122_s17  }
   0x9   :  { %s4124_s25 = smov [#allocation5]   ;;  %s4125_s7 = smov [#allocation9]  }
   0xa   :  { %s29_s26 = sshll.u32 %s4124_s25, 4  ;;  %s61_s27 = sshll.u32 %s4125_s7, 4  ;;  %s30_s26 = int_to_ptr.vmem [resolvable:$true] %s29_s26  ;;  %s62_s27 = int_to_ptr.vmem [resolvable:$true] %s61_s27 }
   0xb   :  { %35 = dma.hbm_to_vmem [thread:$0]  %s28_s22, 1536, %s30_s26, [#allocation6], %s4121_s16, %s4121_s16, %s4122_s17  }
   0xc   :  { %s87_s30 = sshll.u32 %s5470_s9, 4  ;;  %s4126_s1 = smov [#allocation12]   ;;  %s88_s30 = int_to_ptr.hbm [resolvable:$true] %s87_s30 }
   0xd   :  { %67 = dma.hbm_to_vmem [thread:$0]  %s60_s24, 3072, %s62_s27, [#allocation8], %s4121_s16, %s4121_s16, %s4122_s17  }
   0xe   :  { %s89_s14 = sshll.u32 %s4126_s1, 4  ;;  %s90_s14 = int_to_ptr.vmem [resolvable:$true] %s89_s14 }
   0xf   :  { %95 = dma.hbm_to_vmem [thread:$0]  %s88_s30, 3072, %s90_s14, [#allocation11], %s4121_s16, %s4121_s16, %s4122_s17  }
  0x10   :  { %4114 = dma.done.wait [#allocation6], 1536  }
  0x11   :  { %4115 = vsyncadd [#allocation6], 4294965760 }
  0x12   :  { %4116 = dma.done.wait [#allocation8], 4608  }
  0x13   :  { %4117 = vsyncadd [#allocation8], 4294962688 }
  0x14   :  { %4118 = dma.done.wait [#allocation11], 6144  }
  0x15   :  { %4119 = vsyncadd [#allocation11], 4294961152  ;;  %v3199_v0 = vld [vmem:[#allocation5 + $0x48] sm:$0xf]  ;;  %v3707_v1 = vld [vmem:[#allocation5 + $0x50] sm:$0xf0] }
  0x16   :  { %v3207_v2 = vld [vmem:[#allocation5 + $0x50] sm:$0xf]  ;;  %v3200_v3 = vor.u32 %v3707_v1, %v3199_v0  ;;  %v3708_v4 = vld [vmem:[#allocation5 + $0x58] sm:$0xf0]  ;;  %v3259_v5 = vld [vmem:[#allocation7 + $0x48] sm:$0xf] }
  0x17   :  { %v3719_v6 = vld [vmem:[#allocation7 + $0x50] sm:$0xf0]  ;;  %v3208_v7 = vor.u32 %v3708_v4, %v3207_v2  ;;  %v3187_v9 = vld [vmem:[#allocation5 + $0x30] sm:$0xf]  ;;  %v3704_v10 = vld [vmem:[#allocation5 + $0x38] sm:$0xf0] }
  0x18   :  { %v3260_v8 = vor.u32 %v3719_v6, %v3259_v5  ;;  %v3195_v11 = vld [vmem:[#allocation5 + $0x38] sm:$0xf]  ;;  %240 = vmatpush.bf16.msra.mxu0 %v3200_v3  ;;  %3817 = vmatpush.bf16.msra.mxu1 %v3200_v3  ;;  %v3188_v12 = vor.u32 %v3704_v10, %v3187_v9  ;;  %v3705_v13 = vld [vmem:[#allocation5 + $0x40] sm:$0xf0]  ;;  %v3247_v14 = vld [vmem:[#allocation7 + $0x30] sm:$0xf] }
  0x19   :  { %v3716_v15 = vld [vmem:[#allocation7 + $0x38] sm:$0xf0]  ;;  %298 = vmatpush.bf16.msra.mxu2 %v3208_v7  ;;  %v3196_v16 = vor.u32 %v3705_v13, %v3195_v11  ;;  %v3175_v18 = vld [vmem:[#allocation5 + $0x18] sm:$0xf]  ;;  %v3701_v19 = vld [vmem:[#allocation5 + $0x20] sm:$0xf0] }
  0x1a   :  { %431 = vmatpush.bf16.msra.mxu3 %v3260_v8  ;;  %v3248_v17 = vor.u32 %v3716_v15, %v3247_v14  ;;  %v3183_v20 = vld [vmem:[#allocation5 + $0x20] sm:$0xf]  ;;  %v3702_v21 = vld [vmem:[#allocation5 + $0x28] sm:$0xf0]  ;;  %v3235_v22 = vld [vmem:[#allocation7 + $0x18] sm:$0xf]  ;;  %v3176_v24 = vor.u32 %v3701_v19, %v3175_v18 }
  0x1b   :  { %v3713_v23 = vld [vmem:[#allocation7 + $0x20] sm:$0xf0]  ;;  %v3163_v25 = vld [vmem:[#allocation5] sm:$0xf]  ;;  %v3698_v26 = vld [vmem:[#allocation5 + $0x8] sm:$0xf0]  ;;  %v3184_v27 = vor.u32 %v3702_v21, %v3183_v20 }
  0x1c   :  { %241 = vmatpush.bf16.msra.mxu0 %v3188_v12  ;;  %3818 = vmatpush.bf16.msra.mxu1 %v3188_v12  ;;  %v3236_v28 = vor.u32 %v3713_v23, %v3235_v22  ;;  %v3171_v29 = vld [vmem:[#allocation5 + $0x8] sm:$0xf]  ;;  %v3699_v30 = vld [vmem:[#allocation5 + $0x10] sm:$0xf0]  ;;  %v3223_v31 = vld [vmem:[#allocation7] sm:$0xf]  ;;  %v3164_v38 = vor.u32 %v3698_v26, %v3163_v25 }
  0x1d   :  { %299 = vmatpush.bf16.msra.mxu2 %v3196_v16  ;;  %v3710_v32 = vld [vmem:[#allocation7 + $0x8] sm:$0xf0]  ;;  %v123_v33 = vld [vmem:[%s5461_s0] sm:$0xff]  ;;  %v129_v35 = vld [vmem:[%s5461_s0 + $0x30] sm:$0xff]  ;;  %v3172_v42 = vor.u32 %v3699_v30, %v3171_v29  ;;  %vm223_vm0 = vcmask 523264  }
  0x1e   :  { %432 = vmatpush.bf16.msra.mxu3 %v3248_v17  ;;  %v124_v34 = vld [vmem:[%s5461_s0 + $0x8] sm:$0xff]  ;;  %v3201_v37 = vld [vmem:[#allocation5 + $0x54] sm:$0xf0]  ;;  %v3224_v43 = vor.u32 %v3710_v32, %v3223_v31  ;;  %v3703_v45 = vld [vmem:[#allocation5 + $0x34] sm:$0xf] }
  0x1f   :  { %v3706_v36 = vld [vmem:[#allocation5 + $0x4c] sm:$0xf]  ;;  %v130_v39 = vld [vmem:[%s5461_s0 + $0x38] sm:$0xff]  ;;  %v4225_v47 = vpack.c.bf16 %v124_v34, %v123_v33  ;;  %v3189_v49 = vld [vmem:[#allocation5 + $0x3c] sm:$0xf0] }
  0x20   :  { %242 = vmatpush.bf16.msra.mxu0 %v3176_v24  ;;  %3819 = vmatpush.bf16.msra.mxu1 %v3176_v24  ;;  %v3718_v40 = vld [vmem:[#allocation7 + $0x4c] sm:$0xf]  ;;  %v3261_v41 = vld [vmem:[#allocation7 + $0x54] sm:$0xf0]  ;;  %v3204_v44 = vor.u32 %v3706_v36, %v3201_v37  ;;  %v4227_v48 = vpack.c.bf16 %v130_v39, %v129_v35  ;;  %v3715_v50 = vld [vmem:[#allocation7 + $0x34] sm:$0xf]  ;;  %v3192_v54 = vor.u32 %v3703_v45, %v3189_v49 }
  0x21   :  { %300 = vmatpush.bf16.msra.mxu2 %v3184_v27  ;;  %v3264_v46 = vor.u32 %v3718_v40, %v3261_v41  ;;  %v3249_v51 = vld [vmem:[#allocation7 + $0x3c] sm:$0xf0]  ;;  %v3367_v52 = vld [vmem:[%s5465_s4 + $0xa8] sm:$0xf]  ;;  %v3743_v53 = vld [vmem:[%s5465_s4 + $0xb0] sm:$0xf0] }
  0x22   :  { %433 = vmatpush.bf16.msra.mxu3 %v3236_v28  ;;  %v3252_v55 = vor.u32 %v3715_v50, %v3249_v51  ;;  %v4235_v56 = vor.u32 %v3743_v53, %v3367_v52  ;;  %v3700_v57 = vld [vmem:[#allocation5 + $0x1c] sm:$0xf]  ;;  %v3177_v58 = vld [vmem:[#allocation5 + $0x24] sm:$0xf0]  ;;  %v3697_v60 = vld [vmem:[#allocation5 + $0x4] sm:$0xf] }
  0x23   :  { %v3712_v59 = vld [vmem:[#allocation7 + $0x1c] sm:$0xf]  ;;  %v3237_v61 = vld [vmem:[#allocation7 + $0x24] sm:$0xf0]  ;;  %v3355_v62 = vld [vmem:[%s5465_s4 + $0x90] sm:$0xf]  ;;  %v3180_v0 = vor.u32 %v3700_v57, %v3177_v58 }
  0x24   :  { %243 = vmatpush.bf16.msra.mxu0 %v3164_v38  ;;  %3820 = vmatpush.bf16.msra.mxu1 %v3164_v38  ;;  %v3740_v63 = vld [vmem:[%s5465_s4 + $0x98] sm:$0xf0]  ;;  %v3165_v1 = vld [vmem:[#allocation5 + $0xc] sm:$0xf0]  ;;  %v3240_v2 = vor.u32 %v3712_v59, %v3237_v61  ;;  %v3343_v4 = vld [vmem:[%s5465_s4 + $0x78] sm:$0xf] }
  0x25   :  { %301 = vmatpush.bf16.msra.mxu2 %v3172_v42  ;;  %v4252_v3 = vor.u32 %v3740_v63, %v3355_v62  ;;  %v3737_v5 = vld [vmem:[%s5465_s4 + $0x80] sm:$0xf0]  ;;  %v3267_v6 = vld [vmem:[#allocation7 + $0x50] sm:$0xf]  ;;  %v3720_v9 = vld [vmem:[#allocation7 + $0x58] sm:$0xf0]  ;;  %v3168_v14 = vor.u32 %v3697_v60, %v3165_v1 }
  0x26   :  { %434 = vmatpush.bf16.msra.mxu3 %v3224_v43  ;;  %v3709_v7 = vld [vmem:[#allocation7 + $0x4] sm:$0xf]  ;;  %v3225_v8 = vld [vmem:[#allocation7 + $0xc] sm:$0xf0]  ;;  %v3742_v10 = vld [vmem:[%s5465_s4 + $0xac] sm:$0xf]  ;;  %v4267_v12 = vor.u32 %v3737_v5, %v3343_v4  ;;  %v3268_v18 = vor.u32 %v3720_v9, %v3267_v6 }
  0x27   :  { %3209 = vmatmul.msk.bf16.vlgmr.msra.gmra.mxu0 %vm223_vm0, %v4225_v47  ;;  %3212 = vmatmul.msk.bf16.vlgmr.msra.gmra.mxu1 %vm223_vm0, %v4227_v48  ;;  %v3369_v11 = vld [vmem:[%s5465_s4 + $0xb4] sm:$0xf0]  ;;  %v3331_v15 = vld [vmem:[%s5465_s4 + $0x60] sm:$0xf]  ;;  %v3734_v16 = vld [vmem:[%s5465_s4 + $0x68] sm:$0xf0]  ;;  %v3228_v17 = vor.u32 %v3709_v7, %v3225_v8 }
  0x28   :  { %269 = vmatpush.bf16.msrb.mxu1 %v3204_v44  ;;  %460 = vmatpush.bf16.msrb.mxu0 %v3264_v46  ;;  %v4269_v13 = vor.u32 %v3742_v10, %v3369_v11  ;;  %v125_v19 = vld [vmem:[%s5461_s0 + $0x10] sm:$0xff]  ;;  %v126_v20 = vld [vmem:[%s5461_s0 + $0x18] sm:$0xff]  ;;  %v4285_v21 = vor.u32 %v3734_v16, %v3331_v15  ;;  %v3717_v23 = vld [vmem:[#allocation7 + $0x40] sm:$0xf0] }
  0x29   :  { %3217 = vmatmul.msk.bf16.vlgmr.msra.gmra.mxu2 %vm223_vm0, %v4225_v47  ;;  %3269 = vmatmul.msk.bf16.vlgmr.msra.gmra.mxu3 %vm223_vm0, %v4225_v47  ;;  %v3255_v22 = vld [vmem:[#allocation7 + $0x38] sm:$0xf]  ;;  %v4287_v24 = vpack.c.bf16 %v126_v20, %v125_v19  ;;  %v3319_v26 = vld [vmem:[%s5465_s4 + $0x48] sm:$0xf]  ;;  %v3731_v27 = vld [vmem:[%s5465_s4 + $0x50] sm:$0xf0] }
  0x2a   :  { %815 = vmatpush.bf16.msrb.mxu2 %v4235_v56  ;;  %828 = vmatpush.bf16.msrb.mxu3 %v4269_v13  ;;  %v3256_v25 = vor.u32 %v3717_v23, %v3255_v22  ;;  %v4297_v28 = vor.u32 %v3731_v27, %v3319_v26  ;;  %v3243_v29 = vld [vmem:[#allocation7 + $0x20] sm:$0xf]  ;;  %v3714_v30 = vld [vmem:[#allocation7 + $0x28] sm:$0xf0]  ;;  %v3307_v31 = vld [vmem:[%s5465_s4 + $0x30] sm:$0xf] }
  0x2b   :  { %v3244_v32 = vor.u32 %v3714_v30, %v3243_v29  ;;  %v3728_v33 = vld [vmem:[%s5465_s4 + $0x38] sm:$0xf0]  ;;  %v3739_v34 = vld [vmem:[%s5465_s4 + $0x94] sm:$0xf]  ;;  %v3357_v35 = vld [vmem:[%s5465_s4 + $0x9c] sm:$0xf0] }
  0x2c   :  { %270 = vmatpush.bf16.msrb.mxu1 %v3192_v54  ;;  %461 = vmatpush.bf16.msrb.mxu0 %v3252_v55  ;;  %v4320_v36 = vor.u32 %v3728_v33, %v3307_v31  ;;  %v4322_v37 = vor.u32 %v3739_v34, %v3357_v35  ;;  %v3295_v38 = vld [vmem:[%s5465_s4 + $0x18] sm:$0xf]  ;;  %v3725_v39 = vld [vmem:[%s5465_s4 + $0x20] sm:$0xf0]  ;;  %v3736_v40 = vld [vmem:[%s5465_s4 + $0x7c] sm:$0xf] }
  0x2d   :  { %v3345_v41 = vld [vmem:[%s5465_s4 + $0x84] sm:$0xf0]  ;;  %v4341_v43 = vor.u32 %v3725_v39, %v3295_v38  ;;  %v3283_v44 = vld [vmem:[%s5465_s4] sm:$0xf]  ;;  %v3722_v45 = vld [vmem:[%s5465_s4 + $0x8] sm:$0xf0] }
  0x2e   :  { %816 = vmatpush.bf16.msrb.mxu2 %v4252_v3  ;;  %829 = vmatpush.bf16.msrb.mxu3 %v4322_v37  ;;  %v4337_v42 = vor.u32 %v3736_v40, %v3345_v41  ;;  %v3375_v46 = vld [vmem:[%s5465_s4 + $0xb0] sm:$0xf]  ;;  %v3744_v49 = vld [vmem:[%s5465_s4 + $0xb8] sm:$0xf0]  ;;  %v127_v50 = vld [vmem:[%s5461_s0 + $0x20] sm:$0xff]  ;;  %v4364_v52 = vor.u32 %v3722_v45, %v3283_v44  ;;  %v5475_v39 = vmov 0  }
  0x2f   :  { %v128_v51 = vld [vmem:[%s5461_s0 + $0x28] sm:$0xff]  ;;  %v4366_v53 = vor.u32 %v3744_v49, %v3375_v46  ;;  %v3363_v55 = vld [vmem:[%s5465_s4 + $0x98] sm:$0xf]  ;;  %v3741_v57 = vld [vmem:[%s5465_s4 + $0xa0] sm:$0xf0] }
  0x30   :  { %271 = vmatpush.bf16.msrb.mxu1 %v3180_v0  ;;  %462 = vmatpush.bf16.msrb.mxu0 %v3240_v2  ;;  %v4368_v54 = vpack.c.bf16 %v128_v51, %v127_v50  ;;  %v3231_v58 = vld [vmem:[#allocation7 + $0x8] sm:$0xf]  ;;  %v3711_v59 = vld [vmem:[#allocation7 + $0x10] sm:$0xf0]  ;;  %v4382_v60 = vor.u32 %v3741_v57, %v3363_v55  ;;  %v3733_v62 = vld [vmem:[%s5465_s4 + $0x64] sm:$0xf] }
  0x31   :  { %v3232_v61 = vor.u32 %v3711_v59, %v3231_v58  ;;  %v3333_v63 = vld [vmem:[%s5465_s4 + $0x6c] sm:$0xf0]  ;;  %v3351_v0 = vld [vmem:[%s5465_s4 + $0x80] sm:$0xf]  ;;  %v3738_v2 = vld [vmem:[%s5465_s4 + $0x88] sm:$0xf0] }
  0x32   :  { %817 = vmatpush.bf16.msrb.mxu2 %v4267_v12  ;;  %830 = vmatpush.bf16.msrb.mxu3 %v4337_v42  ;;  %v4397_v1 = vor.u32 %v3733_v62, %v3333_v63  ;;  %v4403_v4 = vor.u32 %v3738_v2, %v3351_v0  ;;  %v3730_v5 = vld [vmem:[%s5465_s4 + $0x4c] sm:$0xf]  ;;  %v3321_v6 = vld [vmem:[%s5465_s4 + $0x54] sm:$0xf0]  ;;  %v3339_v7 = vld [vmem:[%s5465_s4 + $0x68] sm:$0xf] }
  0x33   :  { %v3735_v8 = vld [vmem:[%s5465_s4 + $0x70] sm:$0xf0]  ;;  %v4418_v9 = vor.u32 %v3730_v5, %v3321_v6  ;;  %v3327_v11 = vld [vmem:[%s5465_s4 + $0x50] sm:$0xf]  ;;  %v3315_v16 = vld [vmem:[%s5465_s4 + $0x38] sm:$0xf] }
  0x34   :  { %272 = vmatpush.bf16.msrb.mxu1 %v3168_v14  ;;  %463 = vmatpush.bf16.msrb.mxu0 %v3228_v17  ;;  %v4423_v10 = vor.u32 %v3735_v8, %v3339_v7  ;;  %v3732_v14 = vld [vmem:[%s5465_s4 + $0x58] sm:$0xf0]  ;;  %v3729_v17 = vld [vmem:[%s5465_s4 + $0x40] sm:$0xf0]  ;;  %v3727_v19 = vld [vmem:[%s5465_s4 + $0x34] sm:$0xf] }
  0x35   :  { %v4435_v15 = vor.u32 %v3732_v14, %v3327_v11  ;;  %v3309_v20 = vld [vmem:[%s5465_s4 + $0x3c] sm:$0xf0]  ;;  %v3724_v26 = vld [vmem:[%s5465_s4 + $0x1c] sm:$0xf]  ;;  %v3297_v27 = vld [vmem:[%s5465_s4 + $0x24] sm:$0xf0] }
  0x36   :  { %818 = vmatpush.bf16.msrb.mxu2 %v4285_v21  ;;  %831 = vmatpush.bf16.msrb.mxu3 %v4397_v1  ;;  %v3303_v22 = vld [vmem:[%s5465_s4 + $0x20] sm:$0xf]  ;;  %v4464_v23 = vor.u32 %v3727_v19, %v3309_v20  ;;  %v4480_v30 = vor.u32 %v3724_v26, %v3297_v27  ;;  %v3291_v31 = vld [vmem:[%s5465_s4 + $0x8] sm:$0xf]  ;;  %v3721_v34 = vld [vmem:[%s5465_s4 + $0x4] sm:$0xf] }
  0x37   :  { %3210 = vmatmul.msk.bf16.gmra.mxu0 %vm223_vm0, %v4287_v24  ;;  %3213 = vmatmul.msk.bf16.vlgmr.msrb.gmra.mxu1 %vm223_vm0, %v4225_v47  ;;  %v3285_v35 = vld [vmem:[%s5465_s4 + $0xc] sm:$0xf0] }
  0x38   :  { %489 = vmatpush.bf16.msra.mxu1 %v3268_v18  ;;  %920 = vmatpush.bf16.msra.mxu0 %v4269_v13  ;;  %v4449_v18 = vor.u32 %v3729_v17, %v3315_v16  ;;  %v4508_v38 = vor.u32 %v3721_v34, %v3285_v35 }
  0x39   :  { %3218 = vmatmul.msk.bf16.gmra.mxu2 %vm223_vm0, %v4287_v24  ;;  %3270 = vmatmul.msk.bf16.gmra.mxu3 %vm223_vm0, %v4287_v24 }
  0x3a   :  { %819 = vmatpush.bf16.msrb.mxu2 %v4297_v28  ;;  %832 = vmatpush.bf16.msrb.mxu3 %v4418_v9 }
  0x3c   :  { %490 = vmatpush.bf16.msra.mxu1 %v3256_v25  ;;  %921 = vmatpush.bf16.msra.mxu0 %v4322_v37  ;;  %v3726_v25 = vld [vmem:[%s5465_s4 + $0x28] sm:$0xf0] }
  0x3d   :  { %v4478_v29 = vor.u32 %v3726_v25, %v3303_v22 }
  0x3e   :  { %820 = vmatpush.bf16.msrb.mxu2 %v4320_v36  ;;  %833 = vmatpush.bf16.msrb.mxu3 %v4464_v23 }
  0x40   :  { %491 = vmatpush.bf16.msra.mxu1 %v3244_v32  ;;  %922 = vmatpush.bf16.msra.mxu0 %v4337_v42  ;;  %v3723_v32 = vld [vmem:[%s5465_s4 + $0x10] sm:$0xf0] }
  0x41   :  { %v4491_v33 = vor.u32 %v3723_v32, %v3291_v31 }
  0x42   :  { %821 = vmatpush.bf16.msrb.mxu2 %v4341_v43  ;;  %834 = vmatpush.bf16.msrb.mxu3 %v4480_v30 }
  0x44   :  { %492 = vmatpush.bf16.msra.mxu1 %v3232_v61  ;;  %923 = vmatpush.bf16.msra.mxu0 %v4397_v1 }
  0x46   :  { %822 = vmatpush.bf16.msrb.mxu2 %v4364_v52  ;;  %835 = vmatpush.bf16.msrb.mxu3 %v4508_v38 }
  0x47   :  { %3211 = vmatmul.msk.bf16.gmra.mxu0 %vm223_vm0, %v4368_v54  ;;  %3214 = vmatmul.msk.bf16.gmra.mxu1 %vm223_vm0, %v4287_v24 }
  0x48   :  { %933 = vmatpush.bf16.msrb.mxu1 %v4366_v53  ;;  %924 = vmatpush.bf16.msra.mxu0 %v4418_v9 }
  0x49   :  { %3219 = vmatmul.msk.bf16.gmra.mxu2 %vm223_vm0, %v4368_v54  ;;  %3271 = vmatmul.msk.bf16.gmra.mxu3 %vm223_vm0, %v4368_v54 }
  0x4a   :  { %841 = vmatpush.bf16.msra.mxu2 %v4366_v53  ;;  %907 = vmatpush.bf16.msra.mxu3 %v4235_v56 }
  0x4c   :  { %934 = vmatpush.bf16.msrb.mxu1 %v4382_v60  ;;  %925 = vmatpush.bf16.msra.mxu0 %v4464_v23 }
  0x4e   :  { %842 = vmatpush.bf16.msra.mxu2 %v4382_v60  ;;  %908 = vmatpush.bf16.msra.mxu3 %v4252_v3 }
  0x50   :  { %935 = vmatpush.bf16.msrb.mxu1 %v4403_v4  ;;  %926 = vmatpush.bf16.msra.mxu0 %v4480_v30 }
  0x52   :  { %843 = vmatpush.bf16.msra.mxu2 %v4403_v4  ;;  %909 = vmatpush.bf16.msra.mxu3 %v4267_v12 }
  0x54   :  { %936 = vmatpush.bf16.msrb.mxu1 %v4423_v10  ;;  %927 = vmatpush.bf16.msra.mxu0 %v4508_v38 }
  0x56   :  { %844 = vmatpush.bf16.msra.mxu2 %v4423_v10  ;;  %910 = vmatpush.bf16.msra.mxu3 %v4285_v21 }
  0x57   :  { %3215 = vmatmul.msk.bf16.gmra.mxu1 %vm223_vm0, %v4368_v54  ;;  %3273 = vmatmul.msk.bf16.vlgmr.msrb.gmra.mxu0 %vm223_vm0, %v4225_v47 }
  0x58   :  { %937 = vmatpush.bf16.msrb.mxu1 %v4435_v15  ;;  %1026 = vmatpush.bf16.msrb.mxu0 %v4366_v53 }
  0x59   :  { %3220 = vmatmul.msk.bf16.gmra.mxu2 %vm223_vm0, %v4227_v48  ;;  %3272 = vmatmul.msk.bf16.gmra.mxu3 %vm223_vm0, %v4227_v48 }
  0x5a   :  { %845 = vmatpush.bf16.msra.mxu2 %v4435_v15  ;;  %911 = vmatpush.bf16.msra.mxu3 %v4297_v28 }
  0x5c   :  { %938 = vmatpush.bf16.msrb.mxu1 %v4449_v18  ;;  %1027 = vmatpush.bf16.msrb.mxu0 %v4382_v60 }
  0x5e   :  { %846 = vmatpush.bf16.msra.mxu2 %v4449_v18  ;;  %912 = vmatpush.bf16.msra.mxu3 %v4320_v36 }
  0x60   :  { %939 = vmatpush.bf16.msrb.mxu1 %v4478_v29  ;;  %1028 = vmatpush.bf16.msrb.mxu0 %v4403_v4 }
  0x62   :  { %847 = vmatpush.bf16.msra.mxu2 %v4478_v29  ;;  %913 = vmatpush.bf16.msra.mxu3 %v4341_v43 }
  0x64   :  { %940 = vmatpush.bf16.msrb.mxu1 %v4491_v33  ;;  %1029 = vmatpush.bf16.msrb.mxu0 %v4423_v10 }
  0x66   :  { %848 = vmatpush.bf16.msra.mxu2 %v4491_v33  ;;  %914 = vmatpush.bf16.msra.mxu3 %v4364_v52 }
  0x67   :  { %3216 = vmatmul.msk.bf16.gmra.mxu1 %vm223_vm0, %v4227_v48  ;;  %3274 = vmatmul.msk.bf16.gmra.mxu0 %vm223_vm0, %v4287_v24 }
  0x68   :  { %1030 = vmatpush.bf16.msrb.mxu0 %v4435_v15 }
  0x69   :  { %823 = vmatmul.bf16.vlgmr.msrb.gmra.mxu2 %v5475_v39  ;;  %836 = vmatmul.bf16.vlgmr.msrb.gmra.mxu3 %v5475_v39 }
  0x6a   :  { %1000 = vmatpush.bf16.msrb.mxu2 %v4235_v56  ;;  %1013 = vmatpush.bf16.msrb.mxu3 %v4269_v13 }
  0x6c   :  { %1031 = vmatpush.bf16.msrb.mxu0 %v4449_v18 }
  0x6e   :  { %1001 = vmatpush.bf16.msrb.mxu2 %v4252_v3  ;;  %1014 = vmatpush.bf16.msrb.mxu3 %v4322_v37 }
  0x70   :  { %1032 = vmatpush.bf16.msrb.mxu0 %v4478_v29 }
  0x72   :  { %1002 = vmatpush.bf16.msrb.mxu2 %v4267_v12  ;;  %1015 = vmatpush.bf16.msrb.mxu3 %v4337_v42 }
  0x74   :  { %1033 = vmatpush.bf16.msrb.mxu0 %v4491_v33 }
  0x76   :  { %1003 = vmatpush.bf16.msrb.mxu2 %v4285_v21  ;;  %1016 = vmatpush.bf16.msrb.mxu3 %v4397_v1 }
  0x77   :  { %3275 = vmatmul.msk.bf16.gmra.mxu0 %vm223_vm0, %v4368_v54  ;;  %3277 = vmatmul.msk.bf16.vlgmr.msra.gmra.mxu1 %vm223_vm0, %v4225_v47  ;;  %v151_v47 = vld [vmem:[%s5464_s3] sm:$0x7] }
  0x78   :  { %1093 = vmatpush.bf16.msra.mxu1 %v4235_v56  ;;  %v4605_v6 = vperm.slane %v151_v47, 1 }
  0x79   :  { %849 = vmatmul.bf16.vlgmr.msra.gmra.mxu2 %v5475_v39 }
  0x7a   :  { %1004 = vmatpush.bf16.msrb.mxu2 %v4297_v28  ;;  %1017 = vmatpush.bf16.msrb.mxu3 %v4418_v9 }
  0x7c   :  { %1094 = vmatpush.bf16.msra.mxu1 %v4252_v3 }
  0x7e   :  { %1005 = vmatpush.bf16.msrb.mxu2 %v4320_v36  ;;  %1018 = vmatpush.bf16.msrb.mxu3 %v4464_v23 }
  0x80   :  { %1095 = vmatpush.bf16.msra.mxu1 %v4267_v12 }
  0x82   :  { %1006 = vmatpush.bf16.msrb.mxu2 %v4341_v43  ;;  %1019 = vmatpush.bf16.msrb.mxu3 %v4480_v30 }
  0x84   :  { %1096 = vmatpush.bf16.msra.mxu1 %v4285_v21 }
  0x86   :  { %1007 = vmatpush.bf16.msrb.mxu2 %v4364_v52  ;;  %1020 = vmatpush.bf16.msrb.mxu3 %v4508_v38 }
  0x87   :  { %3276 = vmatmul.msk.bf16.gmra.mxu0 %vm223_vm0, %v4227_v48  ;;  %3278 = vmatmul.msk.bf16.gmra.mxu1 %vm223_vm0, %v4287_v24  ;;  %v4574_v24 = vperm.slane %v151_v47, 0 }
  0x88   :  { %1097 = vmatpush.bf16.msra.mxu1 %v4297_v28 }
  0x8a   :  { %1106 = vmatpush.bf16.msra.mxu2 %v4269_v13 }
  0x8c   :  { %1098 = vmatpush.bf16.msra.mxu1 %v4320_v36 }
  0x8e   :  { %1107 = vmatpush.bf16.msra.mxu2 %v4322_v37 }
  0x90   :  { %1099 = vmatpush.bf16.msra.mxu1 %v4341_v43 }
  0x92   :  { %1108 = vmatpush.bf16.msra.mxu2 %v4337_v42 }
  0x94   :  { %1100 = vmatpush.bf16.msra.mxu1 %v4364_v52 }
  0x96   :  { %1109 = vmatpush.bf16.msra.mxu2 %v4397_v1 }
  0x97   :  { %3279 = vmatmul.msk.bf16.gmra.mxu1 %vm223_vm0, %v4368_v54 }
  0x9a   :  { %1110 = vmatpush.bf16.msra.mxu2 %v4418_v9 }
  0x9e   :  { %1111 = vmatpush.bf16.msra.mxu2 %v4464_v23 }
  0xa2   :  { %1112 = vmatpush.bf16.msra.mxu2 %v4480_v30 }
  0xa4   :  { %v4577_v40 = vpop.f32.mrf.mxu0  ;;  %v260_v41 = vpop.f32.mrf.mxu1 }
  0xa5   :  { %v4581_v44 = vadd.f32 %v260_v41, %v4574_v24 }
  0xa6   :  { %1113 = vmatpush.bf16.msra.mxu2 %v4508_v38 }
  0xa7   :  { %5477 = vst [vmem:[#allocation16_spill] sm:$0xff] %v4581_v44  ;;  %3280 = vmatmul.msk.bf16.gmra.mxu1 %vm223_vm0, %v4227_v48  ;;  %v4600_v48 = vperm.slane %v151_v47, 2 }
  0xac   :  { %v4586_v45 = vpop.f32.mrf.mxu2  ;;  %v436_v46 = vpop.f32.mrf.mxu3 }
  0xad   :  { %v247_v49 = vpop.f32.mrf.mxu0  ;;  %v262_v50 = vpop.f32.mrf.mxu1 }
  0xae   :  { %v263_v51 = vadd.f32 %v262_v50, %v4574_v24 }
  0xb0   :  { %v4589_v54 = vadd.f32 %v436_v46, %v263_v51  ;;  %v248_v51 = vadd.f32 %v247_v49, %v4574_v24 }
  0xb2   :  { %5478 = vst [vmem:[#allocation17_spill] sm:$0xff] %v4589_v54 }
  0xb4   :  { %v4591_v55 = vpop.f32.mrf.mxu2  ;;  %v4593_v57 = vpop.f32.mrf.mxu3 }
  0xb5   :  { %5479 = vst [vmem:[#allocation18_spill] sm:$0xff] %v4593_v57  ;;  %v250_v58 = vpop.f32.mrf.mxu0  ;;  %v4595_v59 = vpop.f32.mrf.mxu1 }
  0xb6   :  { %v4598_v61 = vadd.f32 %v250_v58, %v4574_v24 }
  0xbc   :  { %v308_v62 = vpop.f32.mrf.mxu2  ;;  %v441_v63 = vpop.f32.mrf.mxu3 }
  0xbd   :  { %v4603_v0 = vadd.f32 %v308_v62, %v4600_v48  ;;  %v252_v2 = vpop.f32.mrf.mxu0  ;;  %v276_v5 = vpop.f32.mrf.mxu1 }
  0xbe   :  { %v253_v19 = vadd.f32 %v252_v2, %v4574_v24 }
  0xc4   :  { %v4607_v7 = vpop.f32.mrf.mxu2  ;;  %v4609_v8 = vpop.f32.mrf.mxu3 }
  0xc5   :  { %5480 = vst [vmem:[#allocation19_spill] sm:$0xff] %v4609_v8  ;;  %v255_v11 = vpop.f32.mrf.mxu0  ;;  %v279_v14 = vpop.f32.mrf.mxu1 }
  0xc6   :  { %v4612_v16 = vadd.f32 %v255_v11, %v4574_v24  ;;  %v4615_v17 = vadd.f32 %v279_v14, %v4605_v6 }
  0xcc   :  { %v313_v20 = vpop.f32.mrf.mxu2  ;;  %v446_v22 = vpop.f32.mrf.mxu3 }
  0xcd   :  { %v4619_v25 = vadd.f32 %v313_v20, %v4600_v48  ;;  %v4621_v26 = vadd.f32 %v446_v22, %v253_v19  ;;  %v257_v27 = vpop.f32.mrf.mxu0  ;;  %v281_v31 = vpop.f32.mrf.mxu1 }
  0xce   :  { %v258_v32 = vadd.f32 %v257_v27, %v4574_v24 }
  0xcf   :  { %5481 = vst [vmem:[#allocation20_spill] sm:$0xff] %v4619_v25 }
  0xd0   :  { %v4624_v34 = vadd.f32 %v441_v63, %v258_v32 }
  0xd2   :  { %5482 = vst [vmem:[#allocation21_spill] sm:$0xff] %v4624_v34 }
  0xd4   :  { %v315_v35 = vpop.f32.mrf.mxu2  ;;  %v4626_v47 = vpop.f32.mrf.mxu3 }
  0xd5   :  { %v284_v41 = vpop.f32.mrf.mxu1  ;;  %v465_v46 = vpop.f32.mrf.mxu0 }
  0xd6   :  { %v4629_v50 = vadd.f32 %v284_v41, %v4605_v6 }
  0xdc   :  { %v318_v58 = vpop.f32.mrf.mxu2  ;;  %v451_v62 = vpop.f32.mrf.mxu3 }
  0xdd   :  { %v4633_v2 = vadd.f32 %v318_v58, %v4600_v48  ;;  %v4635_v11 = vadd.f32 %v451_v62, %v248_v51  ;;  %v286_v14 = vpop.f32.mrf.mxu1  ;;  %v4637_v63 = vpop.f32.mrf.mxu0 }
  0xde   :  { %5484 = vst [vmem:[#allocation23_spill] sm:$0xff] %v4637_v63  ;;  %v287_v19 = vadd.f32 %v286_v14, %v4605_v6  ;;  %v282_v63 = vadd.f32 %v281_v31, %v4605_v6  ;;  %v316_v31 = vadd.f32 %v315_v35, %v4600_v48  ;;  %v311_v35 = vadd.f32 %v4607_v7, %v4600_v48 }
  0xdf   :  { %5483 = vst [vmem:[#allocation22_spill] sm:$0xff] %v4633_v2 }
  0xe4   :  { %v320_v20 = vpop.f32.mrf.mxu2  ;;  %v453_v49 = vpop.f32.mrf.mxu3 }
  0xe5   :  { %v289_v22 = vpop.f32.mrf.mxu1  ;;  %v470_v27 = vpop.f32.mrf.mxu0  ;;  %v321_v14 = vadd.f32 %v320_v20, %v4600_v48 }
  0xe6   :  { %v4641_v32 = vadd.f32 %v289_v22, %v4605_v6  ;;  %v4643_v41 = vadd.f32 %v470_v27, %v287_v19  ;;  %v246_v19 = vadd.f32 %v4577_v40, %v4574_v24 }
  0xe8   :  { %5485 = vst [vmem:[#allocation24_spill] sm:$0xff] %v4641_v32  ;;  %v545_v34 = vadd.f32 %v453_v49, %v246_v19 }
  0xe9   :  { %5486 = vst [vmem:[#allocation25_spill] sm:$0xff] %v4643_v41 }
  0xec   :  { %v824_v39 = vpop.f32.mrf.mxu2  ;;  %v837_v62 = vpop.f32.mrf.mxu3 }
  0xed   :  { %v291_v54 = vpop.f32.mrf.mxu1  ;;  %v4645_v58 = vpop.f32.mrf.mxu0 }
  0xee   :  { %v292_v51 = vadd.f32 %v291_v54, %v4605_v6  ;;  %v854_v54 = vadd.f32 %v824_v39, %v545_v34  ;;  %v275_v34 = vadd.f32 %v4595_v59, %v4605_v6 }
  0xf0   :  { %v4648_v2 = vadd.f32 %v465_v46, %v292_v51  ;;  %v3377_v20 = vmul.f32 -1.442695, %v854_v54 }
  0xf2   :  { %5487 = vst [vmem:[#allocation26_spill] sm:$0xff] %v4648_v2  ;;  %3832 = vpow2.f32 %v3377_v20 }
  0xf4   :  { %v826_v57 = vpop.f32.mrf.mxu2  ;;  %v839_v41 = vpop.f32.mrf.mxu3 }
  0xf5   :  { %v475_v44 = vpop.f32.mrf.mxu0  ;;  %v494_v22 = vpop.f32.mrf.mxu1  ;;  %v277_v57 = vadd.f32 %v276_v5, %v4605_v6 }
  0xf6   :  { %v4654_v27 = vadd.f32 %v475_v44, %v282_v63  ;;  %v4656_v32 = vadd.f32 %v494_v22, %v321_v14 }
  0xf8   :  { %5488 = vst [vmem:[#allocation27_spill] sm:$0xff] %v4656_v32  ;;  %v3833_v41 = vpop.eup %3832  ;;  %v304_v32 = vadd.f32 %v4586_v45, %v4600_v48 }
  0xf9   :  { %v858_v39 = vadd.f32 1.0, %v3833_v41 }
  0xfb   :  { %3834 = vrcp.f32 %v858_v39  ;;  %vm864_vm2 = vweird.f32 %v858_v39 }
  0xfc   :  { %v850_v25 = vpop.f32.mrf.mxu2 }
  0xfd   :  { %v4658_v46 = vpop.f32.mrf.mxu0  ;;  %v4660_v51 = vpop.f32.mrf.mxu1 }
  0xfe   :  { %5489 = vst [vmem:[#allocation28_spill] sm:$0xff] %v4660_v51 }
 0x104   :  { %v852_v2 = vpop.f32.mrf.mxu2 }
 0x105   :  { %v480_v24 = vpop.f32.mrf.mxu0  ;;  %v499_v40 = vpop.f32.mrf.mxu1 }
 0x106   :  { %v4664_v44 = vadd.f32 %v480_v24, %v277_v57  ;;  %v4666_v63 = vadd.f32 %v499_v40, %v316_v31  ;;  %v3835_v2 = vpop.eup %3834 }
 0x107   :  { %v860_v57 = vmul.f32 %v3835_v2, %v858_v39  ;;  %vm865_vm1 = vweird.f32 %v3835_v2 }
 0x108   :  { %5490 = vst [vmem:[#allocation29_spill] sm:$0xff] %v4666_v63  ;;  %vm866_vm3 = vmor %vm864_vm2, %vm865_vm1 }
 0x109   :  { %v861_v40 = vsub.f32 1.0, %v860_v57 }
 0x10b   :  { %v862_v6 = vmul.f32 %v3835_v2, %v861_v40 }
 0x10d   :  { %v482_v49 = vpop.f32.mrf.mxu0  ;;  %v4670_v14 = vpop.f32.mrf.mxu1 }
 0x10e   :  { %5491 = vst [vmem:[#allocation30_spill] sm:$0xff] %v4670_v14  ;;  %v546_v22 = vadd.f32 %v482_v49, %v275_v34  ;;  %v863_v34 = vadd.f32 %v3835_v2, %v862_v6  ;;  %v870_v49 = vand.u32 2147483648, %v858_v39 }
 0x110   :  { %v874_v5 = vadd.f32 %v837_v62, %v546_v22  ;;  %v306_v62 = vadd.f32 %v4591_v55, %v4600_v48  ;;  %v867_v57 = vsel %vm866_vm3, %v3835_v2, %v863_v34 }
 0x112   :  { %v3378_v19 = vmul.f32 -1.442695, %v874_v5  ;;  %v4683_v5 = vld [vmem:[%s5466_s5] ss:$0 sm:$0xff] }
 0x113   :  { %v894_v55 = vadd.f32 %v4683_v5, %v850_v25 }
 0x114   :  { %3836 = vpow2.f32 %v3378_v19  ;;  %v868_v19 = vand.u32 2147483647, %v858_v39 }
 0x115   :  { %v504_v54 = vpop.f32.mrf.mxu1 }
 0x116   :  { %v4674_v20 = vadd.f32 %v504_v54, %v311_v35  ;;  %vm869_vm4 = vcmp.eq.f32.partialorder %v868_v19, 8.507059e+37 }
 0x11a   :  { %v3837_v31 = vpop.eup %3836 }
 0x11b   :  { %v878_v24 = vadd.f32 1.0, %v3837_v31  ;;  %v871_v31 = vor.u32 1.1754944e-38, %v870_v49 }
 0x11d   :  { %3838 = vrcp.f32 %v878_v24  ;;  %v4676_v59 = vpop.f32.mrf.mxu1  ;;  %v872_v6 = vsel %vm869_vm4, %v871_v31, %v867_v57  ;;  %v890_v8 = vand.u32 2147483648, %v878_v24  ;;  %vm884_vm6 = vweird.f32 %v878_v24 }
 0x11e   :  { %v895_v14 = vmul.f32 %v894_v55, %v872_v6 }
 0x11f   :  { %v891_v34 = vor.u32 1.1754944e-38, %v890_v8 }
 0x123   :  { %v3839_v41 = vpop.eup %3838 }
 0x124   :  { %v880_v7 = vmul.f32 %v3839_v41, %v878_v24  ;;  %vm885_vm5 = vweird.f32 %v3839_v41 }
 0x125   :  { %v509_v22 = vpop.f32.mrf.mxu1  ;;  %vm886_vm7 = vmor %vm884_vm6, %vm885_vm5 }
 0x126   :  { %v881_v35 = vsub.f32 1.0, %v880_v7  ;;  %v4685_v54 = vadd.f32 %v509_v22, %v306_v62  ;;  %v888_v62 = vand.u32 2147483647, %v878_v24 }
 0x128   :  { %v882_v40 = vmul.f32 %v3839_v41, %v881_v35  ;;  %vm889_vm8 = vcmp.eq.f32.partialorder %v888_v62, 8.507059e+37 }
 0x12a   :  { %v883_v51 = vadd.f32 %v3839_v41, %v882_v40 }
 0x12c   :  { %v887_v2 = vsel %vm886_vm7, %v3839_v41, %v883_v51 }
 0x12d   :  { %v511_v63 = vpop.f32.mrf.mxu1  ;;  %v892_v49 = vsel %vm889_vm8, %v891_v34, %v887_v2 }
 0x12e   :  { %v547_v39 = vadd.f32 %v511_v63, %v304_v32  ;;  %v898_v25 = vsub.f32 1.0, %v892_v49  ;;  %v900_v35 = vmul.f32 0.0, %v892_v49 }
 0x130   :  { %v896_v7 = vadd.f32 %v895_v14, %v547_v39 }
 0x132   :  { %3840 = vtanh.f32 %v896_v7 }
 0x138   :  { %v3841_v22 = vpop.eup %3840 }
 0x139   :  { %v899_v19 = vmul.f32 %v3841_v22, %v898_v25 }
 0x13b   :  { %v4690_v45 = vadd.f32 %v900_v35, %v899_v19 }
 0x13d   :  { %v906_v48 = vpack.c.bf16 %v4690_v45, %v4690_v45 }
 0x13f   :  { %915 = vmatmul.bf16.vlgmr.msra.gmra.mxu3 %v906_v48  ;;  %928 = vmatmul.bf16.vlgmr.msra.gmra.mxu0 %v906_v48 }
 0x140   :  { %941 = vmatmul.bf16.vlgmr.msrb.gmra.mxu1 %v906_v48  ;;  %1119 = vmatpush.bf16.msra.mxu3 %v4366_v53 }
 0x141   :  { %1186 = vmatpush.bf16.msra.mxu0 %v4235_v56  ;;  %1199 = vmatpush.bf16.msrb.mxu1 %v4269_v13 }
 0x144   :  { %1120 = vmatpush.bf16.msra.mxu3 %v4382_v60 }
 0x145   :  { %1187 = vmatpush.bf16.msra.mxu0 %v4252_v3  ;;  %1200 = vmatpush.bf16.msrb.mxu1 %v4322_v37 }
 0x148   :  { %1121 = vmatpush.bf16.msra.mxu3 %v4403_v4 }
 0x149   :  { %1188 = vmatpush.bf16.msra.mxu0 %v4267_v12  ;;  %1201 = vmatpush.bf16.msrb.mxu1 %v4337_v42 }
 0x14c   :  { %1122 = vmatpush.bf16.msra.mxu3 %v4423_v10 }
 0x14d   :  { %1189 = vmatpush.bf16.msra.mxu0 %v4285_v21  ;;  %1202 = vmatpush.bf16.msrb.mxu1 %v4397_v1 }
 0x150   :  { %1123 = vmatpush.bf16.msra.mxu3 %v4435_v15 }
 0x151   :  { %1190 = vmatpush.bf16.msra.mxu0 %v4297_v28  ;;  %1203 = vmatpush.bf16.msrb.mxu1 %v4418_v9 }
 0x154   :  { %1124 = vmatpush.bf16.msra.mxu3 %v4449_v18 }
 0x155   :  { %1191 = vmatpush.bf16.msra.mxu0 %v4320_v36  ;;  %1204 = vmatpush.bf16.msrb.mxu1 %v4464_v23 }
 0x158   :  { %1125 = vmatpush.bf16.msra.mxu3 %v4478_v29 }
 0x159   :  { %1192 = vmatpush.bf16.msra.mxu0 %v4341_v43  ;;  %1205 = vmatpush.bf16.msrb.mxu1 %v4480_v30 }
 0x15c   :  { %1126 = vmatpush.bf16.msra.mxu3 %v4491_v33 }
 0x15d   :  { %1193 = vmatpush.bf16.msra.mxu0 %v4364_v52  ;;  %1206 = vmatpush.bf16.msrb.mxu1 %v4508_v38 }
 0x1bc   :  { %v929_v8 = vpop.f32.mrf.mxu0 }
 0x1bd   :  { %v966_v32 = vadd.f32 %v929_v8, %v4664_v44  ;;  %v942_v51 = vpop.f32.mrf.mxu1 }
 0x1bf   :  { %v3380_v63 = vmul.f32 -1.442695, %v966_v32  ;;  %v986_v32 = vadd.f32 %v4683_v5, %v942_v51 }
 0x1c1   :  { %3842 = vpow2.f32 %v3380_v63 }
 0x1c2   :  { %v916_v14 = vpop.f32.mrf.mxu3 }
 0x1c3   :  { %v946_v24 = vadd.f32 %v916_v14, %v4635_v11 }
 0x1c4   :  { %v931_v41 = vpop.f32.mrf.mxu0 }
 0x1c5   :  { %v3379_v57 = vmul.f32 -1.442695, %v946_v24  ;;  %v944_v31 = vpop.f32.mrf.mxu1 }
 0x1c7   :  { %v3843_v40 = vpop.eup %3842  ;;  %3844 = vpow2.f32 %v3379_v57 }
 0x1c8   :  { %v970_v55 = vadd.f32 1.0, %v3843_v40 }
 0x1ca   :  { %v918_v6 = vpop.f32.mrf.mxu3  ;;  %3846 = vrcp.f32 %v970_v55  ;;  %v982_v41 = vand.u32 2147483648, %v970_v55  ;;  %vm976_vm14 = vweird.f32 %v970_v55  ;;  %v980_v31 = vand.u32 2147483647, %v970_v55 }
 0x1cc   :  { %vm981_vm0 = vcmp.eq.f32.partialorder %v980_v31, 8.507059e+37 }
 0x1cd   :  { %v3845_v39 = vpop.eup %3844 }
 0x1ce   :  { %v950_v62 = vadd.f32 1.0, %v3845_v39  ;;  %v983_v39 = vor.u32 1.1754944e-38, %v982_v41 }
 0x1d0   :  { %3848 = vrcp.f32 %v950_v62  ;;  %v3847_v7 = vpop.eup %3846  ;;  %v962_v22 = vand.u32 2147483648, %v950_v62  ;;  %v960_v11 = vand.u32 2147483647, %v950_v62  ;;  %vm956_vm10 = vweird.f32 %v950_v62 }
 0x1d1   :  { %v972_v2 = vmul.f32 %v3847_v7, %v970_v55  ;;  %vm977_vm13 = vweird.f32 %v3847_v7  ;;  %v573_v55 = vadd.f32 %v4626_v47, %v4598_v61 }
 0x1d2   :  { %v963_v8 = vor.u32 1.1754944e-38, %v962_v22  ;;  %vm961_vm12 = vcmp.eq.f32.partialorder %v960_v11, 8.507059e+37  ;;  %vm978_vm15 = vmor %vm976_vm14, %vm977_vm13 }
 0x1d3   :  { %v973_v49 = vsub.f32 1.0, %v972_v2 }
 0x1d5   :  { %v974_v35 = vmul.f32 %v3847_v7, %v973_v49 }
 0x1d6   :  { %v3849_v44 = vpop.eup %3848 }
 0x1d7   :  { %v952_v34 = vmul.f32 %v3849_v44, %v950_v62  ;;  %vm957_vm9 = vweird.f32 %v3849_v44  ;;  %v975_v14 = vadd.f32 %v3847_v7, %v974_v35 }
 0x1d8   :  { %vm958_vm11 = vmor %vm956_vm10, %vm957_vm9 }
 0x1d9   :  { %v953_v25 = vsub.f32 1.0, %v952_v34  ;;  %v979_v6 = vsel %vm978_vm15, %v3847_v7, %v975_v14  ;;  %v574_v7 = vadd.f32 %v4658_v46, %v4615_v17 }
 0x1da   :  { %v984_v62 = vsel %vm981_vm0, %v983_v39, %v979_v6 }
 0x1db   :  { %v954_v19 = vmul.f32 %v3849_v44, %v953_v25  ;;  %v990_v2 = vsub.f32 1.0, %v984_v62 }
 0x1dd   :  { %v955_v48 = vadd.f32 %v3849_v44, %v954_v19 }
 0x1df   :  { %v959_v63 = vsel %vm958_vm11, %v3849_v44, %v955_v48  ;;  %v992_v44 = vmul.f32 %v984_v62, %v4690_v45 }
 0x1e0   :  { %v964_v24 = vsel %vm961_vm12, %v963_v8, %v959_v63 }
 0x1e1   :  { %v987_v57 = vmul.f32 %v986_v32, %v964_v24 }
 0x1e3   :  { %v988_v40 = vadd.f32 %v987_v57, %v4685_v54 }
 0x1e5   :  { %3850 = vtanh.f32 %v988_v40 }
 0x1eb   :  { %v3851_v34 = vpop.eup %3850 }
 0x1ec   :  { %v991_v51 = vmul.f32 %v3851_v34, %v990_v2 }
 0x1ee   :  { %v4723_v49 = vadd.f32 %v992_v44, %v991_v51 }
 0x1f0   :  { %v999_v25 = vpack.c.bf16 %v4723_v49, %v4723_v49 }
 0x1f2   :  { %1008 = vmatmul.bf16.vlgmr.msrb.gmra.mxu2 %v999_v25  ;;  %1021 = vmatmul.bf16.vlgmr.msrb.gmra.mxu3 %v999_v25 }
 0x1f3   :  { %1034 = vmatmul.bf16.vlgmr.msrb.gmra.mxu0 %v999_v25  ;;  %1212 = vmatpush.bf16.msrb.mxu2 %v4366_v53 }
 0x1f4   :  { %1279 = vmatpush.bf16.msrb.mxu3 %v4235_v56  ;;  %1292 = vmatpush.bf16.msrb.mxu0 %v4269_v13 }
 0x1f7   :  { %1213 = vmatpush.bf16.msrb.mxu2 %v4382_v60 }
 0x1f8   :  { %1280 = vmatpush.bf16.msrb.mxu3 %v4252_v3  ;;  %1293 = vmatpush.bf16.msrb.mxu0 %v4322_v37 }
 0x1fb   :  { %1214 = vmatpush.bf16.msrb.mxu2 %v4403_v4 }
 0x1fc   :  { %1281 = vmatpush.bf16.msrb.mxu3 %v4267_v12  ;;  %1294 = vmatpush.bf16.msrb.mxu0 %v4337_v42 }
 0x1ff   :  { %1215 = vmatpush.bf16.msrb.mxu2 %v4423_v10 }
 0x200   :  { %1282 = vmatpush.bf16.msrb.mxu3 %v4285_v21  ;;  %1295 = vmatpush.bf16.msrb.mxu0 %v4397_v1 }
 0x203   :  { %1216 = vmatpush.bf16.msrb.mxu2 %v4435_v15 }
 0x204   :  { %1283 = vmatpush.bf16.msrb.mxu3 %v4297_v28  ;;  %1296 = vmatpush.bf16.msrb.mxu0 %v4418_v9 }
 0x207   :  { %1217 = vmatpush.bf16.msrb.mxu2 %v4449_v18 }
 0x208   :  { %1284 = vmatpush.bf16.msrb.mxu3 %v4320_v36  ;;  %1297 = vmatpush.bf16.msrb.mxu0 %v4464_v23 }
 0x20b   :  { %1218 = vmatpush.bf16.msrb.mxu2 %v4478_v29 }
 0x20c   :  { %1285 = vmatpush.bf16.msrb.mxu3 %v4341_v43  ;;  %1298 = vmatpush.bf16.msrb.mxu0 %v4480_v30 }
 0x20f   :  { %1219 = vmatpush.bf16.msrb.mxu2 %v4491_v33 }
 0x210   :  { %1286 = vmatpush.bf16.msrb.mxu3 %v4364_v52  ;;  %1299 = vmatpush.bf16.msrb.mxu0 %v4508_v38 }
 0x270   :  { %v1035_v54 = vpop.f32.mrf.mxu0 }
 0x271   :  { %v1079_v25 = vadd.f32 %v4683_v5, %v1035_v54 }
 0x275   :  { %v1009_v22 = vpop.f32.mrf.mxu2  ;;  %v1022_v19 = vpop.f32.mrf.mxu3 }
 0x276   :  { %v1039_v11 = vadd.f32 %v1009_v22, %v573_v55  ;;  %v1059_v35 = vadd.f32 %v1022_v19, %v574_v7  ;;  %v575_v19 = vadd.f32 %v4676_v59, %v4603_v0 }
 0x278   :  { %v3381_v48 = vmul.f32 -1.442695, %v1039_v11  ;;  %v3382_v8 = vmul.f32 -1.442695, %v1059_v35  ;;  %v1037_v32 = vpop.f32.mrf.mxu0 }
 0x27a   :  { %3852 = vpow2.f32 %v3381_v48 }
 0x27b   :  { %3854 = vpow2.f32 %v3382_v8 }
 0x27d   :  { %v1011_v63 = vpop.f32.mrf.mxu2  ;;  %v1024_v14 = vpop.f32.mrf.mxu3 }
 0x280   :  { %v3853_v24 = vpop.eup %3852 }
 0x281   :  { %v3855_v41 = vpop.eup %3854  ;;  %v1043_v57 = vadd.f32 1.0, %v3853_v24 }
 0x282   :  { %v1063_v31 = vadd.f32 1.0, %v3855_v41 }
 0x283   :  { %3856 = vrcp.f32 %v1043_v57  ;;  %v1055_v6 = vand.u32 2147483648, %v1043_v57  ;;  %v1053_v2 = vand.u32 2147483647, %v1043_v57  ;;  %vm1049_vm2 = vweird.f32 %v1043_v57 }
 0x284   :  { %3858 = vrcp.f32 %v1063_v31  ;;  %v1075_v35 = vand.u32 2147483648, %v1063_v31  ;;  %vm1069_vm6 = vweird.f32 %v1063_v31  ;;  %v1073_v48 = vand.u32 2147483647, %v1063_v31 }
 0x285   :  { %v1056_v44 = vor.u32 1.1754944e-38, %v1055_v6  ;;  %vm1054_vm4 = vcmp.eq.f32.partialorder %v1053_v2, 8.507059e+37 }
 0x286   :  { %v1076_v63 = vor.u32 1.1754944e-38, %v1075_v35  ;;  %vm1074_vm8 = vcmp.eq.f32.partialorder %v1073_v48, 8.507059e+37 }
 0x289   :  { %v3857_v61 = vpop.eup %3856 }
 0x28a   :  { %v3859_v47 = vpop.eup %3858  ;;  %v1045_v17 = vmul.f32 %v3857_v61, %v1043_v57  ;;  %vm1050_vm1 = vweird.f32 %v3857_v61 }
 0x28b   :  { %v1065_v46 = vmul.f32 %v3859_v47, %v1063_v31  ;;  %vm1051_vm3 = vmor %vm1049_vm2, %vm1050_vm1  ;;  %vm1070_vm5 = vweird.f32 %v3859_v47 }
 0x28c   :  { %v1046_v40 = vsub.f32 1.0, %v1045_v17  ;;  %vm1071_vm7 = vmor %vm1069_vm6, %vm1070_vm5 }
 0x28d   :  { %v1066_v39 = vsub.f32 1.0, %v1065_v46 }
 0x28e   :  { %v1047_v62 = vmul.f32 %v3857_v61, %v1046_v40 }
 0x28f   :  { %v1067_v34 = vmul.f32 %v3859_v47, %v1066_v39 }
 0x290   :  { %v1048_v51 = vadd.f32 %v3857_v61, %v1047_v62 }
 0x291   :  { %v1068_v22 = vadd.f32 %v3859_v47, %v1067_v34 }
 0x292   :  { %v1052_v55 = vsel %vm1051_vm3, %v3857_v61, %v1048_v51 }
 0x293   :  { %v1057_v7 = vsel %vm1054_vm4, %v1056_v44, %v1052_v55  ;;  %v1072_v32 = vsel %vm1071_vm7, %v3859_v47, %v1068_v22 }
 0x294   :  { %v1080_v11 = vmul.f32 %v1079_v25, %v1057_v7  ;;  %v1077_v14 = vsel %vm1074_vm8, %v1076_v63, %v1072_v32 }
 0x295   :  { %v1083_v54 = vsub.f32 1.0, %v1077_v14  ;;  %v1085_v57 = vmul.f32 %v1077_v14, %v4723_v49 }
 0x296   :  { %v1081_v8 = vadd.f32 %v1080_v11, %v575_v19 }
 0x298   :  { %3860 = vtanh.f32 %v1081_v8 }
 0x29e   :  { %v3861_v24 = vpop.eup %3860 }
 0x29f   :  { %v1084_v41 = vmul.f32 %v3861_v24, %v1083_v54 }
 0x2a1   :  { %v4759_v61 = vadd.f32 %v1085_v57, %v1084_v41 }
 0x2a3   :  { %v1092_v0 = vpack.c.bf16 %v4759_v61, %v4759_v61 }
 0x2a5   :  { %1101 = vmatmul.bf16.vlgmr.msra.gmra.mxu1 %v1092_v0  ;;  %1114 = vmatmul.bf16.vlgmr.msra.gmra.mxu2 %v1092_v0 }
 0x2a6   :  { %1127 = vmatmul.bf16.vlgmr.msra.gmra.mxu3 %v1092_v0  ;;  %1305 = vmatpush.bf16.msra.mxu1 %v4366_v53 }
 0x2a7   :  { %1372 = vmatpush.bf16.msra.mxu2 %v4235_v56  ;;  %1385 = vmatpush.bf16.msra.mxu3 %v4269_v13 }
 0x2aa   :  { %1306 = vmatpush.bf16.msra.mxu1 %v4382_v60 }
 0x2ab   :  { %1373 = vmatpush.bf16.msra.mxu2 %v4252_v3  ;;  %1386 = vmatpush.bf16.msra.mxu3 %v4322_v37 }
 0x2ae   :  { %1307 = vmatpush.bf16.msra.mxu1 %v4403_v4 }
 0x2af   :  { %1374 = vmatpush.bf16.msra.mxu2 %v4267_v12  ;;  %1387 = vmatpush.bf16.msra.mxu3 %v4337_v42 }
 0x2b2   :  { %1308 = vmatpush.bf16.msra.mxu1 %v4423_v10 }
 0x2b3   :  { %1375 = vmatpush.bf16.msra.mxu2 %v4285_v21  ;;  %1388 = vmatpush.bf16.msra.mxu3 %v4397_v1 }
 0x2b6   :  { %1309 = vmatpush.bf16.msra.mxu1 %v4435_v15 }
 0x2b7   :  { %1376 = vmatpush.bf16.msra.mxu2 %v4297_v28  ;;  %1389 = vmatpush.bf16.msra.mxu3 %v4418_v9 }
 0x2ba   :  { %1310 = vmatpush.bf16.msra.mxu1 %v4449_v18 }
 0x2bb   :  { %1377 = vmatpush.bf16.msra.mxu2 %v4320_v36  ;;  %1390 = vmatpush.bf16.msra.mxu3 %v4464_v23 }
 0x2be   :  { %1311 = vmatpush.bf16.msra.mxu1 %v4478_v29 }
 0x2bf   :  { %1378 = vmatpush.bf16.msra.mxu2 %v4341_v43  ;;  %1391 = vmatpush.bf16.msra.mxu3 %v4480_v30 }
 0x2c2   :  { %1312 = vmatpush.bf16.msra.mxu1 %v4491_v33 }
 0x2c3   :  { %1379 = vmatpush.bf16.msra.mxu2 %v4364_v52  ;;  %1392 = vmatpush.bf16.msra.mxu3 %v4508_v38 }
 0x322   :  { %v1102_v59 = vpop.f32.mrf.mxu1 }
 0x323   :  { %v1132_v31 = vadd.f32 %v1102_v59, %v4621_v26 }
 0x325   :  { %v3383_v47 = vmul.f32 -1.442695, %v1132_v31 }
 0x327   :  { %3862 = vpow2.f32 %v3383_v47 }
 0x328   :  { %v1115_v17 = vpop.f32.mrf.mxu2 }
 0x329   :  { %v1152_v46 = vadd.f32 %v1115_v17, %v4654_v27  ;;  %v1128_v40 = vpop.f32.mrf.mxu3 }
 0x32a   :  { %v1104_v6 = vpop.f32.mrf.mxu1  ;;  %v1172_v14 = vadd.f32 %v4683_v5, %v1128_v40 }
 0x32b   :  { %v3384_v39 = vmul.f32 -1.442695, %v1152_v46 }
 0x32d   :  { %v3863_v62 = vpop.eup %3862  ;;  %3864 = vpow2.f32 %v3384_v39 }
 0x32e   :  { %v1136_v2 = vadd.f32 1.0, %v3863_v62 }
 0x330   :  { %3866 = vrcp.f32 %v1136_v2  ;;  %v1117_v34 = vpop.f32.mrf.mxu2  ;;  %v1148_v22 = vand.u32 2147483648, %v1136_v2  ;;  %v1146_v11 = vand.u32 2147483647, %v1136_v2  ;;  %vm1142_vm10 = vweird.f32 %v1136_v2 }
 0x331   :  { %v1130_v51 = vpop.f32.mrf.mxu3 }
 0x332   :  { %v1149_v8 = vor.u32 1.1754944e-38, %v1148_v22  ;;  %vm1147_vm12 = vcmp.eq.f32.partialorder %v1146_v11, 8.507059e+37 }
 0x333   :  { %v3865_v44 = vpop.eup %3864 }
 0x334   :  { %v1156_v25 = vadd.f32 1.0, %v3865_v44 }
 0x336   :  { %v3867_v55 = vpop.eup %3866  ;;  %3868 = vrcp.f32 %v1156_v25  ;;  %v1168_v41 = vand.u32 2147483648, %v1156_v25  ;;  %v1166_v0 = vand.u32 2147483647, %v1156_v25  ;;  %vm1162_vm14 = vweird.f32 %v1156_v25 }
 0x337   :  { %v1138_v7 = vmul.f32 %v3867_v55, %v1136_v2  ;;  %vm1143_vm9 = vweird.f32 %v3867_v55 }
 0x338   :  { %vm1144_vm11 = vmor %vm1142_vm10, %vm1143_vm9  ;;  %v1169_v47 = vor.u32 1.1754944e-38, %v1168_v41  ;;  %vm1167_vm0 = vcmp.eq.f32.partialorder %v1166_v0, 8.507059e+37 }
 0x339   :  { %v1139_v26 = vsub.f32 1.0, %v1138_v7 }
 0x33b   :  { %v1140_v19 = vmul.f32 %v3867_v55, %v1139_v26 }
 0x33c   :  { %v3869_v27 = vpop.eup %3868 }
 0x33d   :  { %v1158_v35 = vmul.f32 %v3869_v27, %v1156_v25  ;;  %v1141_v48 = vadd.f32 %v3867_v55, %v1140_v19  ;;  %vm1163_vm13 = vweird.f32 %v3869_v27 }
 0x33e   :  { %vm1164_vm15 = vmor %vm1162_vm14, %vm1163_vm13 }
 0x33f   :  { %v1159_v32 = vsub.f32 1.0, %v1158_v35  ;;  %v1145_v63 = vsel %vm1144_vm11, %v3867_v55, %v1141_v48 }
 0x340   :  { %v1150_v54 = vsel %vm1147_vm12, %v1149_v8, %v1145_v63  ;;  %v5494_v63 = vld [vmem:[#allocation30_spill] sm:$0xff] }
 0x341   :  { %v1160_v24 = vmul.f32 %v3869_v27, %v1159_v32  ;;  %v1173_v57 = vmul.f32 %v1172_v14, %v1150_v54  ;;  %v5493_v32 = vld [vmem:[#allocation20_spill] sm:$0xff] }
 0x342   :  { %v603_v14 = vadd.f32 %v5494_v63, %v5493_v32  ;;  %v3395_v32 = vld [vmem:[#allocation9] sm:$0xf]  ;;  %v3746_v63 = vld [vmem:[#allocation9 + $0x8] sm:$0xf0] }
 0x343   :  { %v1161_v59 = vadd.f32 %v3869_v27, %v1160_v24  ;;  %v1174_v31 = vadd.f32 %v1173_v57, %v4674_v20 }
 0x345   :  { %v1165_v17 = vsel %vm1164_vm15, %v3869_v27, %v1161_v59  ;;  %3870 = vtanh.f32 %v1174_v31 }
 0x346   :  { %v1170_v46 = vsel %vm1167_vm0, %v1169_v47, %v1165_v17 }
 0x347   :  { %v1176_v6 = vsub.f32 1.0, %v1170_v46  ;;  %v1178_v40 = vmul.f32 %v1170_v46, %v4759_v61 }
 0x34b   :  { %v3871_v39 = vpop.eup %3870 }
 0x34c   :  { %v1177_v62 = vmul.f32 %v3871_v39, %v1176_v6 }
 0x34e   :  { %v4792_v2 = vadd.f32 %v1178_v40, %v1177_v62 }
 0x350   :  { %v1185_v34 = vpack.c.bf16 %v4792_v2, %v4792_v2 }
 0x352   :  { %1194 = vmatmul.bf16.vlgmr.msra.gmra.mxu0 %v1185_v34  ;;  %1207 = vmatmul.bf16.vlgmr.msrb.gmra.mxu1 %v1185_v34 }
 0x353   :  { %1220 = vmatmul.bf16.vlgmr.msrb.gmra.mxu2 %v1185_v34  ;;  %1398 = vmatpush.bf16.msra.mxu0 %v4366_v53  ;;  %v5495_v34 = vld [vmem:[#allocation25_spill] sm:$0xff] }
 0x354   :  { %1465 = vmatpush.bf16.msrb.mxu1 %v4235_v56  ;;  %1478 = vmatpush.bf16.msrb.mxu2 %v4269_v13  ;;  %v602_v56 = vadd.f32 %v4645_v58, %v4629_v50 }
 0x357   :  { %1399 = vmatpush.bf16.msra.mxu0 %v4382_v60 }
 0x358   :  { %1466 = vmatpush.bf16.msrb.mxu1 %v4252_v3  ;;  %1479 = vmatpush.bf16.msrb.mxu2 %v4322_v37  ;;  %v5492_v3 = vld [vmem:[#allocation19_spill] sm:$0xff] }
 0x35b   :  { %1400 = vmatpush.bf16.msra.mxu0 %v4403_v4 }
 0x35c   :  { %1467 = vmatpush.bf16.msrb.mxu1 %v4267_v12  ;;  %1480 = vmatpush.bf16.msrb.mxu2 %v4337_v42  ;;  %v601_v12 = vadd.f32 %v5492_v3, %v4612_v16 }
 0x35f   :  { %1401 = vmatpush.bf16.msra.mxu0 %v4423_v10 }
 0x360   :  { %1468 = vmatpush.bf16.msrb.mxu1 %v4285_v21  ;;  %1481 = vmatpush.bf16.msrb.mxu2 %v4397_v1 }
 0x363   :  { %1402 = vmatpush.bf16.msra.mxu0 %v4435_v15 }
 0x364   :  { %1469 = vmatpush.bf16.msrb.mxu1 %v4297_v28  ;;  %1482 = vmatpush.bf16.msrb.mxu2 %v4418_v9 }
 0x367   :  { %1403 = vmatpush.bf16.msra.mxu0 %v4449_v18 }
 0x368   :  { %1470 = vmatpush.bf16.msrb.mxu1 %v4320_v36  ;;  %1483 = vmatpush.bf16.msrb.mxu2 %v4464_v23 }
 0x36b   :  { %1404 = vmatpush.bf16.msra.mxu0 %v4478_v29 }
 0x36c   :  { %1471 = vmatpush.bf16.msrb.mxu1 %v4341_v43  ;;  %1484 = vmatpush.bf16.msrb.mxu2 %v4480_v30 }
 0x36f   :  { %1405 = vmatpush.bf16.msra.mxu0 %v4491_v33 }
 0x370   :  { %1472 = vmatpush.bf16.msrb.mxu1 %v4364_v52  ;;  %1485 = vmatpush.bf16.msrb.mxu2 %v4508_v38 }
 0x3cf   :  { %v1195_v13 = vpop.f32.mrf.mxu0  ;;  %v1208_v21 = vpop.f32.mrf.mxu1 }
 0x3d0   :  { %v1225_v28 = vadd.f32 %v1195_v13, %v601_v12  ;;  %v1245_v36 = vadd.f32 %v1208_v21, %v602_v56  ;;  %v3467_v13 = vld [vmem:[#allocation9 + $0x90] sm:$0xf] }
 0x3d2   :  { %v3385_v37 = vmul.f32 -1.442695, %v1225_v28  ;;  %v3386_v42 = vmul.f32 -1.442695, %v1245_v36  ;;  %v5496_v28 = vld [vmem:[#allocation21_spill] sm:$0xff] }
 0x3d4   :  { %3872 = vpow2.f32 %v3385_v37 }
 0x3d5   :  { %3874 = vpow2.f32 %v3386_v42  ;;  %v3761_v42 = vld [vmem:[#allocation9 + $0x80] sm:$0xf0] }
 0x3d6   :  { %v1221_v43 = vpop.f32.mrf.mxu2 }
 0x3d7   :  { %v1197_v1 = vpop.f32.mrf.mxu0  ;;  %v1210_v9 = vpop.f32.mrf.mxu1  ;;  %v1265_v35 = vadd.f32 %v4683_v5, %v1221_v43 }
 0x3da   :  { %v3873_v52 = vpop.eup %3872 }
 0x3db   :  { %v3875_v23 = vpop.eup %3874  ;;  %v1229_v30 = vadd.f32 1.0, %v3873_v52  ;;  %v3443_v52 = vld [vmem:[#allocation9 + $0x60] sm:$0xf] }
 0x3dc   :  { %v1249_v38 = vadd.f32 1.0, %v3875_v23  ;;  %v3758_v23 = vld [vmem:[#allocation9 + $0x68] sm:$0xf0] }
 0x3dd   :  { %3876 = vrcp.f32 %v1229_v30  ;;  %v1241_v55 = vand.u32 2147483648, %v1229_v30  ;;  %v1239_v26 = vand.u32 2147483647, %v1229_v30  ;;  %vm1235_vm2 = vweird.f32 %v1229_v30 }
 0x3de   :  { %3878 = vrcp.f32 %v1249_v38  ;;  %v1223_v50 = vpop.f32.mrf.mxu2  ;;  %v1261_v54 = vand.u32 2147483648, %v1249_v38  ;;  %vm1255_vm6 = vweird.f32 %v1249_v38  ;;  %v1259_v41 = vand.u32 2147483647, %v1249_v38 }
 0x3df   :  { %v1242_v11 = vor.u32 1.1754944e-38, %v1241_v55  ;;  %vm1240_vm4 = vcmp.eq.f32.partialorder %v1239_v26, 8.507059e+37  ;;  %v3752_v55 = vld [vmem:[#allocation9 + $0x38] sm:$0xf0] }
 0x3e0   :  { %v1262_v59 = vor.u32 1.1754944e-38, %v1261_v54  ;;  %vm1260_vm8 = vcmp.eq.f32.partialorder %v1259_v41, 8.507059e+37 }
 0x3e3   :  { %v3877_v58 = vpop.eup %3876 }
 0x3e4   :  { %v3879_v16 = vpop.eup %3878  ;;  %v1231_v20 = vmul.f32 %v3877_v58, %v1229_v30  ;;  %vm1236_vm1 = vweird.f32 %v3877_v58 }
 0x3e5   :  { %v1251_v51 = vmul.f32 %v3879_v16, %v1249_v38  ;;  %vm1237_vm3 = vmor %vm1235_vm2, %vm1236_vm1  ;;  %vm1256_vm5 = vweird.f32 %v3879_v16  ;;  %v3444_v38 = vor.u32 %v3758_v23, %v3443_v52  ;;  %v3768_v23 = vld [vmem:[#allocation9 + $0xb8] sm:$0xf0] }
 0x3e6   :  { %v1232_v44 = vsub.f32 1.0, %v1231_v20  ;;  %vm1257_vm7 = vmor %vm1255_vm6, %vm1256_vm5  ;;  %v3431_v20 = vld [vmem:[#allocation9 + $0x48] sm:$0xf] }
 0x3e7   :  { %v1252_v25 = vsub.f32 1.0, %v1251_v51  ;;  %v3755_v51 = vld [vmem:[#allocation9 + $0x50] sm:$0xf0] }
 0x3e8   :  { %v1233_v7 = vmul.f32 %v3877_v58, %v1232_v44  ;;  %v3432_v44 = vor.u32 %v3755_v51, %v3431_v20 }
 0x3e9   :  { %v1253_v22 = vmul.f32 %v3879_v16, %v1252_v25  ;;  %v3419_v25 = vld [vmem:[#allocation9 + $0x30] sm:$0xf] }
 0x3ea   :  { %v1234_v19 = vadd.f32 %v3877_v58, %v1233_v7  ;;  %v3420_v26 = vor.u32 %v3752_v55, %v3419_v25  ;;  %v3763_v25 = vld [vmem:[#allocation9 + $0x94] sm:$0xf]  ;;  %v3469_v55 = vld [vmem:[#allocation9 + $0x9c] sm:$0xf0] }
 0x3eb   :  { %v1254_v48 = vadd.f32 %v3879_v16, %v1253_v22  ;;  %v3407_v22 = vld [vmem:[#allocation9 + $0x18] sm:$0xf] }
 0x3ec   :  { %v1238_v27 = vsel %vm1237_vm3, %v3877_v58, %v1234_v19  ;;  %v3749_v19 = vld [vmem:[#allocation9 + $0x20] sm:$0xf0] }
 0x3ed   :  { %v1243_v8 = vsel %vm1240_vm4, %v1242_v11, %v1238_v27  ;;  %v1258_v0 = vsel %vm1257_vm7, %v3879_v16, %v1254_v48  ;;  %v3408_v48 = vor.u32 %v3749_v19, %v3407_v22  ;;  %v3472_v22 = vor.u32 %v3763_v25, %v3469_v55 }
 0x3ee   :  { %v1266_v24 = vmul.f32 %v1265_v35, %v1243_v8  ;;  %v1263_v31 = vsel %vm1260_vm8, %v1262_v59, %v1258_v0 }
 0x3ef   :  { %v1269_v47 = vsub.f32 1.0, %v1263_v31  ;;  %v1271_v6 = vmul.f32 %v1263_v31, %v4792_v2 }
 0x3f0   :  { %v1267_v57 = vadd.f32 %v1266_v24, %v603_v14 }
 0x3f2   :  { %3880 = vtanh.f32 %v1267_v57  ;;  %v3396_v57 = vor.u32 %v3746_v63, %v3395_v32  ;;  %v3463_v32 = vld [vmem:[#allocation9 + $0x80] sm:$0xf]  ;;  %v3762_v63 = vld [vmem:[#allocation9 + $0x88] sm:$0xf0] }
 0x3f8   :  { %v3881_v17 = vpop.eup %3880 }
 0x3f9   :  { %v1270_v46 = vmul.f32 %v3881_v17, %v1269_v47 }
 0x3fb   :  { %v4828_v39 = vadd.f32 %v1271_v6, %v1270_v46 }
 0x3fd   :  { %v1278_v62 = vpack.c.bf16 %v4828_v39, %v4828_v39 }
 0x3ff   :  { %1287 = vmatmul.bf16.vlgmr.msrb.gmra.mxu3 %v1278_v62  ;;  %1300 = vmatmul.bf16.vlgmr.msrb.gmra.mxu0 %v1278_v62 }
 0x400   :  { %1313 = vmatmul.bf16.vlgmr.msra.gmra.mxu1 %v1278_v62  ;;  %1491 = vmatpush.bf16.msrb.mxu3 %v4366_v53  ;;  %v3479_v53 = vld [vmem:[#allocation9 + $0xa8] sm:$0xf] }
 0x404   :  { %1492 = vmatpush.bf16.msrb.mxu3 %v4382_v60  ;;  %v3767_v60 = vld [vmem:[#allocation9 + $0xb0] sm:$0xf0] }
 0x405   :  { %v3480_v21 = vor.u32 %v3767_v60, %v3479_v53 }
 0x407   :  { %1734 = vmatpush.bf16.msrb.mxu0 %v3480_v21 }
 0x408   :  { %1493 = vmatpush.bf16.msrb.mxu3 %v4403_v4 }
 0x40c   :  { %1494 = vmatpush.bf16.msrb.mxu3 %v4423_v10  ;;  %v3764_v10 = vld [vmem:[#allocation9 + $0x98] sm:$0xf0] }
 0x410   :  { %1495 = vmatpush.bf16.msrb.mxu3 %v4435_v15 }
 0x414   :  { %1496 = vmatpush.bf16.msrb.mxu3 %v4449_v18  ;;  %v3468_v18 = vor.u32 %v3764_v10, %v3467_v13 }
 0x416   :  { %1735 = vmatpush.bf16.msrb.mxu0 %v3468_v18 }
 0x418   :  { %1497 = vmatpush.bf16.msrb.mxu3 %v4478_v29 }
 0x41c   :  { %1498 = vmatpush.bf16.msrb.mxu3 %v4491_v33  ;;  %v3455_v33 = vld [vmem:[#allocation9 + $0x78] sm:$0xf] }
 0x41d   :  { %v3456_v9 = vor.u32 %v3761_v42, %v3455_v33  ;;  %v5501_v33 = vld [vmem:[#allocation23_spill] sm:$0xff] }
 0x41f   :  { %1736 = vmatpush.bf16.msrb.mxu0 %v3456_v9 }
 0x423   :  { %1737 = vmatpush.bf16.msrb.mxu0 %v3444_v38 }
 0x427   :  { %1738 = vmatpush.bf16.msrb.mxu0 %v3432_v44 }
 0x42b   :  { %1739 = vmatpush.bf16.msrb.mxu0 %v3420_v26  ;;  %v3765_v26 = vld [vmem:[#allocation9 + $0xa0] sm:$0xf0] }
 0x42f   :  { %1740 = vmatpush.bf16.msrb.mxu0 %v3408_v48 }
 0x433   :  { %1741 = vmatpush.bf16.msrb.mxu0 %v3396_v57 }
 0x47c   :  { %v1301_v40 = vpop.f32.mrf.mxu0 }
 0x47d   :  { %v1338_v56 = vadd.f32 %v1301_v40, %v5495_v34  ;;  %v1314_v3 = vpop.f32.mrf.mxu1  ;;  %v5497_v34 = vld [vmem:[#allocation29_spill] sm:$0xff] }
 0x47e   :  { %v1358_v31 = vadd.f32 %v4683_v5, %v1314_v3 }
 0x47f   :  { %v3388_v12 = vmul.f32 -1.442695, %v1338_v56 }
 0x481   :  { %3882 = vpow2.f32 %v3388_v12 }
 0x482   :  { %v1288_v4 = vpop.f32.mrf.mxu3 }
 0x483   :  { %v1318_v15 = vadd.f32 %v1288_v4, %v5496_v28  ;;  %v4851_v28 = vpack.c.bf16 %v4723_v49, %v4690_v45  ;;  %v5500_v49 = vld [vmem:[#allocation24_spill] sm:$0xff] }
 0x484   :  { %v1303_v36 = vpop.f32.mrf.mxu0  ;;  %v630_v42 = vadd.f32 %v5501_v33, %v5500_v49  ;;  %v3779_v49 = vld [vmem:[#allocation10 + $0x50] sm:$0xf0] }
 0x485   :  { %v3387_v29 = vmul.f32 -1.442695, %v1318_v15  ;;  %v1316_v37 = vpop.f32.mrf.mxu1  ;;  %v4856_v15 = vpack.c.bf16 %v4792_v2, %v4759_v61  ;;  %v3487_v61 = vld [vmem:[#allocation9 + $0xb0] sm:$0xf] }
 0x486   :  { %v5499_v37 = vld [vmem:[#allocation18_spill] sm:$0xff] }
 0x487   :  { %v3883_v43 = vpop.eup %3882  ;;  %3884 = vpow2.f32 %v3387_v29  ;;  %v5498_v29 = vld [vmem:[#allocation16_spill] sm:$0xff] }
 0x488   :  { %v1342_v1 = vadd.f32 1.0, %v3883_v43  ;;  %v629_v45 = vadd.f32 %v5499_v37, %v5498_v29  ;;  %v3766_v43 = vld [vmem:[#allocation9 + $0xac] sm:$0xf]  ;;  %v3756_v29 = vld [vmem:[#allocation9 + $0x58] sm:$0xf0] }
 0x489   :  { %v3527_v37 = vld [vmem:[#allocation10 + $0x48] sm:$0xf] }
 0x48a   :  { %v1290_v30 = vpop.f32.mrf.mxu3  ;;  %3886 = vrcp.f32 %v1342_v1  ;;  %v1354_v6 = vand.u32 2147483648, %v1342_v1  ;;  %vm1348_vm14 = vweird.f32 %v1342_v1  ;;  %v1352_v40 = vand.u32 2147483647, %v1342_v1 }
 0x48b   :  { %v3575_v30 = vld [vmem:[#allocation10 + $0xa8] sm:$0xf]  ;;  %v3528_v33 = vor.u32 %v3779_v49, %v3527_v37 }
 0x48c   :  { %v1355_v53 = vor.u32 1.1754944e-38, %v1354_v6  ;;  %vm1353_vm0 = vcmp.eq.f32.partialorder %v1352_v40, 8.507059e+37 }
 0x48d   :  { %v3885_v50 = vpop.eup %3884 }
 0x48e   :  { %v1322_v58 = vadd.f32 1.0, %v3885_v50 }
 0x490   :  { %3888 = vrcp.f32 %v1322_v58  ;;  %v3887_v16 = vpop.eup %3886  ;;  %v1334_v14 = vand.u32 2147483648, %v1322_v58  ;;  %v1332_v24 = vand.u32 2147483647, %v1322_v58  ;;  %vm1328_vm10 = vweird.f32 %v1322_v58 }
 0x491   :  { %v1344_v7 = vmul.f32 %v3887_v16, %v1342_v1  ;;  %vm1349_vm13 = vweird.f32 %v3887_v16  ;;  %v3481_v1 = vld [vmem:[#allocation9 + $0xb4] sm:$0xf0] }
 0x492   :  { %v1335_v59 = vor.u32 1.1754944e-38, %v1334_v14  ;;  %vm1333_vm12 = vcmp.eq.f32.partialorder %v1332_v24, 8.507059e+37  ;;  %vm1350_vm15 = vmor %vm1348_vm14, %vm1349_vm13  ;;  %v3484_v52 = vor.u32 %v3766_v43, %v3481_v1  ;;  %v3551_v24 = vld [vmem:[#allocation10 + $0x78] sm:$0xf]  ;;  %v3421_v43 = vld [vmem:[#allocation9 + $0x3c] sm:$0xf0] }
 0x493   :  { %v1345_v35 = vsub.f32 1.0, %v1344_v7  ;;  %v3475_v7 = vld [vmem:[#allocation9 + $0x98] sm:$0xf] }
 0x494   :  { %1763 = vmatpush.bf16.msra.mxu1 %v3484_v52  ;;  %v3476_v19 = vor.u32 %v3765_v26, %v3475_v7  ;;  %v3427_v1 = vld [vmem:[#allocation9 + $0x38] sm:$0xf]  ;;  %v3515_v52 = vld [vmem:[#allocation10 + $0x30] sm:$0xf]  ;;  %v3773_v26 = vld [vmem:[#allocation10 + $0x20] sm:$0xf0] }
 0x495   :  { %v1346_v41 = vmul.f32 %v3887_v16, %v1345_v35  ;;  %v3760_v35 = vld [vmem:[#allocation9 + $0x7c] sm:$0xf]  ;;  %v3503_v7 = vld [vmem:[#allocation10 + $0x18] sm:$0xf] }
 0x496   :  { %v3889_v11 = vpop.eup %3888 }
 0x497   :  { %v1324_v27 = vmul.f32 %v3889_v11, %v1322_v58  ;;  %vm1329_vm9 = vweird.f32 %v3889_v11  ;;  %v1347_v17 = vadd.f32 %v3887_v16, %v1346_v41  ;;  %v3488_v58 = vor.u32 %v3768_v23, %v3487_v61  ;;  %v3785_v41 = vld [vmem:[#allocation10 + $0x80] sm:$0xf0]  ;;  %v3776_v23 = vld [vmem:[#allocation10 + $0x38] sm:$0xf0] }
 0x498   :  { %vm1330_vm11 = vmor %vm1328_vm10, %vm1329_vm9  ;;  %1764 = vmatpush.bf16.msra.mxu1 %v3472_v22 }
 0x499   :  { %v1325_v8 = vsub.f32 1.0, %v1324_v27  ;;  %v1351_v12 = vsel %vm1350_vm15, %v3887_v16, %v1347_v17  ;;  %v3788_v27 = vld [vmem:[#allocation10 + $0x98] sm:$0xf0]  ;;  %v3445_v17 = vld [vmem:[#allocation9 + $0x6c] sm:$0xf0] }
 0x49a   :  { %v1356_v60 = vsel %vm1353_vm0, %v1355_v53, %v1351_v12  ;;  %v3539_v53 = vld [vmem:[#allocation10 + $0x60] sm:$0xf] }
 0x49b   :  { %v1326_v54 = vmul.f32 %v3889_v11, %v1325_v8  ;;  %v1362_v13 = vsub.f32 1.0, %v1356_v60  ;;  %v1364_v4 = vmul.f32 %v1356_v60, %v4828_v39  ;;  %v3457_v8 = vld [vmem:[#allocation9 + $0x84] sm:$0xf0]  ;;  %v3782_v60 = vld [vmem:[#allocation10 + $0x68] sm:$0xf0] }
 0x49c   :  { %v3460_v14 = vor.u32 %v3760_v35, %v3457_v8  ;;  %v3397_v35 = vld [vmem:[#allocation9 + $0xc] sm:$0xf0] }
 0x49d   :  { %v1327_v0 = vadd.f32 %v3889_v11, %v1326_v54  ;;  %v3464_v54 = vor.u32 %v3762_v63, %v3463_v32  ;;  %v3403_v32 = vld [vmem:[#allocation9 + $0x8] sm:$0xf]  ;;  %v3747_v63 = vld [vmem:[#allocation9 + $0x10] sm:$0xf0] }
 0x49e   :  { %1765 = vmatpush.bf16.msra.mxu1 %v3460_v14 }
 0x49f   :  { %v1331_v47 = vsel %vm1330_vm11, %v3889_v11, %v1327_v0  ;;  %v3563_v11 = vld [vmem:[#allocation10 + $0x90] sm:$0xf] }
 0x4a0   :  { %v1336_v46 = vsel %vm1333_vm12, %v1335_v59, %v1331_v47  ;;  %v3564_v48 = vor.u32 %v3788_v27, %v3563_v11  ;;  %v3552_v59 = vor.u32 %v3785_v41, %v3551_v24  ;;  %v3757_v47 = vld [vmem:[#allocation9 + $0x64] sm:$0xf] }
 0x4a1   :  { %v1359_v62 = vmul.f32 %v1358_v31, %v1336_v46  ;;  %v3451_v46 = vld [vmem:[#allocation9 + $0x68] sm:$0xf]  ;;  %v3448_v40 = vor.u32 %v3757_v47, %v3445_v17  ;;  %v3745_v27 = vld [vmem:[#allocation9 + $0x4] sm:$0xf]  ;;  %v4888_v47 = vld [vmem:[%s5466_s5] ss:$0 sm:$0xff] }
 0x4a2   :  { %v3400_v41 = vor.u32 %v3745_v27, %v3397_v35  ;;  %v3809_v27 = vld [vmem:[#allocation12 + $0x80] sm:$0xf0]  ;;  %v5505_v35 = vld [vmem:[#allocation26_spill] sm:$0xff] }
 0x4a3   :  { %v1360_v56 = vadd.f32 %v1359_v62, %v5497_v34  ;;  %v3759_v34 = vld [vmem:[#allocation9 + $0x70] sm:$0xf0]  ;;  %1766 = vmatpush.bf16.msra.mxu1 %v3448_v40 }
 0x4a4   :  { %v3452_v12 = vor.u32 %v3759_v34, %v3451_v46  ;;  %v5502_v34 = vld [vmem:[#allocation22_spill] sm:$0xff] }
 0x4a5   :  { %3890 = vtanh.f32 %v1360_v56 }
 0x4ab   :  { %v3891_v5 = vpop.eup %3890 }
 0x4ac   :  { %v1363_v3 = vmul.f32 %v3891_v5, %v1362_v13  ;;  %v3754_v13 = vld [vmem:[#allocation9 + $0x4c] sm:$0xf]  ;;  %v3540_v5 = vor.u32 %v3782_v60, %v3539_v53 }
 0x4ae   :  { %v4845_v21 = vadd.f32 %v1364_v4, %v1363_v3  ;;  %v3433_v3 = vld [vmem:[#allocation9 + $0x54] sm:$0xf0]  ;;  %v3439_v4 = vld [vmem:[#allocation9 + $0x50] sm:$0xf] }
 0x4b0   :  { %v1371_v10 = vpack.c.bf16 %v4845_v21, %v4845_v21  ;;  %v4861_v36 = vpack.c.bf16 %v4845_v21, %v4828_v39  ;;  %v3791_v39 = vld [vmem:[#allocation10 + $0xb0] sm:$0xf0] }
 0x4b1   :  { %v3576_v16 = vor.u32 %v3791_v39, %v3575_v30 }
 0x4b2   :  { %1380 = vmatmul.bf16.vlgmr.msra.gmra.mxu2 %v1371_v10  ;;  %1393 = vmatmul.bf16.vlgmr.msra.gmra.mxu3 %v1371_v10 }
 0x4b3   :  { %1406 = vmatmul.bf16.vlgmr.msra.gmra.mxu0 %v1371_v10  ;;  %1792 = vmatpush.bf16.msra.mxu2 %v3488_v58  ;;  %v3436_v10 = vor.u32 %v3754_v13, %v3433_v3  ;;  %v3409_v58 = vld [vmem:[#allocation9 + $0x24] sm:$0xf0] }
 0x4b4   :  { %2005 = vmatpush.bf16.msra.mxu3 %v3576_v16  ;;  %v3415_v16 = vld [vmem:[#allocation9 + $0x20] sm:$0xf] }
 0x4b5   :  { %1767 = vmatpush.bf16.msra.mxu1 %v3436_v10 }
 0x4b7   :  { %1793 = vmatpush.bf16.msra.mxu2 %v3476_v19 }
 0x4b8   :  { %2006 = vmatpush.bf16.msra.mxu3 %v3564_v48 }
 0x4bb   :  { %1794 = vmatpush.bf16.msra.mxu2 %v3464_v54  ;;  %v3504_v54 = vor.u32 %v3773_v26, %v3503_v7  ;;  %v3571_v7 = vld [vmem:[#allocation10 + $0x98] sm:$0xf]  ;;  %v3789_v26 = vld [vmem:[#allocation10 + $0xa0] sm:$0xf0] }
 0x4bc   :  { %2007 = vmatpush.bf16.msra.mxu3 %v3552_v59 }
 0x4bf   :  { %1795 = vmatpush.bf16.msra.mxu2 %v3452_v12  ;;  %v5503_v12 = vld [vmem:[#allocation28_spill] sm:$0xff] }
 0x4c0   :  { %2008 = vmatpush.bf16.msra.mxu3 %v3540_v5  ;;  %v631_v53 = vadd.f32 %v5503_v12, %v5502_v34  ;;  %v3547_v34 = vld [vmem:[#allocation10 + $0x68] sm:$0xf] }
 0x4c3   :  { %1742 = vmatmul.bf16.vlgmr.msrb.gmra.mxu0 %v4851_v28 }
 0x4c4   :  { %2009 = vmatpush.bf16.msra.mxu3 %v3528_v33 }
 0x4d3   :  { %1747 = vmatmul.bf16.gmra.mxu0 %v4856_v15 }
 0x4e3   :  { %1752 = vmatmul.bf16.gmra.mxu0 %v4861_v36 }
 0x530   :  { %v4864_v18 = vpop.f32.mrf.mxu0 }
 0x531   :  { %v1451_v17 = vadd.f32 %v4888_v47, %v4864_v18 }
 0x535   :  { %v1381_v2 = vpop.f32.mrf.mxu2  ;;  %v1394_v9 = vpop.f32.mrf.mxu3 }
 0x536   :  { %v1411_v38 = vadd.f32 %v1381_v2, %v629_v45  ;;  %v1431_v50 = vadd.f32 %v1394_v9, %v630_v42  ;;  %v3440_v45 = vor.u32 %v3756_v29, %v3439_v4  ;;  %v3751_v42 = vld [vmem:[#allocation9 + $0x34] sm:$0xf]  ;;  %v3753_v9 = vld [vmem:[#allocation9 + $0x40] sm:$0xf0] }
 0x537   :  { %v3424_v2 = vor.u32 %v3751_v42, %v3421_v43  ;;  %v3577_v42 = vld [vmem:[#allocation10 + $0xb4] sm:$0xf0] }
 0x538   :  { %v3389_v20 = vmul.f32 -1.442695, %v1411_v38  ;;  %v3390_v51 = vmul.f32 -1.442695, %v1431_v50  ;;  %v1409_v44 = vpop.f32.mrf.mxu0  ;;  %1796 = vmatpush.bf16.msra.mxu2 %v3440_v45  ;;  %v3428_v38 = vor.u32 %v3753_v9, %v3427_v1  ;;  %v3748_v50 = vld [vmem:[#allocation9 + $0x1c] sm:$0xf] }
 0x539   :  { %v3750_v44 = vld [vmem:[#allocation9 + $0x28] sm:$0xf0]  ;;  %1768 = vmatpush.bf16.msra.mxu1 %v3424_v2  ;;  %v3412_v55 = vor.u32 %v3748_v50, %v3409_v58  ;;  %v3671_v1 = vld [vmem:[#allocation12 + $0xa8] sm:$0xf]  ;;  %v3583_v2 = vld [vmem:[#allocation10 + $0xb0] sm:$0xf] }
 0x53a   :  { %3892 = vpow2.f32 %v3389_v20  ;;  %v3416_v11 = vor.u32 %v3750_v44, %v3415_v16  ;;  %v3792_v9 = vld [vmem:[#allocation10 + $0xb8] sm:$0xf0]  ;;  %v3659_v50 = vld [vmem:[#allocation12 + $0x90] sm:$0xf]  ;;  %v3565_v44 = vld [vmem:[#allocation10 + $0x9c] sm:$0xf0] }
 0x53b   :  { %3894 = vpow2.f32 %v3390_v51  ;;  %v3516_v51 = vor.u32 %v3776_v23, %v3515_v52  ;;  %v3812_v58 = vld [vmem:[#allocation12 + $0x98] sm:$0xf0] }
 0x53c   :  { %1797 = vmatpush.bf16.msra.mxu2 %v3428_v38 }
 0x53d   :  { %v1383_v57 = vpop.f32.mrf.mxu2  ;;  %v1396_v0 = vpop.f32.mrf.mxu3  ;;  %2010 = vmatpush.bf16.msra.mxu3 %v3516_v51  ;;  %1769 = vmatpush.bf16.msra.mxu1 %v3412_v55  ;;  %v3787_v51 = vld [vmem:[#allocation10 + $0x94] sm:$0xf] }
 0x53e   :  { %v3491_v57 = vld [vmem:[#allocation10] sm:$0xf]  ;;  %v3770_v0 = vld [vmem:[#allocation10 + $0x8] sm:$0xf0]  ;;  %v3568_v55 = vor.u32 %v3787_v51, %v3565_v44  ;;  %v3523_v51 = vld [vmem:[#allocation10 + $0x38] sm:$0xf] }
 0x53f   :  { %v3492_v40 = vor.u32 %v3770_v0, %v3491_v57  ;;  %v3786_v57 = vld [vmem:[#allocation10 + $0x88] sm:$0xf0] }
 0x540   :  { %v3893_v31 = vpop.eup %3892  ;;  %1798 = vmatpush.bf16.msra.mxu2 %v3416_v11  ;;  %v4918_v16 = vpop.f32.mrf.mxu0  ;;  %v3647_v11 = vld [vmem:[#allocation12 + $0x78] sm:$0xf] }
 0x541   :  { %v3895_v6 = vpop.eup %3894  ;;  %v4870_v62 = vadd.f32 1.0, %v3893_v31  ;;  %v3404_v31 = vor.u32 %v3747_v63, %v3403_v32  ;;  %2011 = vmatpush.bf16.msra.mxu3 %v3504_v54  ;;  %1770 = vmatpush.bf16.msra.mxu1 %v3400_v41  ;;  %v3784_v32 = vld [vmem:[#allocation10 + $0x7c] sm:$0xf]  ;;  %v3553_v63 = vld [vmem:[#allocation10 + $0x84] sm:$0xf0]  ;;  %v4926_v54 = vor.u32 %v3809_v27, %v3647_v11 }
 0x542   :  { %v4872_v56 = vadd.f32 1.0, %v3895_v6  ;;  %v3556_v41 = vor.u32 %v3784_v32, %v3553_v63  ;;  %v3599_v11 = vld [vmem:[#allocation12 + $0x18] sm:$0xf]  ;;  %v3797_v27 = vld [vmem:[#allocation12 + $0x20] sm:$0xf0] }
 0x543   :  { %3896 = vrcp.f32 %v4870_v62  ;;  %v1427_v22 = vand.u32 2147483648, %v4870_v62  ;;  %v1425_v8 = vand.u32 2147483647, %v4870_v62  ;;  %vm1421_vm2 = vweird.f32 %v4870_v62 }
 0x544   :  { %3898 = vrcp.f32 %v4872_v56  ;;  %v1447_v13 = vand.u32 2147483648, %v4872_v56  ;;  %vm1441_vm6 = vweird.f32 %v4872_v56  ;;  %v1445_v18 = vand.u32 2147483647, %v4872_v56  ;;  %1799 = vmatpush.bf16.msra.mxu2 %v3404_v31  ;;  %v3635_v31 = vld [vmem:[#allocation12 + $0x60] sm:$0xf] }
 0x545   :  { %v1428_v59 = vor.u32 1.1754944e-38, %v1427_v22  ;;  %vm1426_vm4 = vcmp.eq.f32.partialorder %v1425_v8, 8.507059e+37  ;;  %2012 = vmatpush.bf16.msra.mxu3 %v3492_v40  ;;  %v3572_v22 = vor.u32 %v3789_v26, %v3571_v7  ;;  %v3777_v26 = vld [vmem:[#allocation10 + $0x40] sm:$0xf0]  ;;  %v4954_v63 = vor.u32 %v3797_v27, %v3599_v11  ;;  %v3595_v11 = vld [vmem:[#allocation12 + $0x8] sm:$0xf] }
 0x546   :  { %v1448_v4 = vor.u32 1.1754944e-38, %v1447_v13  ;;  %vm1446_vm8 = vcmp.eq.f32.partialorder %v1445_v18, 8.507059e+37 }
 0x548   :  { %v4933_v13 = vpop.f32.mrf.mxu0 }
 0x549   :  { %v3897_v61 = vpop.eup %3896 }
 0x54a   :  { %v4876_v30 = vpop.eup %3898  ;;  %v1417_v39 = vmul.f32 %v3897_v61, %v4870_v62  ;;  %vm1422_vm1 = vweird.f32 %v3897_v61 }
 0x54b   :  { %v1437_v20 = vmul.f32 %v4876_v30, %v4872_v56  ;;  %vm1423_vm3 = vmor %vm1421_vm2, %vm1422_vm1  ;;  %vm1442_vm5 = vweird.f32 %v4876_v30 }
 0x54c   :  { %v1418_v25 = vsub.f32 1.0, %v1417_v39  ;;  %vm1443_vm7 = vmor %vm1441_vm6, %vm1442_vm5  ;;  %v5504_v39 = vld [vmem:[#allocation17_spill] sm:$0xff] }
 0x54d   :  { %v1438_v19 = vsub.f32 1.0, %v1437_v20 }
 0x54e   :  { %v1419_v48 = vmul.f32 %v3897_v61, %v1418_v25  ;;  %v4920_v25 = vor.u32 %v3812_v58, %v3659_v50  ;;  %v3814_v50 = vld [vmem:[#allocation12 + $0xac] sm:$0xf]  ;;  %v3673_v58 = vld [vmem:[#allocation12 + $0xb4] sm:$0xf0] }
 0x54f   :  { %v1439_v14 = vmul.f32 %v4876_v30, %v1438_v19  ;;  %v4946_v7 = vor.u32 %v3814_v50, %v3673_v58 }
 0x550   :  { %v1420_v24 = vadd.f32 %v3897_v61, %v1419_v48 }
 0x551   :  { %v1440_v62 = vadd.f32 %v4876_v30, %v1439_v14  ;;  %v3559_v14 = vld [vmem:[#allocation10 + $0x80] sm:$0xf] }
 0x552   :  { %v1424_v46 = vsel %vm1423_vm3, %v3897_v61, %v1420_v24  ;;  %v3815_v61 = vld [vmem:[#allocation12 + $0xb0] sm:$0xf0] }
 0x553   :  { %v1429_v6 = vsel %vm1426_vm4, %v1428_v59, %v1424_v46  ;;  %v1444_v3 = vsel %vm1443_vm7, %v4876_v30, %v1440_v62  ;;  %v4914_v52 = vor.u32 %v3815_v61, %v3671_v1  ;;  %v3584_v30 = vor.u32 %v3792_v9, %v3583_v2  ;;  %v3541_v62 = vld [vmem:[#allocation10 + $0x6c] sm:$0xf0] }
 0x554   :  { %v1452_v60 = vmul.f32 %v1451_v17, %v1429_v6  ;;  %v1449_v10 = vsel %vm1446_vm8, %v1448_v4, %v1444_v3  ;;  %v3560_v59 = vor.u32 %v3786_v57, %v3559_v14  ;;  %v3806_v17 = vld [vmem:[#allocation12 + $0x68] sm:$0xf0]  ;;  %v3781_v6 = vld [vmem:[#allocation10 + $0x64] sm:$0xf]  ;;  %v3535_v61 = vld [vmem:[#allocation10 + $0x50] sm:$0xf] }
 0x555   :  { %v1455_v29 = vsub.f32 1.0, %v1449_v10  ;;  %v1457_v49 = vmul.f32 %v1449_v10, %v4845_v21  ;;  %v3790_v21 = vld [vmem:[#allocation10 + $0xac] sm:$0xf]  ;;  %v4929_v40 = vor.u32 %v3806_v17, %v3635_v31  ;;  %v3529_v10 = vld [vmem:[#allocation10 + $0x54] sm:$0xf0] }
 0x556   :  { %v1453_v5 = vadd.f32 %v1452_v60, %v631_v53  ;;  %v3580_v43 = vor.u32 %v3790_v21, %v3577_v42  ;;  %v3544_v53 = vor.u32 %v3781_v6, %v3541_v62  ;;  %v3783_v60 = vld [vmem:[#allocation10 + $0x70] sm:$0xf0]  ;;  %v3778_v3 = vld [vmem:[#allocation10 + $0x4c] sm:$0xf]  ;;  %v3772_v42 = vld [vmem:[#allocation10 + $0x1c] sm:$0xf] }
 0x557   :  { %v3548_v18 = vor.u32 %v3783_v60, %v3547_v34  ;;  %v3511_v14 = vld [vmem:[#allocation10 + $0x20] sm:$0xf]  ;;  %v3493_v31 = vld [vmem:[#allocation10 + $0xc] sm:$0xf0]  ;;  %v3794_v34 = vld [vmem:[#allocation12 + $0x8] sm:$0xf0] }
 0x558   :  { %3900 = vtanh.f32 %v1453_v5  ;;  %2034 = vmatpush.bf16.msra.mxu0 %v3580_v43  ;;  %v3505_v43 = vld [vmem:[#allocation10 + $0x24] sm:$0xf0]  ;;  %v3661_v60 = vld [vmem:[#allocation12 + $0x9c] sm:$0xf0] }
 0x55c   :  { %2035 = vmatpush.bf16.msra.mxu0 %v3568_v55 }
 0x55e   :  { %v3901_v37 = vpop.eup %3900 }
 0x55f   :  { %v1456_v45 = vmul.f32 %v3901_v37, %v1455_v29  ;;  %v3775_v29 = vld [vmem:[#allocation10 + $0x34] sm:$0xf]  ;;  %v3517_v37 = vld [vmem:[#allocation10 + $0x3c] sm:$0xf0] }
 0x560   :  { %2036 = vmatpush.bf16.msra.mxu0 %v3556_v41  ;;  %v3520_v9 = vor.u32 %v3775_v29, %v3517_v37  ;;  %v3679_v29 = vld [vmem:[#allocation12 + $0xb0] sm:$0xf] }
 0x561   :  { %v4901_v33 = vadd.f32 %v1457_v49, %v1456_v45  ;;  %v3532_v45 = vor.u32 %v3778_v3, %v3529_v10  ;;  %v3623_v49 = vld [vmem:[#allocation12 + $0x48] sm:$0xf]  ;;  %v3771_v10 = vld [vmem:[#allocation10 + $0x10] sm:$0xf0] }
 0x563   :  { %v1464_v56 = vpack.c.bf16 %v4901_v33, %v4901_v33 }
 0x564   :  { %2037 = vmatpush.bf16.msra.mxu0 %v3544_v53  ;;  %v3811_v53 = vld [vmem:[#allocation12 + $0x94] sm:$0xf] }
 0x565   :  { %1473 = vmatmul.bf16.vlgmr.msrb.gmra.mxu1 %v1464_v56  ;;  %1486 = vmatmul.bf16.vlgmr.msrb.gmra.mxu2 %v1464_v56 }
 0x566   :  { %1499 = vmatmul.bf16.vlgmr.msrb.gmra.mxu3 %v1464_v56  ;;  %2379 = vmatpush.bf16.msrb.mxu2 %v4914_v52  ;;  %v3803_v56 = vld [vmem:[#allocation12 + $0x50] sm:$0xf0] }
 0x567   :  { %2063 = vmatpush.bf16.msrb.mxu1 %v3584_v30  ;;  %v4937_v1 = vor.u32 %v3803_v56, %v3623_v49  ;;  %v3611_v30 = vld [vmem:[#allocation12 + $0x30] sm:$0xf]  ;;  %2392 = vmatpush.bf16.msrb.mxu3 %v4946_v7  ;;  %v4969_v49 = vor.u32 %v3811_v53, %v3661_v60  ;;  %v3816_v56 = vld [vmem:[#allocation12 + $0xb8] sm:$0xf0]  ;;  %v5020_v53 = vld [vmem:[%s5469_s8] sm:$0x7] }
 0x568   :  { %2038 = vmatpush.bf16.msra.mxu0 %v3532_v45 }
 0x56a   :  { %2380 = vmatpush.bf16.msrb.mxu2 %v4920_v25 }
 0x56b   :  { %2064 = vmatpush.bf16.msrb.mxu1 %v3572_v22  ;;  %v3508_v22 = vor.u32 %v3772_v42, %v3505_v43  ;;  %v4971_v43 = vor.u32 %v3816_v56, %v3679_v29  ;;  %2393 = vmatpush.bf16.msrb.mxu3 %v4969_v49  ;;  %v5026_v29 = vperm.slane %v5020_v53, 0 }
 0x56c   :  { %2039 = vmatpush.bf16.msra.mxu0 %v3520_v9 }
 0x56e   :  { %2381 = vmatpush.bf16.msrb.mxu2 %v4926_v54 }
 0x56f   :  { %2065 = vmatpush.bf16.msrb.mxu1 %v3560_v59  ;;  %v3769_v59 = vld [vmem:[#allocation10 + $0x4] sm:$0xf] }
 0x570   :  { %2040 = vmatpush.bf16.msra.mxu0 %v3508_v22  ;;  %v3496_v62 = vor.u32 %v3769_v59, %v3493_v31  ;;  %v3649_v22 = vld [vmem:[#allocation12 + $0x84] sm:$0xf0] }
 0x571   :  { %v3643_v31 = vld [vmem:[#allocation12 + $0x68] sm:$0xf] }
 0x572   :  { %2382 = vmatpush.bf16.msrb.mxu2 %v4929_v40 }
 0x573   :  { %2066 = vmatpush.bf16.msrb.mxu1 %v3548_v18 }
 0x574   :  { %2041 = vmatpush.bf16.msra.mxu0 %v3496_v62 }
 0x575   :  { %1771 = vmatmul.bf16.vlgmr.msra.gmra.mxu1 %v4851_v28  ;;  %1800 = vmatmul.bf16.vlgmr.msra.gmra.mxu2 %v4851_v28 }
 0x576   :  { %2013 = vmatmul.bf16.vlgmr.msra.gmra.mxu3 %v4851_v28  ;;  %2383 = vmatpush.bf16.msrb.mxu2 %v4937_v1 }
 0x578   :  { %2484 = vmatpush.bf16.msrb.mxu0 %v4946_v7 }
 0x57c   :  { %2485 = vmatpush.bf16.msrb.mxu0 %v4969_v49 }
 0x585   :  { %1776 = vmatmul.bf16.gmra.mxu1 %v4856_v15  ;;  %1805 = vmatmul.bf16.gmra.mxu2 %v4856_v15 }
 0x586   :  { %2018 = vmatmul.bf16.gmra.mxu3 %v4856_v15 }
 0x595   :  { %1781 = vmatmul.bf16.gmra.mxu1 %v4861_v36  ;;  %1810 = vmatmul.bf16.gmra.mxu2 %v4861_v36 }
 0x596   :  { %2023 = vmatmul.bf16.gmra.mxu3 %v4861_v36 }
 0x5e2   :  { %v1474_v23 = vpop.f32.mrf.mxu1 }
 0x5e3   :  { %v1504_v38 = vadd.f32 %v1474_v23, %v5504_v39  ;;  %v3780_v23 = vld [vmem:[#allocation10 + $0x58] sm:$0xf0] }
 0x5e4   :  { %v3536_v39 = vor.u32 %v3780_v23, %v3535_v61 }
 0x5e5   :  { %v3391_v20 = vmul.f32 -1.442695, %v1504_v38  ;;  %v3800_v38 = vld [vmem:[#allocation12 + $0x38] sm:$0xf0] }
 0x5e6   :  { %2067 = vmatpush.bf16.msrb.mxu1 %v3536_v39  ;;  %v4944_v55 = vor.u32 %v3800_v38, %v3611_v30  ;;  %v3667_v30 = vld [vmem:[#allocation12 + $0x98] sm:$0xf]  ;;  %v3813_v39 = vld [vmem:[#allocation12 + $0xa0] sm:$0xf0] }
 0x5e7   :  { %3902 = vpow2.f32 %v3391_v20  ;;  %v4983_v50 = vor.u32 %v3813_v39, %v3667_v30  ;;  %v3799_v39 = vld [vmem:[#allocation12 + $0x34] sm:$0xf] }
 0x5e8   :  { %v1487_v19 = vpop.f32.mrf.mxu2  ;;  %2384 = vmatpush.bf16.msrb.mxu2 %v4944_v55 }
 0x5e9   :  { %v1524_v48 = vadd.f32 %v1487_v19, %v5505_v35  ;;  %v4924_v8 = vpop.f32.mrf.mxu3  ;;  %v3524_v19 = vor.u32 %v3777_v26, %v3523_v51  ;;  %v4948_v35 = vpop.f32.mrf.mxu0  ;;  %v5508_v51 = vld [vmem:[#allocation27_spill] sm:$0xff] }
 0x5ea   :  { %v1476_v24 = vpop.f32.mrf.mxu1  ;;  %v1544_v45 = vadd.f32 %v4888_v47, %v4924_v8  ;;  %v3808_v26 = vld [vmem:[#allocation12 + $0x7c] sm:$0xf] }
 0x5eb   :  { %v3392_v0 = vmul.f32 -1.442695, %v1524_v48  ;;  %v3774_v24 = vld [vmem:[#allocation10 + $0x28] sm:$0xf0]  ;;  %2068 = vmatpush.bf16.msrb.mxu1 %v3524_v19  ;;  %v3655_v19 = vld [vmem:[#allocation12 + $0x80] sm:$0xf]  ;;  %v4996_v27 = vor.u32 %v3808_v26, %v3649_v22 }
 0x5ec   :  { %v3512_v17 = vor.u32 %v3774_v24, %v3511_v14  ;;  %2385 = vmatpush.bf16.msrb.mxu2 %v4954_v63  ;;  %v3805_v24 = vld [vmem:[#allocation12 + $0x64] sm:$0xf] }
 0x5ed   :  { %v3903_v46 = vpop.eup %3902  ;;  %3904 = vpow2.f32 %v3392_v0  ;;  %2394 = vmatpush.bf16.msrb.mxu3 %v4996_v27  ;;  %2486 = vmatpush.bf16.msrb.mxu0 %v4996_v27 }
 0x5ee   :  { %v4931_v12 = vadd.f32 1.0, %v3903_v46  ;;  %v3587_v46 = vld [vmem:[#allocation12] sm:$0xf] }
 0x5ef   :  { %v4964_v3 = vor.u32 %v3794_v34, %v3587_v46  ;;  %2069 = vmatpush.bf16.msrb.mxu1 %v3512_v17  ;;  %v3807_v17 = vld [vmem:[#allocation12 + $0x70] sm:$0xf0] }
 0x5f0   :  { %3906 = vrcp.f32 %v4931_v12  ;;  %v1489_v5 = vpop.f32.mrf.mxu2  ;;  %v1518_v41 = vand.u32 2147483647, %v4931_v12  ;;  %v1520_v57 = vand.u32 2147483648, %v4931_v12  ;;  %vm1514_vm10 = vweird.f32 %v4931_v12 }
 0x5f1   :  { %v1502_v4 = vpop.f32.mrf.mxu3  ;;  %2386 = vmatpush.bf16.msrb.mxu2 %v4964_v3  ;;  %v4985_v58 = vpop.f32.mrf.mxu0  ;;  %v5014_v62 = vor.u32 %v3807_v17, %v3643_v31  ;;  %v3589_v17 = vld [vmem:[#allocation12 + $0xc] sm:$0xf0] }
 0x5f2   :  { %v3499_v4 = vld [vmem:[#allocation10 + $0x8] sm:$0xf]  ;;  %vm1519_vm12 = vcmp.eq.f32.partialorder %v1518_v41, 8.507059e+37  ;;  %v1521_v37 = vor.u32 1.1754944e-38, %v1520_v57  ;;  %v3637_v41 = vld [vmem:[#allocation12 + $0x6c] sm:$0xf0]  ;;  %v1751_v26 = vadd.f32 %v4985_v58, %v5026_v29 }
 0x5f3   :  { %v3905_v21 = vpop.eup %3904  ;;  %v3796_v58 = vld [vmem:[#allocation12 + $0x1c] sm:$0xf] }
 0x5f4   :  { %v4939_v2 = vadd.f32 1.0, %v3905_v21 }
 0x5f5   :  { %2405 = vmatpush.bf16.msra.mxu2 %v4971_v43 }
 0x5f6   :  { %v3907_v20 = vpop.eup %3906  ;;  %3908 = vrcp.f32 %v4939_v2  ;;  %v1540_v23 = vand.u32 2147483648, %v4939_v2  ;;  %v1538_v38 = vand.u32 2147483647, %v4939_v2  ;;  %vm1534_vm14 = vweird.f32 %v4939_v2 }
 0x5f7   :  { %v1510_v44 = vmul.f32 %v3907_v20, %v4931_v12  ;;  %vm1515_vm9 = vweird.f32 %v3907_v20  ;;  %v3500_v12 = vor.u32 %v3771_v10, %v3499_v4  ;;  %v3631_v4 = vld [vmem:[#allocation12 + $0x50] sm:$0xf]  ;;  %v3804_v10 = vld [vmem:[#allocation12 + $0x58] sm:$0xf0] }
 0x5f8   :  { %vm1516_vm11 = vmor %vm1514_vm10, %vm1515_vm9  ;;  %v1541_v14 = vor.u32 1.1754944e-38, %v1540_v23  ;;  %vm1539_vm0 = vcmp.eq.f32.partialorder %v1538_v38, 8.507059e+37  ;;  %v3802_v23 = vld [vmem:[#allocation12 + $0x4c] sm:$0xf]  ;;  %v3613_v38 = vld [vmem:[#allocation12 + $0x3c] sm:$0xf0] }
 0x5f9   :  { %v1511_v48 = vsub.f32 1.0, %v1510_v44  ;;  %v4950_v32 = vpop.f32.mrf.mxu3  ;;  %2070 = vmatpush.bf16.msrb.mxu1 %v3500_v12  ;;  %2406 = vmatpush.bf16.msra.mxu2 %v4983_v50  ;;  %v3619_v12 = vld [vmem:[#allocation12 + $0x38] sm:$0xf] }
 0x5fa   :  { %5506 = vst [vmem:[#allocation19_spill] sm:$0xff] %v4950_v32  ;;  %v1744_v32 = vadd.f32 %v4918_v16, %v5026_v29 }
 0x5fb   :  { %v1512_v0 = vmul.f32 %v3907_v20, %v1511_v48  ;;  %v3810_v48 = vld [vmem:[#allocation12 + $0x88] sm:$0xf0] }
 0x5fc   :  { %v4958_v6 = vpop.eup %3908  ;;  %v5005_v57 = vor.u32 %v3810_v48, %v3655_v19  ;;  %v3795_v48 = vld [vmem:[#allocation12 + $0x10] sm:$0xf0] }
 0x5fd   :  { %v1530_v18 = vmul.f32 %v4958_v6, %v4939_v2  ;;  %v1513_v5 = vadd.f32 %v3907_v20, %v1512_v0  ;;  %vm1535_vm13 = vweird.f32 %v4958_v6  ;;  %2497 = vmatpush.bf16.msra.mxu1 %v4971_v43  ;;  %v5007_v0 = vor.u32 %v3805_v24, %v3637_v41  ;;  %v3601_v24 = vld [vmem:[#allocation12 + $0x24] sm:$0xf0]  ;;  %v3793_v41 = vld [vmem:[#allocation12 + $0x4] sm:$0xf] }
 0x5fe   :  { %vm4992_vm15 = vmor %vm1534_vm14, %vm1535_vm13  ;;  %2407 = vmatpush.bf16.msra.mxu2 %v5005_v57  ;;  %v5071_v31 = vor.u32 %v3796_v58, %v3601_v24 }
 0x5ff   :  { %v1531_v21 = vsub.f32 1.0, %v1530_v18  ;;  %v1517_v42 = vsel %vm1516_vm11, %v3907_v20, %v1513_v5  ;;  %2395 = vmatpush.bf16.msrb.mxu3 %v5007_v0  ;;  %v1753_v5 = vpop.f32.mrf.mxu0  ;;  %2487 = vmatpush.bf16.msrb.mxu0 %v5007_v0 }
 0x600   :  { %v1522_v61 = vsel %vm1519_vm12, %v1521_v37, %v1517_v42 }
 0x601   :  { %v1532_v9 = vmul.f32 %v4958_v6, %v1531_v21  ;;  %v1545_v47 = vmul.f32 %v1544_v45, %v1522_v61  ;;  %v4977_v8 = vpop.f32.mrf.mxu3  ;;  %2498 = vmatpush.bf16.msra.mxu1 %v4983_v50  ;;  %v1754_v45 = vadd.f32 %v1753_v5, %v5026_v29  ;;  %v5033_v21 = vor.u32 %v3804_v10, %v3631_v4  ;;  %v3801_v61 = vld [vmem:[#allocation12 + $0x40] sm:$0xf0] }
 0x602   :  { %5507 = vst [vmem:[#allocation20_spill] sm:$0xff] %v4977_v8  ;;  %2408 = vmatpush.bf16.msra.mxu2 %v5014_v62  ;;  %v5045_v30 = vor.u32 %v3801_v61, %v3619_v12 }
 0x603   :  { %v1533_v20 = vadd.f32 %v4958_v6, %v1532_v9  ;;  %v1546_v44 = vadd.f32 %v1545_v47, %v5508_v51  ;;  %v3625_v47 = vld [vmem:[#allocation12 + $0x54] sm:$0xf0]  ;;  %v3798_v51 = vld [vmem:[#allocation12 + $0x28] sm:$0xf0] }
 0x605   :  { %v1537_v2 = vsel %vm4992_vm15, %v4958_v6, %v1533_v20  ;;  %3910 = vtanh.f32 %v1546_v44  ;;  %2499 = vmatpush.bf16.msra.mxu1 %v5005_v57  ;;  %v3607_v20 = vld [vmem:[#allocation12 + $0x20] sm:$0xf]  ;;  %v5049_v44 = vor.u32 %v3799_v39, %v3613_v38 }
 0x606   :  { %v1542_v59 = vsel %vm1539_vm0, %v1541_v14, %v1537_v2  ;;  %2409 = vmatpush.bf16.msra.mxu2 %v5033_v21  ;;  %v5055_v22 = vor.u32 %v3798_v51, %v3607_v20  ;;  %v5063_v2 = vor.u32 %v3795_v48, %v3595_v11  ;;  %v5158_v51 = vperm.slane %v5020_v53, 1 }
 0x607   :  { %v1548_v6 = vsub.f32 1.0, %v1542_v59  ;;  %v1550_v18 = vmul.f32 %v1542_v59, %v4901_v33  ;;  %v5512_v59 = vmov 0  }
 0x609   :  { %v5010_v46 = vpop.f32.mrf.mxu3  ;;  %2500 = vmatpush.bf16.msra.mxu1 %v5014_v62 }
 0x60a   :  { %5511 = vst [vmem:[#allocation30_spill] sm:$0xff] %v5010_v46  ;;  %2410 = vmatpush.bf16.msra.mxu2 %v5045_v30 }
 0x60b   :  { %v3911_v34 = vpop.eup %3910 }
 0x60c   :  { %v1549_v60 = vmul.f32 %v3911_v34, %v1548_v6  ;;  %v5076_v6 = vor.u32 %v3793_v41, %v3589_v17 }
 0x60d   :  { %2501 = vmatpush.bf16.msra.mxu1 %v5033_v21 }
 0x60e   :  { %v1551_v37 = vadd.f32 %v1550_v18, %v1549_v60  ;;  %2411 = vmatpush.bf16.msra.mxu2 %v5055_v22 }
 0x610   :  { %v5031_v56 = vpack.c.bf16 %v1551_v37, %v4901_v33  ;;  %v5042_v33 = vor.u32 %v3802_v23, %v3625_v47 }
 0x611   :  { %v2021_v42 = vpop.f32.mrf.mxu3  ;;  %2502 = vmatpush.bf16.msra.mxu1 %v5045_v30 }
 0x612   :  { %v5036_v9 = vadd.f32 %v2021_v42, %v1754_v45  ;;  %1757 = vmatmul.bf16.gmra.mxu0 %v5031_v56  ;;  %1786 = vmatmul.bf16.gmra.mxu1 %v5031_v56  ;;  %v5143_v45 = vpop.f32.mrf.mxu0 }
 0x613   :  { %1815 = vmatmul.bf16.gmra.mxu2 %v5031_v56  ;;  %2028 = vmatmul.bf16.gmra.mxu3 %v5031_v56  ;;  %5513 = vst [vmem:[#allocation25_spill] sm:$0xff] %v5143_v45 }
 0x614   :  { %2396 = vmatpush.bf16.msrb.mxu3 %v5042_v33  ;;  %2488 = vmatpush.bf16.msrb.mxu0 %v5042_v33 }
 0x615   :  { %2503 = vmatpush.bf16.msra.mxu1 %v5055_v22  ;;  %2412 = vmatpush.bf16.msra.mxu2 %v5063_v2 }
 0x618   :  { %2397 = vmatpush.bf16.msrb.mxu3 %v5049_v44  ;;  %2489 = vmatpush.bf16.msrb.mxu0 %v5049_v44 }
 0x619   :  { %v2024_v19 = vpop.f32.mrf.mxu3  ;;  %2504 = vmatpush.bf16.msra.mxu1 %v5063_v2 }
 0x61a   :  { %v5060_v14 = vadd.f32 %v2024_v19, %v1751_v26  ;;  %v5161_v26 = vperm.slane %v5020_v53, 2 }
 0x61c   :  { %2398 = vmatpush.bf16.msrb.mxu3 %v5071_v31  ;;  %2490 = vmatpush.bf16.msrb.mxu0 %v5071_v31 }
 0x620   :  { %2399 = vmatpush.bf16.msrb.mxu3 %v5076_v6  ;;  %2491 = vmatpush.bf16.msrb.mxu0 %v5076_v6 }
 0x621   :  { %v5151_v23 = vpop.f32.mrf.mxu3 }
 0x622   :  { %2042 = vmatmul.bf16.vlgmr.msra.gmra.mxu0 %v4851_v28  ;;  %2071 = vmatmul.bf16.vlgmr.msrb.gmra.mxu1 %v4851_v28  ;;  %v5128_v28 = vpop.f32.mrf.mxu1 }
 0x623   :  { %2387 = vmatmul.bf16.vlgmr.msrb.gmra.mxu2 %v5512_v59  ;;  %2655 = vmatpush.bf16.msrb.mxu1 %v4914_v52 }
 0x624   :  { %2563 = vmatpush.bf16.msrb.mxu2 %v4914_v52  ;;  %2471 = vmatpush.bf16.msra.mxu3 %v4914_v52 }
 0x625   :  { %2589 = vmatpush.bf16.msra.mxu0 %v4971_v43  ;;  %2400 = vmatmul.bf16.vlgmr.msrb.gmra.mxu3 %v5512_v59 }
 0x627   :  { %2656 = vmatpush.bf16.msrb.mxu1 %v4920_v25 }
 0x628   :  { %2564 = vmatpush.bf16.msrb.mxu2 %v4920_v25  ;;  %2472 = vmatpush.bf16.msra.mxu3 %v4920_v25 }
 0x629   :  { %2590 = vmatpush.bf16.msra.mxu0 %v4983_v50 }
 0x62b   :  { %2657 = vmatpush.bf16.msrb.mxu1 %v4926_v54 }
 0x62c   :  { %2565 = vmatpush.bf16.msrb.mxu2 %v4926_v54  ;;  %2473 = vmatpush.bf16.msra.mxu3 %v4926_v54 }
 0x62d   :  { %2591 = vmatpush.bf16.msra.mxu0 %v5005_v57 }
 0x62f   :  { %2658 = vmatpush.bf16.msrb.mxu1 %v4929_v40 }
 0x630   :  { %2566 = vmatpush.bf16.msrb.mxu2 %v4929_v40  ;;  %2474 = vmatpush.bf16.msra.mxu3 %v4929_v40 }
 0x631   :  { %2592 = vmatpush.bf16.msra.mxu0 %v5014_v62 }
 0x632   :  { %2047 = vmatmul.bf16.gmra.mxu0 %v4856_v15  ;;  %2076 = vmatmul.bf16.gmra.mxu1 %v4856_v15  ;;  %v5133_v15 = vpop.f32.mrf.mxu2 }
 0x633   :  { %2413 = vmatmul.bf16.vlgmr.msra.gmra.mxu2 %v5512_v59  ;;  %2659 = vmatpush.bf16.msrb.mxu1 %v4937_v1 }
 0x634   :  { %2567 = vmatpush.bf16.msrb.mxu2 %v4937_v1  ;;  %2475 = vmatpush.bf16.msra.mxu3 %v4937_v1 }
 0x635   :  { %2593 = vmatpush.bf16.msra.mxu0 %v5033_v21 }
 0x637   :  { %2660 = vmatpush.bf16.msrb.mxu1 %v4944_v55 }
 0x638   :  { %2568 = vmatpush.bf16.msrb.mxu2 %v4944_v55  ;;  %2476 = vmatpush.bf16.msra.mxu3 %v4944_v55 }
 0x639   :  { %2594 = vmatpush.bf16.msra.mxu0 %v5045_v30 }
 0x63a   :  { %v5141_v34 = vpop.f32.mrf.mxu2 }
 0x63b   :  { %2661 = vmatpush.bf16.msrb.mxu1 %v4954_v63 }
 0x63c   :  { %2569 = vmatpush.bf16.msrb.mxu2 %v4954_v63  ;;  %2477 = vmatpush.bf16.msra.mxu3 %v4954_v63 }
 0x63d   :  { %2595 = vmatpush.bf16.msra.mxu0 %v5055_v22 }
 0x63f   :  { %2662 = vmatpush.bf16.msrb.mxu1 %v4964_v3 }
 0x640   :  { %2570 = vmatpush.bf16.msrb.mxu2 %v4964_v3  ;;  %2478 = vmatpush.bf16.msra.mxu3 %v4964_v3 }
 0x641   :  { %2596 = vmatpush.bf16.msra.mxu0 %v5063_v2 }
 0x642   :  { %2052 = vmatmul.bf16.gmra.mxu0 %v4861_v36  ;;  %2081 = vmatmul.bf16.gmra.mxu1 %v4861_v36  ;;  %v5137_v36 = vpop.f32.mrf.mxu1  ;;  %v1806_v18 = vpop.f32.mrf.mxu2 }
 0x644   :  { %2668 = vmatpush.bf16.msra.mxu2 %v4946_v7  ;;  %2576 = vmatpush.bf16.msrb.mxu3 %v4946_v7 }
 0x648   :  { %2669 = vmatpush.bf16.msra.mxu2 %v4969_v49  ;;  %2577 = vmatpush.bf16.msrb.mxu3 %v4969_v49 }
 0x64a   :  { %v1777_v60 = vpop.f32.mrf.mxu1  ;;  %v1808_v4 = vpop.f32.mrf.mxu2 }
 0x64c   :  { %2670 = vmatpush.bf16.msra.mxu2 %v4996_v27  ;;  %2578 = vmatpush.bf16.msrb.mxu3 %v4996_v27 }
 0x650   :  { %2671 = vmatpush.bf16.msra.mxu2 %v5007_v0  ;;  %2579 = vmatpush.bf16.msrb.mxu3 %v5007_v0 }
 0x652   :  { %2057 = vmatmul.bf16.gmra.mxu0 %v5031_v56  ;;  %2086 = vmatmul.bf16.gmra.mxu1 %v5031_v56  ;;  %v1779_v5 = vpop.f32.mrf.mxu1  ;;  %v1811_v37 = vpop.f32.mrf.mxu2 }
 0x654   :  { %2672 = vmatpush.bf16.msra.mxu2 %v5042_v33  ;;  %2580 = vmatpush.bf16.msrb.mxu3 %v5042_v33 }
 0x658   :  { %2673 = vmatpush.bf16.msra.mxu2 %v5049_v44  ;;  %2581 = vmatpush.bf16.msrb.mxu3 %v5049_v44 }
 0x65a   :  { %v1782_v10 = vpop.f32.mrf.mxu1  ;;  %v5147_v42 = vpop.f32.mrf.mxu2 }
 0x65b   :  { %5515 = vst [vmem:[#allocation29_spill] sm:$0xff] %v5147_v42 }
 0x65c   :  { %2674 = vmatpush.bf16.msra.mxu2 %v5071_v31  ;;  %2582 = vmatpush.bf16.msrb.mxu3 %v5071_v31 }
 0x660   :  { %2675 = vmatpush.bf16.msra.mxu2 %v5076_v6  ;;  %2583 = vmatpush.bf16.msrb.mxu3 %v5076_v6 }
 0x662   :  { %v5145_v56 = vpop.f32.mrf.mxu1 }
 0x663   :  { %5514 = vst [vmem:[#allocation21_spill] sm:$0xff] %v5145_v56 }
 0x68f   :  { %v5149_v12 = vpop.f32.mrf.mxu0  ;;  %v1787_v61 = vpop.f32.mrf.mxu1 }
 0x690   :  { %5516 = vst [vmem:[#allocation16_spill] sm:$0xff] %v5149_v12  ;;  %v1788_v8 = vadd.f32 %v1787_v61, %v5158_v51 }
 0x696   :  { %v1816_v47 = vpop.f32.mrf.mxu2  ;;  %v5155_v20 = vpop.f32.mrf.mxu3 }
 0x697   :  { %v5153_v39 = vpop.f32.mrf.mxu0  ;;  %v1789_v38 = vpop.f32.mrf.mxu1  ;;  %v1817_v53 = vadd.f32 %v1816_v47, %v5161_v26  ;;  %v1783_v47 = vadd.f32 %v1782_v10, %v5158_v51 }
 0x698   :  { %5517 = vst [vmem:[#allocation18_spill] sm:$0xff] %v5153_v39  ;;  %v1790_v19 = vadd.f32 %v1789_v38, %v5158_v51 }
 0x69e   :  { %v1818_v11 = vpop.f32.mrf.mxu2  ;;  %v2031_v17 = vpop.f32.mrf.mxu3 }
 0x69f   :  { %v1819_v48 = vadd.f32 %v1818_v11, %v5161_v26  ;;  %v2043_v58 = vpop.f32.mrf.mxu0  ;;  %v2072_v24 = vpop.f32.mrf.mxu1  ;;  %v2122_v39 = vadd.f32 %v2031_v17, %v1744_v32 }
 0x6a0   :  { %v5165_v41 = vadd.f32 %v2043_v58, %v1790_v19 }
 0x6a1   :  { %v5167_v59 = vadd.f32 %v2072_v24, %v1819_v48 }
 0x6a2   :  { %5518 = vst [vmem:[#allocation24_spill] sm:$0xff] %v5165_v41 }
 0x6a3   :  { %5519 = vst [vmem:[#allocation23_spill] sm:$0xff] %v5167_v59 }
 0x6a6   :  { %v2388_v12 = vpop.f32.mrf.mxu2 }
 0x6a7   :  { %v2418_v38 = vadd.f32 %v2388_v12, %v2122_v39  ;;  %v2045_v42 = vpop.f32.mrf.mxu0  ;;  %v2074_v46 = vpop.f32.mrf.mxu1  ;;  %v1812_v12 = vadd.f32 %v1811_v37, %v5161_v26 }
 0x6a8   :  { %v5173_v11 = vadd.f32 %v2045_v42, %v1788_v8  ;;  %v5175_v45 = vadd.f32 %v2074_v46, %v1817_v53  ;;  %v2401_v16 = vpop.f32.mrf.mxu3 }
 0x6a9   :  { %v3681_v19 = vmul.f32 -1.442695, %v2418_v38  ;;  %v1780_v38 = vadd.f32 %v1779_v5, %v5158_v51 }
 0x6aa   :  { %5520 = vst [vmem:[#allocation22_spill] sm:$0xff] %v5173_v11 }
 0x6ab   :  { %5521 = vst [vmem:[#allocation28_spill] sm:$0xff] %v5175_v45  ;;  %3912 = vpow2.f32 %v3681_v19  ;;  %v1809_v19 = vadd.f32 %v1808_v4, %v5161_v26 }
 0x6ae   :  { %v2390_v48 = vpop.f32.mrf.mxu2 }
 0x6af   :  { %v5177_v58 = vpop.f32.mrf.mxu0  ;;  %v5179_v24 = vpop.f32.mrf.mxu1 }
 0x6b0   :  { %5522 = vst [vmem:[#allocation17_spill] sm:$0xff] %v5177_v58  ;;  %v2403_v53 = vpop.f32.mrf.mxu3 }
 0x6b1   :  { %5523 = vst [vmem:[#allocation26_spill] sm:$0xff] %v5179_v24  ;;  %v3913_v32 = vpop.eup %3912 }
 0x6b2   :  { %v2422_v61 = vadd.f32 1.0, %v3913_v32 }
 0x6b4   :  { %3914 = vrcp.f32 %v2422_v61  ;;  %vm2428_vm2 = vweird.f32 %v2422_v61 }
 0x6b6   :  { %v2414_v39 = vpop.f32.mrf.mxu2 }
 0x6b7   :  { %v2050_v17 = vpop.f32.mrf.mxu0  ;;  %v2079_v8 = vpop.f32.mrf.mxu1 }
 0x6b8   :  { %v5183_v42 = vadd.f32 %v2050_v17, %v1783_v47  ;;  %v5185_v46 = vadd.f32 %v2079_v8, %v1812_v12  ;;  %v1778_v47 = vadd.f32 %v1777_v60, %v5158_v51  ;;  %v1807_v12 = vadd.f32 %v1806_v18, %v5161_v26  ;;  %v5206_v60 = vld [vmem:[%s5471_s10] ss:$0 sm:$0xff] }
 0x6b9   :  { %v2432_v18 = vand.u32 2147483647, %v2422_v61 }
 0x6ba   :  { %5524 = vst [vmem:[#allocation27_spill] sm:$0xff] %v5185_v46  ;;  %v3915_v59 = vpop.eup %3914 }
 0x6bb   :  { %v2424_v45 = vmul.f32 %v3915_v59, %v2422_v61  ;;  %vm2429_vm1 = vweird.f32 %v3915_v59  ;;  %vm2433_vm4 = vcmp.eq.f32.partialorder %v2432_v18, 8.507059e+37 }
 0x6bc   :  { %vm2430_vm3 = vmor %vm2428_vm2, %vm2429_vm1 }
 0x6bd   :  { %v2425_v17 = vsub.f32 1.0, %v2424_v45 }
 0x6be   :  { %v2416_v48 = vpop.f32.mrf.mxu2 }
 0x6bf   :  { %v2053_v32 = vpop.f32.mrf.mxu0  ;;  %v2082_v41 = vpop.f32.mrf.mxu1  ;;  %v2426_v4 = vmul.f32 %v3915_v59, %v2425_v17  ;;  %v1804_v48 = vadd.f32 %v5141_v34, %v5161_v26  ;;  %v2458_v34 = vadd.f32 %v5206_v60, %v2414_v39 }
 0x6c0   :  { %v5189_v10 = vadd.f32 %v2053_v32, %v1780_v38  ;;  %v5191_v37 = vadd.f32 %v2082_v41, %v1809_v19  ;;  %v2434_v41 = vand.u32 2147483648, %v2422_v61 }
 0x6c1   :  { %v2427_v38 = vadd.f32 %v3915_v59, %v2426_v4 }
 0x6c7   :  { %v2055_v8 = vpop.f32.mrf.mxu0  ;;  %v2084_v53 = vpop.f32.mrf.mxu1 }
 0x6c8   :  { %v5195_v11 = vadd.f32 %v2055_v8, %v1778_v47  ;;  %v5197_v5 = vadd.f32 %v2084_v53, %v1807_v12  ;;  %v2431_v47 = vsel %vm2430_vm3, %v3915_v59, %v2427_v38  ;;  %v2435_v12 = vor.u32 1.1754944e-38, %v2434_v41 }
 0x6c9   :  { %v1773_v8 = vadd.f32 %v5128_v28, %v5158_v51  ;;  %v1802_v53 = vadd.f32 %v5133_v15, %v5161_v26 }
 0x6ca   :  { %v2436_v17 = vsel %vm2433_vm4, %v2435_v12, %v2431_v47 }
 0x6cb   :  { %v2459_v58 = vmul.f32 %v2458_v34, %v2436_v17 }
 0x6cf   :  { %v5201_v19 = vpop.f32.mrf.mxu0  ;;  %v2087_v32 = vpop.f32.mrf.mxu1 }
 0x6d0   :  { %v5208_v45 = vadd.f32 %v2087_v32, %v1804_v48 }
 0x6d7   :  { %v2060_v4 = vpop.f32.mrf.mxu0  ;;  %v2089_v24 = vpop.f32.mrf.mxu1 }
 0x6d8   :  { %v2123_v56 = vadd.f32 %v2060_v4, %v1773_v8  ;;  %v2124_v61 = vadd.f32 %v2089_v24, %v1802_v53  ;;  %v1775_v4 = vadd.f32 %v5137_v36, %v5158_v51 }
 0x6da   :  { %v2438_v48 = vadd.f32 %v2401_v16, %v2123_v56  ;;  %v2460_v32 = vadd.f32 %v2459_v58, %v2124_v61  ;;  %v2135_v61 = vadd.f32 %v5201_v19, %v1775_v4 }
 0x6dc   :  { %v3682_v46 = vmul.f32 -1.442695, %v2438_v48 }
 0x6de   :  { %3916 = vpow2.f32 %v3682_v46 }
 0x6e4   :  { %v3917_v59 = vpop.eup %3916 }
 0x6e5   :  { %v2442_v38 = vadd.f32 1.0, %v3917_v59 }
 0x6e7   :  { %3918 = vrcp.f32 %v2442_v38  ;;  %v2454_v47 = vand.u32 2147483648, %v2442_v38  ;;  %v2452_v12 = vand.u32 2147483647, %v2442_v38  ;;  %vm2448_vm6 = vweird.f32 %v2442_v38 }
 0x6e8   :  { %3920 = vtanh.f32 %v2460_v32 }
 0x6e9   :  { %v2455_v34 = vor.u32 1.1754944e-38, %v2454_v47  ;;  %vm2453_vm8 = vcmp.eq.f32.partialorder %v2452_v12, 8.507059e+37 }
 0x6ed   :  { %v3919_v39 = vpop.eup %3918 }
 0x6ee   :  { %v2444_v41 = vmul.f32 %v3919_v39, %v2442_v38  ;;  %vm2449_vm5 = vweird.f32 %v3919_v39  ;;  %v3921_v16 = vpop.eup %3920  ;;  %v1746_v38 = vadd.f32 %v4933_v13, %v5026_v29 }
 0x6ef   :  { %vm2450_vm7 = vmor %vm2448_vm6, %vm2449_vm5 }
 0x6f0   :  { %v2445_v18 = vsub.f32 1.0, %v2444_v41  ;;  %v2134_v41 = vadd.f32 %v5155_v20, %v1746_v38 }
 0x6f2   :  { %v2446_v28 = vmul.f32 %v3919_v39, %v2445_v18 }
 0x6f4   :  { %v2447_v15 = vadd.f32 %v3919_v39, %v2446_v28 }
 0x6f6   :  { %v2451_v24 = vsel %vm2450_vm7, %v3919_v39, %v2447_v15 }
 0x6f7   :  { %v2456_v56 = vsel %vm2453_vm8, %v2455_v34, %v2451_v24 }
 0x6f8   :  { %v2462_v58 = vsub.f32 1.0, %v2456_v56  ;;  %v2464_v17 = vmul.f32 0.0, %v2456_v56 }
 0x6fa   :  { %v2463_v46 = vmul.f32 %v3921_v16, %v2462_v58 }
 0x6fc   :  { %v5215_v8 = vadd.f32 %v2464_v17, %v2463_v46 }
 0x6fe   :  { %v2470_v53 = vpack.c.bf16 %v5215_v8, %v5215_v8 }
 0x700   :  { %2479 = vmatmul.bf16.vlgmr.msra.gmra.mxu3 %v2470_v53  ;;  %2492 = vmatmul.bf16.vlgmr.msrb.gmra.mxu0 %v2470_v53 }
 0x701   :  { %2505 = vmatmul.bf16.vlgmr.msra.gmra.mxu1 %v2470_v53  ;;  %2681 = vmatpush.bf16.msra.mxu3 %v4971_v43 }
 0x702   :  { %2747 = vmatpush.bf16.msrb.mxu0 %v4914_v52  ;;  %2760 = vmatpush.bf16.msra.mxu1 %v4946_v7 }
 0x705   :  { %2682 = vmatpush.bf16.msra.mxu3 %v4983_v50 }
 0x706   :  { %2748 = vmatpush.bf16.msrb.mxu0 %v4920_v25  ;;  %2761 = vmatpush.bf16.msra.mxu1 %v4969_v49 }
 0x709   :  { %2683 = vmatpush.bf16.msra.mxu3 %v5005_v57 }
 0x70a   :  { %2749 = vmatpush.bf16.msrb.mxu0 %v4926_v54  ;;  %2762 = vmatpush.bf16.msra.mxu1 %v4996_v27 }
 0x70d   :  { %2684 = vmatpush.bf16.msra.mxu3 %v5014_v62 }
 0x70e   :  { %2750 = vmatpush.bf16.msrb.mxu0 %v4929_v40  ;;  %2763 = vmatpush.bf16.msra.mxu1 %v5007_v0 }
 0x711   :  { %2685 = vmatpush.bf16.msra.mxu3 %v5033_v21 }
 0x712   :  { %2751 = vmatpush.bf16.msrb.mxu0 %v4937_v1  ;;  %2764 = vmatpush.bf16.msra.mxu1 %v5042_v33 }
 0x715   :  { %2686 = vmatpush.bf16.msra.mxu3 %v5045_v30 }
 0x716   :  { %2752 = vmatpush.bf16.msrb.mxu0 %v4944_v55  ;;  %2765 = vmatpush.bf16.msra.mxu1 %v5049_v44 }
 0x719   :  { %2687 = vmatpush.bf16.msra.mxu3 %v5055_v22 }
 0x71a   :  { %2753 = vmatpush.bf16.msrb.mxu0 %v4954_v63  ;;  %2766 = vmatpush.bf16.msra.mxu1 %v5071_v31 }
 0x71d   :  { %2688 = vmatpush.bf16.msra.mxu3 %v5063_v2 }
 0x71e   :  { %2754 = vmatpush.bf16.msrb.mxu0 %v4964_v3  ;;  %2767 = vmatpush.bf16.msra.mxu1 %v5076_v6 }
 0x77d   :  { %v2493_v48 = vpop.f32.mrf.mxu0 }
 0x77e   :  { %v2530_v32 = vadd.f32 %v2493_v48, %v2135_v61  ;;  %v2506_v59 = vpop.f32.mrf.mxu1 }
 0x780   :  { %v3684_v39 = vmul.f32 -1.442695, %v2530_v32 }
 0x782   :  { %3922 = vpow2.f32 %v3684_v39  ;;  %v2550_v39 = vadd.f32 %v5206_v60, %v2506_v59 }
 0x783   :  { %v2480_v18 = vpop.f32.mrf.mxu3 }
 0x784   :  { %v2510_v47 = vadd.f32 %v2480_v18, %v2134_v41 }
 0x785   :  { %v2495_v28 = vpop.f32.mrf.mxu0 }
 0x786   :  { %v3683_v12 = vmul.f32 -1.442695, %v2510_v47  ;;  %v2508_v15 = vpop.f32.mrf.mxu1 }
 0x788   :  { %v3923_v34 = vpop.eup %3922  ;;  %3924 = vpow2.f32 %v3683_v12 }
 0x789   :  { %v2534_v36 = vadd.f32 1.0, %v3923_v34 }
 0x78b   :  { %v2482_v24 = vpop.f32.mrf.mxu3  ;;  %3926 = vrcp.f32 %v2534_v36  ;;  %v2546_v28 = vand.u32 2147483648, %v2534_v36  ;;  %vm2540_vm14 = vweird.f32 %v2534_v36  ;;  %v2544_v15 = vand.u32 2147483647, %v2534_v36 }
 0x78d   :  { %vm2545_vm0 = vcmp.eq.f32.partialorder %v2544_v15, 8.507059e+37 }
 0x78e   :  { %v3925_v19 = vpop.eup %3924 }
 0x78f   :  { %v2514_v56 = vadd.f32 1.0, %v3925_v19  ;;  %v2547_v19 = vor.u32 1.1754944e-38, %v2546_v28 }
 0x791   :  { %3928 = vrcp.f32 %v2514_v56  ;;  %v3927_v58 = vpop.eup %3926  ;;  %v2526_v53 = vand.u32 2147483648, %v2514_v56  ;;  %v2524_v61 = vand.u32 2147483647, %v2514_v56  ;;  %vm2520_vm10 = vweird.f32 %v2514_v56 }
 0x792   :  { %v2536_v16 = vmul.f32 %v3927_v58, %v2534_v36  ;;  %vm2541_vm13 = vweird.f32 %v3927_v58  ;;  %v1749_v36 = vadd.f32 %v4948_v35, %v5026_v29 }
 0x793   :  { %v2527_v38 = vor.u32 1.1754944e-38, %v2526_v53  ;;  %vm2525_vm12 = vcmp.eq.f32.partialorder %v2524_v61, 8.507059e+37  ;;  %vm2542_vm15 = vmor %vm2540_vm14, %vm2541_vm13 }
 0x794   :  { %v2537_v17 = vsub.f32 1.0, %v2536_v16 }
 0x796   :  { %v2538_v48 = vmul.f32 %v3927_v58, %v2537_v17 }
 0x797   :  { %v3929_v13 = vpop.eup %3928 }
 0x798   :  { %v2516_v46 = vmul.f32 %v3929_v13, %v2514_v56  ;;  %vm2521_vm9 = vweird.f32 %v3929_v13  ;;  %v2539_v18 = vadd.f32 %v3927_v58, %v2538_v48 }
 0x799   :  { %vm2522_vm11 = vmor %vm2520_vm10, %vm2521_vm9 }
 0x79a   :  { %v2517_v20 = vsub.f32 1.0, %v2516_v46  ;;  %v2543_v24 = vsel %vm2542_vm15, %v3927_v58, %v2539_v18  ;;  %v2146_v58 = vadd.f32 %v5151_v23, %v1749_v36 }
 0x79b   :  { %v2548_v56 = vsel %vm2545_vm0, %v2547_v19, %v2543_v24 }
 0x79c   :  { %v2518_v4 = vmul.f32 %v3929_v13, %v2517_v20  ;;  %v2554_v16 = vsub.f32 1.0, %v2548_v56 }
 0x79e   :  { %v2519_v32 = vadd.f32 %v3929_v13, %v2518_v4 }
 0x7a0   :  { %v2523_v41 = vsel %vm2522_vm11, %v3929_v13, %v2519_v32  ;;  %v2556_v13 = vmul.f32 %v2548_v56, %v5215_v8 }
 0x7a1   :  { %v2528_v47 = vsel %vm2525_vm12, %v2527_v38, %v2523_v41 }
 0x7a2   :  { %v2551_v12 = vmul.f32 %v2550_v39, %v2528_v47 }
 0x7a4   :  { %v2552_v34 = vadd.f32 %v2551_v12, %v5208_v45 }
 0x7a6   :  { %3930 = vtanh.f32 %v2552_v34 }
 0x7ac   :  { %v3931_v46 = vpop.eup %3930 }
 0x7ad   :  { %v2555_v59 = vmul.f32 %v3931_v46, %v2554_v16 }
 0x7af   :  { %v5252_v17 = vadd.f32 %v2556_v13, %v2555_v59 }
 0x7b1   :  { %v2562_v20 = vpack.c.bf16 %v5252_v17, %v5252_v17 }
 0x7b3   :  { %2571 = vmatmul.bf16.vlgmr.msrb.gmra.mxu2 %v2562_v20  ;;  %2584 = vmatmul.bf16.vlgmr.msrb.gmra.mxu3 %v2562_v20 }
 0x7b4   :  { %2597 = vmatmul.bf16.vlgmr.msra.gmra.mxu0 %v2562_v20  ;;  %2773 = vmatpush.bf16.msrb.mxu2 %v4971_v43 }
 0x7b5   :  { %2839 = vmatpush.bf16.msrb.mxu3 %v4914_v52  ;;  %2852 = vmatpush.bf16.msra.mxu0 %v4946_v7 }
 0x7b8   :  { %2774 = vmatpush.bf16.msrb.mxu2 %v4983_v50 }
 0x7b9   :  { %2840 = vmatpush.bf16.msrb.mxu3 %v4920_v25  ;;  %2853 = vmatpush.bf16.msra.mxu0 %v4969_v49 }
 0x7bc   :  { %2775 = vmatpush.bf16.msrb.mxu2 %v5005_v57 }
 0x7bd   :  { %2841 = vmatpush.bf16.msrb.mxu3 %v4926_v54  ;;  %2854 = vmatpush.bf16.msra.mxu0 %v4996_v27 }
 0x7c0   :  { %2776 = vmatpush.bf16.msrb.mxu2 %v5014_v62 }
 0x7c1   :  { %2842 = vmatpush.bf16.msrb.mxu3 %v4929_v40  ;;  %2855 = vmatpush.bf16.msra.mxu0 %v5007_v0 }
 0x7c4   :  { %2777 = vmatpush.bf16.msrb.mxu2 %v5033_v21 }
 0x7c5   :  { %2843 = vmatpush.bf16.msrb.mxu3 %v4937_v1  ;;  %2856 = vmatpush.bf16.msra.mxu0 %v5042_v33 }
 0x7c8   :  { %2778 = vmatpush.bf16.msrb.mxu2 %v5045_v30 }
 0x7c9   :  { %2844 = vmatpush.bf16.msrb.mxu3 %v4944_v55  ;;  %2857 = vmatpush.bf16.msra.mxu0 %v5049_v44 }
 0x7cc   :  { %2779 = vmatpush.bf16.msrb.mxu2 %v5055_v22 }
 0x7cd   :  { %2845 = vmatpush.bf16.msrb.mxu3 %v4954_v63  ;;  %2858 = vmatpush.bf16.msra.mxu0 %v5071_v31 }
 0x7d0   :  { %2780 = vmatpush.bf16.msrb.mxu2 %v5063_v2 }
 0x7d1   :  { %2846 = vmatpush.bf16.msrb.mxu3 %v4964_v3  ;;  %2859 = vmatpush.bf16.msra.mxu0 %v5076_v6 }
 0x831   :  { %v2598_v45 = vpop.f32.mrf.mxu0 }
 0x832   :  { %v2642_v36 = vadd.f32 %v5206_v60, %v2598_v45 }
 0x836   :  { %v2572_v53 = vpop.f32.mrf.mxu2  ;;  %v2585_v4 = vpop.f32.mrf.mxu3 }
 0x837   :  { %v2602_v61 = vadd.f32 %v2572_v53, %v2146_v58  ;;  %v2622_v48 = vadd.f32 %v2585_v4, %v5195_v11 }
 0x839   :  { %v3685_v32 = vmul.f32 -1.442695, %v2602_v61  ;;  %v3686_v38 = vmul.f32 -1.442695, %v2622_v48  ;;  %v2600_v39 = vpop.f32.mrf.mxu0 }
 0x83b   :  { %3932 = vpow2.f32 %v3685_v32 }
 0x83c   :  { %3934 = vpow2.f32 %v3686_v38 }
 0x83e   :  { %v2574_v41 = vpop.f32.mrf.mxu2  ;;  %v2587_v18 = vpop.f32.mrf.mxu3 }
 0x841   :  { %v3933_v47 = vpop.eup %3932 }
 0x842   :  { %v3935_v28 = vpop.eup %3934  ;;  %v2606_v12 = vadd.f32 1.0, %v3933_v47 }
 0x843   :  { %v2626_v15 = vadd.f32 1.0, %v3935_v28 }
 0x844   :  { %3936 = vrcp.f32 %v2606_v12  ;;  %v2618_v56 = vand.u32 2147483648, %v2606_v12  ;;  %v2616_v46 = vand.u32 2147483647, %v2606_v12  ;;  %vm2612_vm2 = vweird.f32 %v2606_v12 }
 0x845   :  { %3938 = vrcp.f32 %v2626_v15  ;;  %v2638_v48 = vand.u32 2147483648, %v2626_v15  ;;  %vm2632_vm6 = vweird.f32 %v2626_v15  ;;  %v2636_v32 = vand.u32 2147483647, %v2626_v15 }
 0x846   :  { %v2619_v20 = vor.u32 1.1754944e-38, %v2618_v56  ;;  %vm2617_vm4 = vcmp.eq.f32.partialorder %v2616_v46, 8.507059e+37 }
 0x847   :  { %v2639_v41 = vor.u32 1.1754944e-38, %v2638_v48  ;;  %vm2637_vm8 = vcmp.eq.f32.partialorder %v2636_v32, 8.507059e+37 }
 0x84a   :  { %v3937_v35 = vpop.eup %3936 }
 0x84b   :  { %v3939_v23 = vpop.eup %3938  ;;  %v2608_v34 = vmul.f32 %v3937_v35, %v2606_v12  ;;  %vm2613_vm1 = vweird.f32 %v3937_v35 }
 0x84c   :  { %v2628_v24 = vmul.f32 %v3939_v23, %v2626_v15  ;;  %vm2614_vm3 = vmor %vm2612_vm2, %vm2613_vm1  ;;  %vm2633_vm5 = vweird.f32 %v3939_v23 }
 0x84d   :  { %v2609_v19 = vsub.f32 1.0, %v2608_v34  ;;  %vm2634_vm7 = vmor %vm2632_vm6, %vm2633_vm5 }
 0x84e   :  { %v2629_v11 = vsub.f32 1.0, %v2628_v24 }
 0x84f   :  { %v2610_v16 = vmul.f32 %v3937_v35, %v2609_v19 }
 0x850   :  { %v2630_v59 = vmul.f32 %v3939_v23, %v2629_v11 }
 0x851   :  { %v2611_v13 = vadd.f32 %v3937_v35, %v2610_v16 }
 0x852   :  { %v2631_v4 = vadd.f32 %v3939_v23, %v2630_v59 }
 0x853   :  { %v2615_v58 = vsel %vm2614_vm3, %v3937_v35, %v2611_v13 }
 0x854   :  { %v2620_v53 = vsel %vm2617_vm4, %v2619_v20, %v2615_v58  ;;  %v2635_v39 = vsel %vm2634_vm7, %v3939_v23, %v2631_v4 }
 0x855   :  { %v2643_v61 = vmul.f32 %v2642_v36, %v2620_v53  ;;  %v2640_v18 = vsel %vm2637_vm8, %v2639_v41, %v2635_v39 }
 0x856   :  { %v2646_v47 = vsub.f32 1.0, %v2640_v18  ;;  %v2648_v12 = vmul.f32 %v2640_v18, %v5252_v17 }
 0x857   :  { %v2644_v38 = vadd.f32 %v2643_v61, %v5197_v5 }
 0x859   :  { %3940 = vtanh.f32 %v2644_v38 }
 0x85f   :  { %v3941_v28 = vpop.eup %3940 }
 0x860   :  { %v2647_v45 = vmul.f32 %v3941_v28, %v2646_v47 }
 0x862   :  { %v5287_v35 = vadd.f32 %v2648_v12, %v2647_v45 }
 0x864   :  { %v2654_v34 = vpack.c.bf16 %v5287_v35, %v5287_v35 }
 0x866   :  { %2663 = vmatmul.bf16.vlgmr.msrb.gmra.mxu1 %v2654_v34  ;;  %2676 = vmatmul.bf16.vlgmr.msra.gmra.mxu2 %v2654_v34 }
 0x867   :  { %2689 = vmatmul.bf16.vlgmr.msra.gmra.mxu3 %v2654_v34  ;;  %2865 = vmatpush.bf16.msrb.mxu1 %v4971_v43 }
 0x868   :  { %2931 = vmatpush.bf16.msra.mxu2 %v4914_v52  ;;  %2944 = vmatpush.bf16.msra.mxu3 %v4946_v7 }
 0x86b   :  { %2866 = vmatpush.bf16.msrb.mxu1 %v4983_v50 }
 0x86c   :  { %2932 = vmatpush.bf16.msra.mxu2 %v4920_v25  ;;  %2945 = vmatpush.bf16.msra.mxu3 %v4969_v49 }
 0x86f   :  { %2867 = vmatpush.bf16.msrb.mxu1 %v5005_v57 }
 0x870   :  { %2933 = vmatpush.bf16.msra.mxu2 %v4926_v54  ;;  %2946 = vmatpush.bf16.msra.mxu3 %v4996_v27 }
 0x873   :  { %2868 = vmatpush.bf16.msrb.mxu1 %v5014_v62 }
 0x874   :  { %2934 = vmatpush.bf16.msra.mxu2 %v4929_v40  ;;  %2947 = vmatpush.bf16.msra.mxu3 %v5007_v0 }
 0x877   :  { %2869 = vmatpush.bf16.msrb.mxu1 %v5033_v21 }
 0x878   :  { %2935 = vmatpush.bf16.msra.mxu2 %v4937_v1  ;;  %2948 = vmatpush.bf16.msra.mxu3 %v5042_v33 }
 0x87b   :  { %2870 = vmatpush.bf16.msrb.mxu1 %v5045_v30 }
 0x87c   :  { %2936 = vmatpush.bf16.msra.mxu2 %v4944_v55  ;;  %2949 = vmatpush.bf16.msra.mxu3 %v5049_v44 }
 0x87f   :  { %2871 = vmatpush.bf16.msrb.mxu1 %v5055_v22 }
 0x880   :  { %2937 = vmatpush.bf16.msra.mxu2 %v4954_v63  ;;  %2950 = vmatpush.bf16.msra.mxu3 %v5071_v31 }
 0x883   :  { %2872 = vmatpush.bf16.msrb.mxu1 %v5063_v2 }
 0x884   :  { %2938 = vmatpush.bf16.msra.mxu2 %v4964_v3  ;;  %2951 = vmatpush.bf16.msra.mxu3 %v5076_v6 }
 0x8e3   :  { %v2664_v5 = vpop.f32.mrf.mxu1 }
 0x8e4   :  { %v2694_v15 = vadd.f32 %v2664_v5, %v5060_v14 }
 0x8e6   :  { %v3687_v23 = vmul.f32 -1.442695, %v2694_v15 }
 0x8e8   :  { %3942 = vpow2.f32 %v3687_v23 }
 0x8e9   :  { %v2677_v24 = vpop.f32.mrf.mxu2 }
 0x8ea   :  { %v2714_v19 = vadd.f32 %v2677_v24, %v5189_v10  ;;  %v2690_v56 = vpop.f32.mrf.mxu3 }
 0x8eb   :  { %v2666_v11 = vpop.f32.mrf.mxu1  ;;  %v2734_v28 = vadd.f32 %v5206_v60, %v2690_v56 }
 0x8ec   :  { %v3688_v16 = vmul.f32 -1.442695, %v2714_v19 }
 0x8ee   :  { %v3943_v46 = vpop.eup %3942  ;;  %3944 = vpow2.f32 %v3688_v16 }
 0x8ef   :  { %v2698_v59 = vadd.f32 1.0, %v3943_v46 }
 0x8f1   :  { %3946 = vrcp.f32 %v2698_v59  ;;  %v2679_v13 = vpop.f32.mrf.mxu2  ;;  %v2710_v61 = vand.u32 2147483648, %v2698_v59  ;;  %v2708_v32 = vand.u32 2147483647, %v2698_v59  ;;  %vm2704_vm10 = vweird.f32 %v2698_v59 }
 0x8f2   :  { %v2692_v20 = vpop.f32.mrf.mxu3 }
 0x8f3   :  { %v2711_v41 = vor.u32 1.1754944e-38, %v2710_v61  ;;  %vm2709_vm12 = vcmp.eq.f32.partialorder %v2708_v32, 8.507059e+37 }
 0x8f4   :  { %v3945_v36 = vpop.eup %3944 }
 0x8f5   :  { %v2718_v58 = vadd.f32 1.0, %v3945_v36 }
 0x8f7   :  { %v3947_v53 = vpop.eup %3946  ;;  %3948 = vrcp.f32 %v2718_v58  ;;  %v2730_v34 = vand.u32 2147483648, %v2718_v58  ;;  %v2728_v15 = vand.u32 2147483647, %v2718_v58  ;;  %vm2724_vm14 = vweird.f32 %v2718_v58 }
 0x8f8   :  { %v2700_v4 = vmul.f32 %v3947_v53, %v2698_v59  ;;  %vm2705_vm9 = vweird.f32 %v3947_v53 }
 0x8f9   :  { %vm2706_vm11 = vmor %vm2704_vm10, %vm2705_vm9  ;;  %v2731_v19 = vor.u32 1.1754944e-38, %v2730_v34  ;;  %vm2729_vm0 = vcmp.eq.f32.partialorder %v2728_v15, 8.507059e+37 }
 0x8fa   :  { %v2701_v14 = vsub.f32 1.0, %v2700_v4 }
 0x8fc   :  { %v2702_v48 = vmul.f32 %v3947_v53, %v2701_v14 }
 0x8fd   :  { %v3949_v10 = vpop.eup %3948 }
 0x8fe   :  { %v2720_v38 = vmul.f32 %v3949_v10, %v2718_v58  ;;  %v2703_v39 = vadd.f32 %v3947_v53, %v2702_v48  ;;  %vm2725_vm13 = vweird.f32 %v3949_v10 }
 0x8ff   :  { %vm2726_vm15 = vmor %vm2724_vm14, %vm2725_vm13 }
 0x900   :  { %v2721_v18 = vsub.f32 1.0, %v2720_v38  ;;  %v2707_v47 = vsel %vm2706_vm11, %v3947_v53, %v2703_v39 }
 0x901   :  { %v2712_v45 = vsel %vm2709_vm12, %v2711_v41, %v2707_v47 }
 0x902   :  { %v2722_v12 = vmul.f32 %v3949_v10, %v2721_v18  ;;  %v2735_v5 = vmul.f32 %v2734_v28, %v2712_v45  ;;  %v5525_v45 = vld [vmem:[#allocation27_spill] sm:$0xff] }
 0x904   :  { %v2723_v23 = vadd.f32 %v3949_v10, %v2722_v12  ;;  %v2736_v24 = vadd.f32 %v2735_v5, %v5191_v37 }
 0x906   :  { %v2727_v11 = vsel %vm2726_vm15, %v3949_v10, %v2723_v23  ;;  %3950 = vtanh.f32 %v2736_v24 }
 0x907   :  { %v2732_v16 = vsel %vm2729_vm0, %v2731_v19, %v2727_v11 }
 0x908   :  { %v2738_v46 = vsub.f32 1.0, %v2732_v16  ;;  %v2740_v56 = vmul.f32 %v2732_v16, %v5287_v35 }
 0x90c   :  { %v3951_v59 = vpop.eup %3950 }
 0x90d   :  { %v2739_v13 = vmul.f32 %v3951_v59, %v2738_v46  ;;  %v5526_v59 = vld [vmem:[#allocation21_spill] sm:$0xff] }
 0x90f   :  { %v5320_v20 = vadd.f32 %v2740_v56, %v2739_v13  ;;  %v1785_v13 = vadd.f32 %v5526_v59, %v5158_v51  ;;  %v5527_v56 = vld [vmem:[#allocation17_spill] sm:$0xff] }
 0x911   :  { %v2746_v36 = vpack.c.bf16 %v5320_v20, %v5320_v20 }
 0x913   :  { %2755 = vmatmul.bf16.vlgmr.msrb.gmra.mxu0 %v2746_v36  ;;  %2768 = vmatmul.bf16.vlgmr.msra.gmra.mxu1 %v2746_v36 }
 0x914   :  { %2781 = vmatmul.bf16.vlgmr.msrb.gmra.mxu2 %v2746_v36  ;;  %2957 = vmatpush.bf16.msrb.mxu0 %v4971_v43  ;;  %v2183_v36 = vadd.f32 %v5527_v56, %v1785_v13  ;;  %v5533_v13 = vld [vmem:[#allocation20_spill] sm:$0xff] }
 0x915   :  { %3023 = vmatpush.bf16.msra.mxu1 %v4914_v52  ;;  %3036 = vmatpush.bf16.msrb.mxu2 %v4946_v7 }
 0x918   :  { %2958 = vmatpush.bf16.msrb.mxu0 %v4983_v50 }
 0x919   :  { %3024 = vmatpush.bf16.msra.mxu1 %v4920_v25  ;;  %3037 = vmatpush.bf16.msrb.mxu2 %v4969_v49 }
 0x91c   :  { %2959 = vmatpush.bf16.msrb.mxu0 %v5005_v57 }
 0x91d   :  { %3025 = vmatpush.bf16.msra.mxu1 %v4926_v54  ;;  %3038 = vmatpush.bf16.msrb.mxu2 %v4996_v27 }
 0x920   :  { %2960 = vmatpush.bf16.msrb.mxu0 %v5014_v62 }
 0x921   :  { %3026 = vmatpush.bf16.msra.mxu1 %v4929_v40  ;;  %3039 = vmatpush.bf16.msrb.mxu2 %v5007_v0 }
 0x924   :  { %2961 = vmatpush.bf16.msrb.mxu0 %v5033_v21 }
 0x925   :  { %3027 = vmatpush.bf16.msra.mxu1 %v4937_v1  ;;  %3040 = vmatpush.bf16.msrb.mxu2 %v5042_v33 }
 0x928   :  { %2962 = vmatpush.bf16.msrb.mxu0 %v5045_v30 }
 0x929   :  { %3028 = vmatpush.bf16.msra.mxu1 %v4944_v55  ;;  %3041 = vmatpush.bf16.msrb.mxu2 %v5049_v44 }
 0x92c   :  { %2963 = vmatpush.bf16.msrb.mxu0 %v5055_v22 }
 0x92d   :  { %3029 = vmatpush.bf16.msra.mxu1 %v4954_v63  ;;  %3042 = vmatpush.bf16.msrb.mxu2 %v5071_v31 }
 0x930   :  { %2964 = vmatpush.bf16.msrb.mxu0 %v5063_v2 }
 0x931   :  { %3030 = vmatpush.bf16.msra.mxu1 %v4964_v3  ;;  %3043 = vmatpush.bf16.msrb.mxu2 %v5076_v6 }
 0x990   :  { %v2756_v52 = vpop.f32.mrf.mxu0  ;;  %v2769_v25 = vpop.f32.mrf.mxu1 }
 0x991   :  { %v2786_v54 = vadd.f32 %v2756_v52, %v5036_v9  ;;  %v2806_v40 = vadd.f32 %v2769_v25, %v5183_v42 }
 0x993   :  { %v3689_v1 = vmul.f32 -1.442695, %v2786_v54  ;;  %v3690_v55 = vmul.f32 -1.442695, %v2806_v40  ;;  %v5529_v54 = vld [vmem:[#allocation30_spill] sm:$0xff] }
 0x995   :  { %3952 = vpow2.f32 %v3689_v1 }
 0x996   :  { %3954 = vpow2.f32 %v3690_v55 }
 0x997   :  { %v2782_v7 = vpop.f32.mrf.mxu2 }
 0x998   :  { %v2758_v63 = vpop.f32.mrf.mxu0  ;;  %v2771_v49 = vpop.f32.mrf.mxu1  ;;  %v2826_v38 = vadd.f32 %v5206_v60, %v2782_v7 }
 0x99b   :  { %v3953_v27 = vpop.eup %3952 }
 0x99c   :  { %v3955_v0 = vpop.eup %3954  ;;  %v2790_v33 = vadd.f32 1.0, %v3953_v27 }
 0x99d   :  { %v2810_v44 = vadd.f32 1.0, %v3955_v0 }
 0x99e   :  { %3956 = vrcp.f32 %v2790_v33  ;;  %v2802_v53 = vand.u32 2147483648, %v2790_v33  ;;  %v2800_v14 = vand.u32 2147483647, %v2790_v33  ;;  %vm2796_vm2 = vweird.f32 %v2790_v33 }
 0x99f   :  { %3958 = vrcp.f32 %v2810_v44  ;;  %v2784_v3 = vpop.f32.mrf.mxu2  ;;  %v2822_v18 = vand.u32 2147483648, %v2810_v44  ;;  %vm2816_vm6 = vweird.f32 %v2810_v44  ;;  %v2820_v28 = vand.u32 2147483647, %v2810_v44 }
 0x9a0   :  { %v2803_v32 = vor.u32 1.1754944e-38, %v2802_v53  ;;  %vm2801_vm4 = vcmp.eq.f32.partialorder %v2800_v14, 8.507059e+37 }
 0x9a1   :  { %v2823_v5 = vor.u32 1.1754944e-38, %v2822_v18  ;;  %vm2821_vm8 = vcmp.eq.f32.partialorder %v2820_v28, 8.507059e+37 }
 0x9a4   :  { %v3957_v31 = vpop.eup %3956 }
 0x9a5   :  { %v3959_v6 = vpop.eup %3958  ;;  %v2792_v37 = vmul.f32 %v3957_v31, %v2790_v33  ;;  %vm2797_vm1 = vweird.f32 %v3957_v31 }
 0x9a6   :  { %v2812_v9 = vmul.f32 %v3959_v6, %v2810_v44  ;;  %vm2798_vm3 = vmor %vm2796_vm2, %vm2797_vm1  ;;  %vm2817_vm5 = vweird.f32 %v3959_v6 }
 0x9a7   :  { %v2793_v58 = vsub.f32 1.0, %v2792_v37  ;;  %vm2818_vm7 = vmor %vm2816_vm6, %vm2817_vm5 }
 0x9a8   :  { %v2813_v42 = vsub.f32 1.0, %v2812_v9 }
 0x9a9   :  { %v2794_v4 = vmul.f32 %v3957_v31, %v2793_v58 }
 0x9aa   :  { %v2814_v61 = vmul.f32 %v3959_v6, %v2813_v42 }
 0x9ab   :  { %v2795_v48 = vadd.f32 %v3957_v31, %v2794_v4  ;;  %v5530_v4 = vld [vmem:[#allocation29_spill] sm:$0xff] }
 0x9ac   :  { %v2815_v39 = vadd.f32 %v3959_v6, %v2814_v61  ;;  %v1814_v14 = vadd.f32 %v5530_v4, %v5161_v26 }
 0x9ad   :  { %v2799_v10 = vsel %vm2798_vm3, %v3957_v31, %v2795_v48 }
 0x9ae   :  { %v2804_v41 = vsel %vm2801_vm4, %v2803_v32, %v2799_v10  ;;  %v2819_v34 = vsel %vm2818_vm7, %v3959_v6, %v2815_v39 }
 0x9af   :  { %v2827_v47 = vmul.f32 %v2826_v38, %v2804_v41  ;;  %v2824_v15 = vsel %vm2821_vm8, %v2823_v5, %v2819_v34  ;;  %v5531_v38 = vld [vmem:[#allocation26_spill] sm:$0xff] }
 0x9b0   :  { %v2830_v23 = vsub.f32 1.0, %v2824_v15  ;;  %v2832_v11 = vmul.f32 %v2824_v15, %v5320_v20  ;;  %v2184_v39 = vadd.f32 %v5531_v38, %v1814_v14 }
 0x9b1   :  { %v2828_v12 = vadd.f32 %v2827_v47, %v5525_v45 }
 0x9b3   :  { %3960 = vtanh.f32 %v2828_v12 }
 0x9b9   :  { %v3961_v24 = vpop.eup %3960 }
 0x9ba   :  { %v2831_v19 = vmul.f32 %v3961_v24, %v2830_v23 }
 0x9bc   :  { %v5353_v16 = vadd.f32 %v2832_v11, %v2831_v19  ;;  %v5532_v11 = vld [vmem:[#allocation16_spill] sm:$0xff] }
 0x9be   :  { %v2838_v46 = vpack.c.bf16 %v5353_v16, %v5353_v16 }
 0x9c0   :  { %2847 = vmatmul.bf16.vlgmr.msrb.gmra.mxu3 %v2838_v46  ;;  %2860 = vmatmul.bf16.vlgmr.msra.gmra.mxu0 %v2838_v46 }
 0x9c1   :  { %2873 = vmatmul.bf16.vlgmr.msrb.gmra.mxu1 %v2838_v46  ;;  %3049 = vmatpush.bf16.msrb.mxu3 %v4971_v43  ;;  %v1759_v46 = vadd.f32 %v5532_v11, %v5026_v29  ;;  %v5537_v11 = vld [vmem:[#allocation19_spill] sm:$0xff] }
 0x9c3   :  { %v2194_v56 = vadd.f32 %v5533_v13, %v1759_v46 }
 0x9c5   :  { %3050 = vmatpush.bf16.msrb.mxu3 %v4983_v50 }
 0x9c9   :  { %3051 = vmatpush.bf16.msrb.mxu3 %v5005_v57  ;;  %v5528_v57 = vld [vmem:[#allocation25_spill] sm:$0xff] }
 0x9ca   :  { %v1756_v25 = vadd.f32 %v5528_v57, %v5026_v29 }
 0x9cd   :  { %3052 = vmatpush.bf16.msrb.mxu3 %v5014_v62 }
 0x9d1   :  { %3053 = vmatpush.bf16.msrb.mxu3 %v5033_v21  ;;  %v2182_v21 = vadd.f32 %v5529_v54, %v1756_v25 }
 0x9d5   :  { %3054 = vmatpush.bf16.msrb.mxu3 %v5045_v30 }
 0x9d9   :  { %3055 = vmatpush.bf16.msrb.mxu3 %v5055_v22 }
 0x9dd   :  { %3056 = vmatpush.bf16.msrb.mxu3 %v5063_v2 }
 0xa3d   :  { %v2861_v43 = vpop.f32.mrf.mxu0 }
 0xa3e   :  { %v2898_v52 = vadd.f32 %v2861_v43, %v2183_v36  ;;  %v2874_v50 = vpop.f32.mrf.mxu1 }
 0xa3f   :  { %v2918_v61 = vadd.f32 %v5206_v60, %v2874_v50  ;;  %v5534_v50 = vld [vmem:[#allocation22_spill] sm:$0xff] }
 0xa40   :  { %v3692_v62 = vmul.f32 -1.442695, %v2898_v52 }
 0xa42   :  { %3962 = vpow2.f32 %v3692_v62 }
 0xa43   :  { %v2848_v30 = vpop.f32.mrf.mxu3 }
 0xa44   :  { %v2878_v40 = vadd.f32 %v2848_v30, %v2182_v21 }
 0xa45   :  { %v2863_v22 = vpop.f32.mrf.mxu0 }
 0xa46   :  { %v3691_v1 = vmul.f32 -1.442695, %v2878_v40  ;;  %v2876_v2 = vpop.f32.mrf.mxu1 }
 0xa48   :  { %v3963_v55 = vpop.eup %3962  ;;  %3964 = vpow2.f32 %v3691_v1 }
 0xa49   :  { %v2902_v51 = vadd.f32 1.0, %v3963_v55 }
 0xa4b   :  { %v2850_v7 = vpop.f32.mrf.mxu3  ;;  %3966 = vrcp.f32 %v2902_v51  ;;  %v2914_v41 = vand.u32 2147483648, %v2902_v51  ;;  %vm2908_vm14 = vweird.f32 %v2902_v51  ;;  %v2912_v47 = vand.u32 2147483647, %v2902_v51 }
 0xa4d   :  { %v2915_v12 = vor.u32 1.1754944e-38, %v2914_v41  ;;  %vm2913_vm0 = vcmp.eq.f32.partialorder %v2912_v47, 8.507059e+37 }
 0xa4e   :  { %v3965_v63 = vpop.eup %3964 }
 0xa4f   :  { %v2882_v49 = vadd.f32 1.0, %v3965_v63 }
 0xa51   :  { %3968 = vrcp.f32 %v2882_v49  ;;  %v3967_v27 = vpop.eup %3966  ;;  %v2894_v6 = vand.u32 2147483648, %v2882_v49  ;;  %v2892_v9 = vand.u32 2147483647, %v2882_v49  ;;  %vm2888_vm10 = vweird.f32 %v2882_v49 }
 0xa52   :  { %v2904_v0 = vmul.f32 %v3967_v27, %v2902_v51  ;;  %vm2909_vm13 = vweird.f32 %v3967_v27 }
 0xa53   :  { %v2895_v53 = vor.u32 1.1754944e-38, %v2894_v6  ;;  %vm2893_vm12 = vcmp.eq.f32.partialorder %v2892_v9, 8.507059e+37  ;;  %vm2910_vm15 = vmor %vm2908_vm14, %vm2909_vm13 }
 0xa54   :  { %v2905_v3 = vsub.f32 1.0, %v2904_v0 }
 0xa56   :  { %v2906_v58 = vmul.f32 %v3967_v27, %v2905_v3 }
 0xa57   :  { %v3969_v33 = vpop.eup %3968 }
 0xa58   :  { %v2884_v44 = vmul.f32 %v3969_v33, %v2882_v49  ;;  %vm2889_vm9 = vweird.f32 %v3969_v33  ;;  %v2907_v32 = vadd.f32 %v3967_v27, %v2906_v58 }
 0xa59   :  { %vm2890_vm11 = vmor %vm2888_vm10, %vm2889_vm9 }
 0xa5a   :  { %v2885_v31 = vsub.f32 1.0, %v2884_v44  ;;  %v2911_v45 = vsel %vm2910_vm15, %v3967_v27, %v2907_v32 }
 0xa5b   :  { %v2916_v26 = vsel %vm2913_vm0, %v2915_v12, %v2911_v45  ;;  %v3127_v45 = vld [vmem:[%s5472_s11 + $0x78] sm:$0xff]  ;;  %v3126_v12 = vld [vmem:[%s5472_s11 + $0x70] sm:$0xff] }
 0xa5c   :  { %v2886_v37 = vmul.f32 %v3969_v33, %v2885_v31  ;;  %v2922_v34 = vsub.f32 1.0, %v2916_v26  ;;  %v2924_v23 = vmul.f32 %v2916_v26, %v5353_v16  ;;  %3132 = vmatpush.msra.mxu0 %v3127_v45  ;;  %v3125_v26 = vld [vmem:[%s5472_s11 + $0x68] sm:$0xff]  ;;  %v2558_v45 = vadd.f32 %v5252_v17, %v5215_v8 }
 0xa5e   :  { %v2887_v42 = vadd.f32 %v3969_v33, %v2886_v37  ;;  %3133 = vmatpush.msra.mxu0 %v3126_v12 }
 0xa60   :  { %v2891_v48 = vsel %vm2890_vm11, %v3969_v33, %v2887_v42  ;;  %3134 = vmatpush.msra.mxu0 %v3125_v26 }
 0xa61   :  { %v2896_v10 = vsel %vm2893_vm12, %v2895_v53, %v2891_v48 }
 0xa62   :  { %v2919_v18 = vmul.f32 %v2918_v61, %v2896_v10  ;;  %v5535_v61 = vld [vmem:[#allocation28_spill] sm:$0xff] }
 0xa64   :  { %v2920_v28 = vadd.f32 %v2919_v18, %v2184_v39 }
 0xa66   :  { %3970 = vtanh.f32 %v2920_v28 }
 0xa6c   :  { %v3971_v5 = vpop.eup %3970 }
 0xa6d   :  { %v2923_v15 = vmul.f32 %v3971_v5, %v2922_v34  ;;  %v3124_v34 = vld [vmem:[%s5472_s11 + $0x60] sm:$0xff]  ;;  %v5536_v5 = vld [vmem:[#allocation18_spill] sm:$0xff] }
 0xa6e   :  { %3135 = vmatpush.msra.mxu0 %v3124_v34  ;;  %v2650_v34 = vadd.f32 %v5287_v35, %v2558_v45  ;;  %v3831_v35 = vld [vmem:[%s5473_s12] ss:$0 sm:$0xff] }
 0xa6f   :  { %v5376_v24 = vadd.f32 %v2924_v23, %v2923_v15  ;;  %v1761_v15 = vadd.f32 %v5536_v5, %v5026_v29  ;;  %v3123_v23 = vld [vmem:[%s5472_s11 + $0x58] sm:$0xff]  ;;  %v3120_v29 = vld [vmem:[%s5472_s11 + $0x40] sm:$0xff] }
 0xa70   :  { %3136 = vmatpush.msra.mxu0 %v3123_v23 }
 0xa71   :  { %v2930_v19 = vpack.c.bf16 %v5376_v24, %v5376_v24  ;;  %v2206_v46 = vadd.f32 %v5537_v11, %v1761_v15  ;;  %v2742_v15 = vadd.f32 %v5320_v20, %v2650_v34 }
 0xa73   :  { %2939 = vmatmul.bf16.vlgmr.msra.gmra.mxu2 %v2930_v19  ;;  %2952 = vmatmul.bf16.vlgmr.msra.gmra.mxu3 %v2930_v19 }
 0xa74   :  { %2965 = vmatmul.bf16.vlgmr.msrb.gmra.mxu0 %v2930_v19  ;;  %v3122_v19 = vld [vmem:[%s5472_s11 + $0x50] sm:$0xff] }
 0xa75   :  { %3137 = vmatpush.msra.mxu0 %v3122_v19  ;;  %v2834_v19 = vadd.f32 %v5353_v16, %v2742_v15 }
 0xaf1   :  { %v2966_v59 = vpop.f32.mrf.mxu0 }
 0xaf2   :  { %v3010_v37 = vadd.f32 %v5206_v60, %v2966_v59  ;;  %v3121_v59 = vld [vmem:[%s5472_s11 + $0x48] sm:$0xff] }
 0xaf3   :  { %3138 = vmatpush.msra.mxu0 %v3121_v59 }
 0xaf5   :  { %3139 = vmatpush.msra.mxu0 %v3120_v29 }
 0xaf6   :  { %v2940_v36 = vpop.f32.mrf.mxu2  ;;  %v2953_v43 = vpop.f32.mrf.mxu3 }
 0xaf7   :  { %v2970_v52 = vadd.f32 %v2940_v36, %v2194_v56  ;;  %v2990_v57 = vadd.f32 %v2953_v43, %v5534_v50  ;;  %v3119_v43 = vld [vmem:[%s5472_s11 + $0x38] sm:$0xff] }
 0xaf8   :  { %3140 = vmatpush.msra.mxu0 %v3119_v43 }
 0xaf9   :  { %v3693_v25 = vmul.f32 -1.442695, %v2970_v52  ;;  %v3694_v62 = vmul.f32 -1.442695, %v2990_v57  ;;  %v2968_v54 = vpop.f32.mrf.mxu0  ;;  %v3118_v52 = vld [vmem:[%s5472_s11 + $0x30] sm:$0xff]  ;;  %v5538_v57 = vld [vmem:[#allocation24_spill] sm:$0xff] }
 0xafa   :  { %3141 = vmatpush.msra.mxu0 %v3118_v52  ;;  %v3117_v54 = vld [vmem:[%s5472_s11 + $0x28] sm:$0xff] }
 0xafb   :  { %3972 = vpow2.f32 %v3693_v25 }
 0xafc   :  { %3974 = vpow2.f32 %v3694_v62  ;;  %3142 = vmatpush.msra.mxu0 %v3117_v54 }
 0xafe   :  { %v2942_v21 = vpop.f32.mrf.mxu2  ;;  %v2955_v30 = vpop.f32.mrf.mxu3 }
 0xb01   :  { %v3973_v40 = vpop.eup %3972 }
 0xb02   :  { %v3975_v22 = vpop.eup %3974  ;;  %v2974_v1 = vadd.f32 1.0, %v3973_v40  ;;  %v3116_v40 = vld [vmem:[%s5472_s11 + $0x20] sm:$0xff] }
 0xb03   :  { %v2994_v2 = vadd.f32 1.0, %v3975_v22  ;;  %3143 = vmatpush.msra.mxu0 %v3116_v40 }
 0xb04   :  { %3976 = vrcp.f32 %v2974_v1  ;;  %v2986_v27 = vand.u32 2147483648, %v2974_v1  ;;  %v2984_v44 = vand.u32 2147483647, %v2974_v1  ;;  %vm2980_vm2 = vweird.f32 %v2974_v1 }
 0xb05   :  { %3978 = vrcp.f32 %v2994_v2  ;;  %v3006_v4 = vand.u32 2147483648, %v2994_v2  ;;  %vm3000_vm6 = vweird.f32 %v2994_v2  ;;  %v3004_v14 = vand.u32 2147483647, %v2994_v2 }
 0xb06   :  { %v2987_v6 = vor.u32 1.1754944e-38, %v2986_v27  ;;  %vm2985_vm4 = vcmp.eq.f32.partialorder %v2984_v44, 8.507059e+37 }
 0xb07   :  { %v3007_v10 = vor.u32 1.1754944e-38, %v3006_v4  ;;  %vm3005_vm8 = vcmp.eq.f32.partialorder %v3004_v14, 8.507059e+37 }
 0xb0a   :  { %v3977_v55 = vpop.eup %3976 }
 0xb0b   :  { %v3979_v51 = vpop.eup %3978  ;;  %v2976_v7 = vmul.f32 %v3977_v55, %v2974_v1  ;;  %vm2981_vm1 = vweird.f32 %v3977_v55  ;;  %v3115_v1 = vld [vmem:[%s5472_s11 + $0x18] sm:$0xff] }
 0xb0c   :  { %v2996_v63 = vmul.f32 %v3979_v51, %v2994_v2  ;;  %vm2982_vm3 = vmor %vm2980_vm2, %vm2981_vm1  ;;  %vm3001_vm5 = vweird.f32 %v3979_v51  ;;  %3144 = vmatpush.msra.mxu0 %v3115_v1  ;;  %vm3152_vm1 = vcmask 31744  }
 0xb0d   :  { %v2977_v49 = vsub.f32 1.0, %v2976_v7  ;;  %vm3002_vm7 = vmor %vm3000_vm6, %vm3001_vm5 }
 0xb0e   :  { %v2997_v0 = vsub.f32 1.0, %v2996_v63 }
 0xb0f   :  { %v2978_v33 = vmul.f32 %v3977_v55, %v2977_v49  ;;  %v3112_v49 = vld [vmem:[%s5472_s11] sm:$0xff] }
 0xb10   :  { %v2998_v3 = vmul.f32 %v3979_v51, %v2997_v0 }
 0xb11   :  { %v2979_v31 = vadd.f32 %v3977_v55, %v2978_v33 }
 0xb12   :  { %v2999_v42 = vadd.f32 %v3979_v51, %v2998_v3 }
 0xb13   :  { %v2983_v9 = vsel %vm2982_vm3, %v3977_v55, %v2979_v31  ;;  %v3114_v55 = vld [vmem:[%s5472_s11 + $0x10] sm:$0xff] }
 0xb14   :  { %v2988_v58 = vsel %vm2985_vm4, %v2987_v6, %v2983_v9  ;;  %v3003_v32 = vsel %vm3002_vm7, %v3979_v51, %v2999_v42  ;;  %v3113_v51 = vld [vmem:[%s5472_s11 + $0x8] sm:$0xff]  ;;  %3145 = vmatpush.msra.mxu0 %v3114_v55 }
 0xb15   :  { %v3011_v53 = vmul.f32 %v3010_v37, %v2988_v58  ;;  %v3008_v38 = vsel %vm3005_vm8, %v3007_v10, %v3003_v32 }
 0xb16   :  { %v3014_v39 = vsub.f32 1.0, %v3008_v38  ;;  %v3016_v18 = vmul.f32 %v3008_v38, %v5376_v24  ;;  %3146 = vmatpush.msra.mxu0 %v3113_v51 }
 0xb17   :  { %v3012_v48 = vadd.f32 %v3011_v53, %v5535_v61  ;;  %v3993_v61 = vld [vmem:[%s5471_s10] ss:$0 sm:$0xff] }
 0xb18   :  { %3147 = vmatpush.msra.mxu0 %v3112_v49 }
 0xb19   :  { %3980 = vtanh.f32 %v3012_v48 }
 0xb1f   :  { %v3981_v41 = vpop.eup %3980 }
 0xb20   :  { %v3015_v60 = vmul.f32 %v3981_v41, %v3014_v39 }
 0xb22   :  { %v5387_v47 = vadd.f32 %v3016_v18, %v3015_v60  ;;  %v5539_v18 = vld [vmem:[#allocation23_spill] sm:$0xff] }
 0xb24   :  { %v3022_v28 = vpack.c.bf16 %v5387_v47, %v5387_v47 }
 0xb26   :  { %3031 = vmatmul.bf16.vlgmr.msra.gmra.mxu1 %v3022_v28  ;;  %3044 = vmatmul.bf16.vlgmr.msrb.gmra.mxu2 %v3022_v28 }
 0xb27   :  { %3057 = vmatmul.bf16.vlgmr.msrb.gmra.mxu3 %v3022_v28 }
 0xba3   :  { %v3032_v13 = vpop.f32.mrf.mxu1 }
 0xba4   :  { %v3062_v56 = vadd.f32 %v3032_v13, %v2206_v46  ;;  %v2926_v13 = vadd.f32 %v5376_v24, %v2834_v19 }
 0xba6   :  { %v3695_v36 = vmul.f32 -1.442695, %v3062_v56  ;;  %v3018_v17 = vadd.f32 %v5387_v47, %v2926_v13 }
 0xba8   :  { %3982 = vpow2.f32 %v3695_v36 }
 0xba9   :  { %v3045_v50 = vpop.f32.mrf.mxu2 }
 0xbaa   :  { %v3082_v25 = vadd.f32 %v3045_v50, %v5538_v57  ;;  %v3058_v62 = vpop.f32.mrf.mxu3 }
 0xbab   :  { %v3034_v21 = vpop.f32.mrf.mxu1  ;;  %v3102_v48 = vadd.f32 %v3993_v61, %v3058_v62 }
 0xbac   :  { %v3696_v30 = vmul.f32 -1.442695, %v3082_v25 }
 0xbae   :  { %v3983_v22 = vpop.eup %3982  ;;  %3984 = vpow2.f32 %v3696_v30 }
 0xbaf   :  { %v3066_v2 = vadd.f32 1.0, %v3983_v22 }
 0xbb1   :  { %3986 = vrcp.f32 %v3066_v2  ;;  %v3047_v7 = vpop.f32.mrf.mxu2  ;;  %v3078_v31 = vand.u32 2147483648, %v3066_v2  ;;  %v3076_v37 = vand.u32 2147483647, %v3066_v2  ;;  %vm3072_vm10 = vweird.f32 %v3066_v2 }
 0xbb2   :  { %v3060_v63 = vpop.f32.mrf.mxu3 }
 0xbb3   :  { %v3079_v53 = vor.u32 1.1754944e-38, %v3078_v31  ;;  %vm3077_vm12 = vcmp.eq.f32.partialorder %v3076_v37, 8.507059e+37 }
 0xbb4   :  { %v3985_v27 = vpop.eup %3984 }
 0xbb5   :  { %v3086_v0 = vadd.f32 1.0, %v3985_v27 }
 0xbb7   :  { %v3987_v33 = vpop.eup %3986  ;;  %3988 = vrcp.f32 %v3086_v0  ;;  %v3098_v38 = vand.u32 2147483648, %v3086_v0  ;;  %v3096_v41 = vand.u32 2147483647, %v3086_v0  ;;  %vm3092_vm14 = vweird.f32 %v3086_v0 }
 0xbb8   :  { %v3068_v44 = vmul.f32 %v3987_v33, %v3066_v2  ;;  %vm3073_vm9 = vweird.f32 %v3987_v33 }
 0xbb9   :  { %vm3074_vm11 = vmor %vm3072_vm10, %vm3073_vm9  ;;  %v3099_v12 = vor.u32 1.1754944e-38, %v3098_v38  ;;  %vm3097_vm0 = vcmp.eq.f32.partialorder %v3096_v41, 8.507059e+37 }
 0xbba   :  { %v3069_v3 = vsub.f32 1.0, %v3068_v44 }
 0xbbc   :  { %v3070_v6 = vmul.f32 %v3987_v33, %v3069_v3 }
 0xbbd   :  { %v3989_v9 = vpop.eup %3988 }
 0xbbe   :  { %v3088_v58 = vmul.f32 %v3989_v9, %v3086_v0  ;;  %v3071_v42 = vadd.f32 %v3987_v33, %v3070_v6  ;;  %vm3093_vm13 = vweird.f32 %v3989_v9 }
 0xbbf   :  { %vm3094_vm15 = vmor %vm3092_vm14, %vm3093_vm13 }
 0xbc0   :  { %v3089_v4 = vsub.f32 1.0, %v3088_v58  ;;  %v3075_v14 = vsel %vm3074_vm11, %v3987_v33, %v3071_v42 }
 0xbc1   :  { %v3080_v32 = vsel %vm3077_vm12, %v3079_v53, %v3075_v14 }
 0xbc2   :  { %v3090_v10 = vmul.f32 %v3989_v9, %v3089_v4  ;;  %v3103_v39 = vmul.f32 %v3102_v48, %v3080_v32 }
 0xbc4   :  { %v3091_v60 = vadd.f32 %v3989_v9, %v3090_v10  ;;  %v3104_v28 = vadd.f32 %v3103_v39, %v5539_v18 }
 0xbc6   :  { %v3095_v26 = vsel %vm3094_vm15, %v3989_v9, %v3091_v60  ;;  %3990 = vtanh.f32 %v3104_v28 }
 0xbc7   :  { %v3100_v5 = vsel %vm3097_vm0, %v3099_v12, %v3095_v26 }
 0xbc8   :  { %v3106_v23 = vsub.f32 1.0, %v3100_v5  ;;  %v3108_v59 = vmul.f32 %v3100_v5, %v5387_v47 }
 0xbcc   :  { %v3991_v11 = vpop.eup %3990 }
 0xbcd   :  { %v3107_v46 = vmul.f32 %v3991_v11, %v3106_v23 }
 0xbcf   :  { %v3109_v8 = vadd.f32 %v3108_v59, %v3107_v46 }
 0xbd1   :  { %v3110_v56 = vadd.f32 %v3109_v8, %v3018_v17 }
 0xbd3   :  { %v3111_v29 = vmul.f32 0.125, %v3110_v56 }
 0xbd5   :  { %3148 = vmatmul.f32.vlgmr.msra.gmra.mxu0 %v3111_v29 }
 0xc52   :  { %v3149_v20 = vpop.f32.mrf.mxu0 }
 0xc53   :  { %v3150_v36 = vadd.f32 %v3831_v35, %v3149_v20 }
 0xc55   :  { %3153 = vst.msk [vmem:[%s5474_s13] sm:$0xff] %vm3152_vm1, %v3150_v36 }
 0xc56   :  { %3158 = vsyncpa [#allocation6], 1 }
 0xc57   :  { %3159 = vsyncpa [#allocation8], 1 }
 0xc58   :  { %3160 = vsyncpa [#allocation11], 1 }

</bundles_post_ra>
